<compile_context>
chip_gen: v7x
topology: tpu7x:2x2x1
jax: 0.10.0
libtpu: 0.0.40
codegen_flags: <defaults>
</compile_context>

<pallas_src>
import jax
import jax.numpy as jnp
from jax.experimental import pallas as pl
from jax.experimental.pallas import tpu as pltpu

NUM_CLASSES = 10
LANE = 128


def mlp_kernel(x_ref, w1_ref, b1_ref, w2_ref, b2_ref,
               w3_ref, b3_ref, w4_ref, b4_ref, o_ref):
    # fc1..fc3 + ReLU. bf16 operands, f32 accumulation. Intermediate
    # activations are re-cast to bf16 so every matmul stays on the fast
    # bf16 MXU path. Biases are (1, N) f32 and broadcast over the batch tile.
    h = jnp.dot(x_ref[...], w1_ref[...], preferred_element_type=jnp.float32)
    h = jnp.maximum(h + b1_ref[...], 0.0).astype(jnp.bfloat16)

    h = jnp.dot(h, w2_ref[...], preferred_element_type=jnp.float32)
    h = jnp.maximum(h + b2_ref[...], 0.0).astype(jnp.bfloat16)

    h = jnp.dot(h, w3_ref[...], preferred_element_type=jnp.float32)
    h = jnp.maximum(h + b3_ref[...], 0.0).astype(jnp.bfloat16)

    # fc4: lane-padded to 128 output columns (cols >= 10 have zero W / zero b).
    logits = jnp.dot(h, w4_ref[...], preferred_element_type=jnp.float32)
    logits = logits + b4_ref[...]

    # Numerically stable log_softmax over the first NUM_CLASSES columns only;
    # padded columns are excluded from both the max and the sum.
    col = jax.lax.broadcasted_iota(jnp.int32, logits.shape, 1)
    valid = col < NUM_CLASSES
    masked = jnp.where(valid, logits, jnp.float32(-1e30))
    m = jnp.max(masked, axis=1, keepdims=True)
    z = logits - m
    e = jnp.where(valid, jnp.exp(z), 0.0)
    lse = jnp.log(jnp.sum(e, axis=1, keepdims=True))
    o_ref[...] = (z - lse).astype(o_ref.dtype)


def _round_up(n, m):
    return (n + m - 1) // m * m


def mlp_forward(x, params, *, batch_tile=256):
    (w1, b1), (w2, b2), (w3, b3), (w4, b4) = params
    B, D_in = x.shape
    assert D_in == w1.shape[0]

    D_in_p = _round_up(D_in, LANE)      # 784 -> 896 (7 * 128), dense K-tiling
    D_out = w4.shape[1]                 # 10
    D_out_p = LANE                      # lane-dense output slab (128 cols)
    B_p = _round_up(B, batch_tile)      # pad batch to a whole number of tiles

    # x: zero-pad batch and features, cast to bf16 (halves streamed HBM bytes).
    x_p = jnp.zeros((B_p, D_in_p), jnp.bfloat16).at[:B, :D_in].set(
        x.astype(jnp.bfloat16))

    # Weights: bf16; w1 padded with zero rows (K), w4/b4 padded with zero cols.
    w1_p = jnp.zeros((D_in_p, w1.shape[1]), jnp.bfloat16).at[:D_in, :].set(
        w1.astype(jnp.bfloat16))
    w2_p = w2.astype(jnp.bfloat16)
    w3_p = w3.astype(jnp.bfloat16)
    w4_p = jnp.zeros((w4.shape[0], D_out_p), jnp.bfloat16).at[:, :D_out].set(
        w4.astype(jnp.bfloat16))

    # Biases stay f32 (tiny) and 2-D so they broadcast over the batch tile.
    b1_p = b1.reshape(1, -1).astype(jnp.float32)
    b2_p = b2.reshape(1, -1).astype(jnp.float32)
    b3_p = b3.reshape(1, -1).astype(jnp.float32)
    b4_p = jnp.zeros((1, D_out_p), jnp.float32).at[:, :D_out].set(
        b4.reshape(1, -1).astype(jnp.float32))

    full = lambda arr: pl.BlockSpec(arr.shape, lambda i: (0, 0))

    out = pl.pallas_call(
        mlp_kernel,
        out_shape=jax.ShapeDtypeStruct((B_p, D_out_p), jnp.float32),
        grid_spec=pltpu.PrefetchScalarGridSpec(
            num_scalar_prefetch=0,
            grid=(B_p // batch_tile,),
            in_specs=[
                pl.BlockSpec((batch_tile, D_in_p), lambda i: (i, 0)),  # x tile
                full(w1_p), full(b1_p),
                full(w2_p), full(b2_p),
                full(w3_p), full(b3_p),
                full(w4_p), full(b4_p),
            ],
            out_specs=pl.BlockSpec((batch_tile, D_out_p), lambda i: (i, 0)),
        ),
        compiler_params=pltpu.CompilerParams(
            dimension_semantics=("parallel",)),
    )(x_p, w1_p, b1_p, w2_p, b2_p, w3_p, b3_p, w4_p, b4_p)

    # Drop batch padding and the 118 padded logit columns.
    return out[:B, :D_out]


def init_params(key):
    """Deterministic init mimicking nn.Linear (uniform ±1/sqrt(fan_in))."""
    sizes = [(28 * 28, 64), (64, 64), (64, 64), (64, 10)]
    params = []
    for (fan_in, fan_out) in sizes:
        key, kw, kb = jax.random.split(key, 3)
        bound = 1.0 / jnp.sqrt(fan_in)
        w = jax.random.uniform(kw, (fan_in, fan_out), jnp.float32, -bound, bound)
        b = jax.random.uniform(kb, (fan_out,), jnp.float32, -bound, bound)
        params.append((w, b))
    return params


def reference_forward(x, params):
    """Pure-JAX reference emulating the kernel's bf16 quantization points."""
    q = lambda a: a.astype(jnp.bfloat16).astype(jnp.float32)
    h = q(x)
    for i, (w, b) in enumerate(params):
        h = jnp.dot(h, q(w), preferred_element_type=jnp.float32) + b
        if i < len(params) - 1:
            h = q(jnp.maximum(h, 0.0))
    return jax.nn.log_softmax(h, axis=1)


if __name__ == "__main__":
    key = jax.random.PRNGKey(0)
    kx, kp = jax.random.split(key)
    # B deliberately not a multiple of batch_tile to exercise batch padding;
    # padded B = 1024 -> 4 grid steps (keeps both v7x TensorCores busy).
    B = 1000
    x = jax.random.normal(kx, (B, 28 * 28), jnp.float32)
    params = init_params(kp)

    out = jax.block_until_ready(mlp_forward(x, params, batch_tile=256))
    ref = reference_forward(x, params)

    assert out.shape == (B, 10)
    assert bool(jnp.all(jnp.isfinite(out)))
    assert jnp.allclose(out, ref, atol=1e-3, rtol=1e-3), float(
        jnp.max(jnp.abs(out - ref)))
    print("KERNEL_OK")
</pallas_src>

<mosaic_0001>
module attributes {stable_mosaic.version = 11 : i64} {
  func.func @mlp_kernel(%arg0: i32, %arg1: memref<256x896xbf16, #tpu.memory_space<vmem>>, %arg2: memref<896x64xbf16, #tpu.memory_space<vmem>>, %arg3: memref<1x64xf32, #tpu.memory_space<vmem>>, %arg4: memref<64x64xbf16, #tpu.memory_space<vmem>>, %arg5: memref<1x64xf32, #tpu.memory_space<vmem>>, %arg6: memref<64x64xbf16, #tpu.memory_space<vmem>>, %arg7: memref<1x64xf32, #tpu.memory_space<vmem>>, %arg8: memref<64x128xbf16, #tpu.memory_space<vmem>>, %arg9: memref<1x128xf32, #tpu.memory_space<vmem>>, %arg10: memref<256x128xf32, #tpu.memory_space<vmem>>) attributes {dimension_semantics = [#tpu.dimension_semantics<parallel>], iteration_bounds = array<i64: 4>, scalar_prefetch = 0 : i64, scratch_operands = 0 : i64, tpu.core_type = #tpu.core_type<tc>, window_params = [{transform_indices = @transform_0, window_bounds = array<i64: 256, 896>}, {pipeline_mode = #tpu.pipeline_mode<synchronous>, transform_indices = @transform_1, window_bounds = array<i64: 896, 64>}, {pipeline_mode = #tpu.pipeline_mode<synchronous>, transform_indices = @transform_2, window_bounds = array<i64: 1, 64>}, {pipeline_mode = #tpu.pipeline_mode<synchronous>, transform_indices = @transform_3, window_bounds = array<i64: 64, 64>}, {pipeline_mode = #tpu.pipeline_mode<synchronous>, transform_indices = @transform_4, window_bounds = array<i64: 1, 64>}, {pipeline_mode = #tpu.pipeline_mode<synchronous>, transform_indices = @transform_5, window_bounds = array<i64: 64, 64>}, {pipeline_mode = #tpu.pipeline_mode<synchronous>, transform_indices = @transform_6, window_bounds = array<i64: 1, 64>}, {pipeline_mode = #tpu.pipeline_mode<synchronous>, transform_indices = @transform_7, window_bounds = array<i64: 64, 128>}, {pipeline_mode = #tpu.pipeline_mode<synchronous>, transform_indices = @transform_8, window_bounds = array<i64: 1, 128>}, {transform_indices = @transform_9, window_bounds = array<i64: 256, 128>}]} {
    %c0 = arith.constant 0 : index
    %c0_0 = arith.constant 0 : index
    %0 = vector.load %arg1[%c0, %c0_0] : memref<256x896xbf16, #tpu.memory_space<vmem>>, vector<256x896xbf16>
    %c0_1 = arith.constant 0 : index
    %c0_2 = arith.constant 0 : index
    %1 = vector.load %arg2[%c0_1, %c0_2] : memref<896x64xbf16, #tpu.memory_space<vmem>>, vector<896x64xbf16>
    %cst = arith.constant dense<0.000000e+00> : vector<256x64xf32>
    %2 = tpu.matmul %0, %1, %cst {dimension_numbers = #tpu.dot_dimension_numbers<[1], [0], [0], [1], [0, 0, 1, 1], [], []>} : vector<256x896xbf16>, vector<896x64xbf16>, vector<256x64xf32> -> vector<256x64xf32>
    %c0_3 = arith.constant 0 : index
    %c0_4 = arith.constant 0 : index
    %3 = vector.load %arg3[%c0_3, %c0_4] : memref<1x64xf32, #tpu.memory_space<vmem>>, vector<1x64xf32>
    %4 = vector.broadcast %3 : vector<1x64xf32> to vector<256x64xf32>
    %5 = arith.addf %2, %4 : vector<256x64xf32>
    %cst_5 = arith.constant 0.000000e+00 : f32
    %6 = vector.broadcast %cst_5 : f32 to vector<256x64xf32>
    %7 = arith.maximumf %5, %6 : vector<256x64xf32>
    %8 = arith.truncf %7 : vector<256x64xf32> to vector<256x64xbf16>
    %c0_6 = arith.constant 0 : index
    %c0_7 = arith.constant 0 : index
    %9 = vector.load %arg4[%c0_6, %c0_7] : memref<64x64xbf16, #tpu.memory_space<vmem>>, vector<64x64xbf16>
    %cst_8 = arith.constant dense<0.000000e+00> : vector<256x64xf32>
    %10 = tpu.matmul %8, %9, %cst_8 {dimension_numbers = #tpu.dot_dimension_numbers<[1], [0], [0], [1], [0, 0, 1, 1], [], []>} : vector<256x64xbf16>, vector<64x64xbf16>, vector<256x64xf32> -> vector<256x64xf32>
    %c0_9 = arith.constant 0 : index
    %c0_10 = arith.constant 0 : index
    %11 = vector.load %arg5[%c0_9, %c0_10] : memref<1x64xf32, #tpu.memory_space<vmem>>, vector<1x64xf32>
    %12 = vector.broadcast %11 : vector<1x64xf32> to vector<256x64xf32>
    %13 = arith.addf %10, %12 : vector<256x64xf32>
    %cst_11 = arith.constant 0.000000e+00 : f32
    %14 = vector.broadcast %cst_11 : f32 to vector<256x64xf32>
    %15 = arith.maximumf %13, %14 : vector<256x64xf32>
    %16 = arith.truncf %15 : vector<256x64xf32> to vector<256x64xbf16>
    %c0_12 = arith.constant 0 : index
    %c0_13 = arith.constant 0 : index
    %17 = vector.load %arg6[%c0_12, %c0_13] : memref<64x64xbf16, #tpu.memory_space<vmem>>, vector<64x64xbf16>
    %cst_14 = arith.constant dense<0.000000e+00> : vector<256x64xf32>
    %18 = tpu.matmul %16, %17, %cst_14 {dimension_numbers = #tpu.dot_dimension_numbers<[1], [0], [0], [1], [0, 0, 1, 1], [], []>} : vector<256x64xbf16>, vector<64x64xbf16>, vector<256x64xf32> -> vector<256x64xf32>
    %c0_15 = arith.constant 0 : index
    %c0_16 = arith.constant 0 : index
    %19 = vector.load %arg7[%c0_15, %c0_16] : memref<1x64xf32, #tpu.memory_space<vmem>>, vector<1x64xf32>
    %20 = vector.broadcast %19 : vector<1x64xf32> to vector<256x64xf32>
    %21 = arith.addf %18, %20 : vector<256x64xf32>
    %cst_17 = arith.constant 0.000000e+00 : f32
    %22 = vector.broadcast %cst_17 : f32 to vector<256x64xf32>
    %23 = arith.maximumf %21, %22 : vector<256x64xf32>
    %24 = arith.truncf %23 : vector<256x64xf32> to vector<256x64xbf16>
    %c0_18 = arith.constant 0 : index
    %c0_19 = arith.constant 0 : index
    %25 = vector.load %arg8[%c0_18, %c0_19] : memref<64x128xbf16, #tpu.memory_space<vmem>>, vector<64x128xbf16>
    %cst_20 = arith.constant dense<0.000000e+00> : vector<256x128xf32>
    %26 = tpu.matmul %24, %25, %cst_20 {dimension_numbers = #tpu.dot_dimension_numbers<[1], [0], [0], [1], [0, 0, 1, 1], [], []>} : vector<256x64xbf16>, vector<64x128xbf16>, vector<256x128xf32> -> vector<256x128xf32>
    %c0_21 = arith.constant 0 : index
    %c0_22 = arith.constant 0 : index
    %27 = vector.load %arg9[%c0_21, %c0_22] : memref<1x128xf32, #tpu.memory_space<vmem>>, vector<1x128xf32>
    %28 = vector.broadcast %27 : vector<1x128xf32> to vector<256x128xf32>
    %29 = arith.addf %26, %28 : vector<256x128xf32>
    %30 = tpu.iota {dimensions = array<i32: 1>} : vector<256x128xi32>
    %c10_i32 = arith.constant 10 : i32
    %31 = vector.broadcast %c10_i32 : i32 to vector<256x128xi32>
    %32 = arith.cmpi slt, %30, %31 : vector<256x128xi32>
    %cst_23 = arith.constant -1.000000e+30 : f32
    %33 = vector.broadcast %cst_23 : f32 to vector<256x128xf32>
    %34 = arith.select %32, %29, %33 : vector<256x128xi1>, vector<256x128xf32>
    %cst_24 = arith.constant dense<0xFF800000> : vector<256xf32>
    %35 = vector.multi_reduction <maximumf>, %34, %cst_24 [1] : vector<256x128xf32> to vector<256xf32>
    %36 = vector.shape_cast %35 : vector<256xf32> to vector<256x1xf32>
    %37 = vector.broadcast %36 : vector<256x1xf32> to vector<256x128xf32>
    %38 = arith.subf %29, %37 : vector<256x128xf32>
    %39 = math.exp %38 : vector<256x128xf32>
    %cst_25 = arith.constant 0.000000e+00 : f32
    %40 = vector.broadcast %cst_25 : f32 to vector<256x128xf32>
    %41 = arith.select %32, %39, %40 : vector<256x128xi1>, vector<256x128xf32>
    %cst_26 = arith.constant dense<0.000000e+00> : vector<256xf32>
    %42 = vector.multi_reduction <add>, %41, %cst_26 [1] : vector<256x128xf32> to vector<256xf32>
    %43 = vector.shape_cast %42 : vector<256xf32> to vector<256x1xf32>
    %44 = math.log %43 : vector<256x1xf32>
    %45 = vector.broadcast %44 : vector<256x1xf32> to vector<256x128xf32>
    %46 = arith.subf %38, %45 : vector<256x128xf32>
    %c0_27 = arith.constant 0 : index
    %c0_28 = arith.constant 0 : index
    %47 = vector.load %arg10[%c0_27, %c0_28] : memref<256x128xf32, #tpu.memory_space<vmem>>, vector<256x128xf32>
    tpu.vector_store %arg10[%c0_27, %c0_28], %46 {strides = array<i32>} : memref<256x128xf32, #tpu.memory_space<vmem>>, vector<256x128xf32>,
    return
  }
  func.func @transform_0(%arg0: i32) -> (i32, i32) {
    %c0_i32 = arith.constant 0 : i32
    %c0_i32_0 = arith.constant 0 : i32
    return %arg0, %c0_i32 : i32, i32
  }
  func.func @transform_1(%arg0: i32) -> (i32, i32) {
    %c0_i32 = arith.constant 0 : i32
    %c0_i32_0 = arith.constant 0 : i32
    %c0_i32_1 = arith.constant 0 : i32
    return %c0_i32, %c0_i32_0 : i32, i32
  }
  func.func @transform_2(%arg0: i32) -> (i32, i32) {
    %c0_i32 = arith.constant 0 : i32
    %c0_i32_0 = arith.constant 0 : i32
    %c0_i32_1 = arith.constant 0 : i32
    return %c0_i32, %c0_i32_0 : i32, i32
  }
  func.func @transform_3(%arg0: i32) -> (i32, i32) {
    %c0_i32 = arith.constant 0 : i32
    %c0_i32_0 = arith.constant 0 : i32
    %c0_i32_1 = arith.constant 0 : i32
    return %c0_i32, %c0_i32_0 : i32, i32
  }
  func.func @transform_4(%arg0: i32) -> (i32, i32) {
    %c0_i32 = arith.constant 0 : i32
    %c0_i32_0 = arith.constant 0 : i32
    %c0_i32_1 = arith.constant 0 : i32
    return %c0_i32, %c0_i32_0 : i32, i32
  }
  func.func @transform_5(%arg0: i32) -> (i32, i32) {
    %c0_i32 = arith.constant 0 : i32
    %c0_i32_0 = arith.constant 0 : i32
    %c0_i32_1 = arith.constant 0 : i32
    return %c0_i32, %c0_i32_0 : i32, i32
  }
  func.func @transform_6(%arg0: i32) -> (i32, i32) {
    %c0_i32 = arith.constant 0 : i32
    %c0_i32_0 = arith.constant 0 : i32
    %c0_i32_1 = arith.constant 0 : i32
    return %c0_i32, %c0_i32_0 : i32, i32
  }
  func.func @transform_7(%arg0: i32) -> (i32, i32) {
    %c0_i32 = arith.constant 0 : i32
    %c0_i32_0 = arith.constant 0 : i32
    %c0_i32_1 = arith.constant 0 : i32
    return %c0_i32, %c0_i32_0 : i32, i32
  }
  func.func @transform_8(%arg0: i32) -> (i32, i32) {
    %c0_i32 = arith.constant 0 : i32
    %c0_i32_0 = arith.constant 0 : i32
    %c0_i32_1 = arith.constant 0 : i32
    return %c0_i32, %c0_i32_0 : i32, i32
  }
  func.func @transform_9(%arg0: i32) -> (i32, i32) {
    %c0_i32 = arith.constant 0 : i32
    %c0_i32_0 = arith.constant 0 : i32
    return %arg0, %c0_i32 : i32, i32
  }
}

</mosaic_0001>

<bundles_post_ra>
// kernel: tpu_custom_call.1
= control target key start
LH: loop header
LB: loop body
LE: loop exit
PB: predicated region body
PF: predicated region fallthrough
CT: control target
= control target key end

     0   :  { %s6819_s0 = inlined_call_operand.hbm [shape: bf16[1024,896], index: 0, kind: input, shape index: {}]   ;;  %s6820_s1 = inlined_call_operand.vmem [shape: bf16[896,64], index: 1, kind: input, shape index: {}]   ;;  %s6821_s2 = inlined_call_operand.hbm [shape: f32[1,64], index: 2, kind: input, shape index: {}]   ;;  %s6822_s3 = inlined_call_operand.hbm [shape: bf16[64,64], index: 3, kind: input, shape index: {}]   ;;  %s6823_s4 = inlined_call_operand.hbm [shape: f32[1,64], index: 4, kind: input, shape index: {}]   ;;  %s6824_s5 = inlined_call_operand.hbm [shape: bf16[64,64], index: 5, kind: input, shape index: {}]   ;;  %s6825_s6 = inlined_call_operand.hbm [shape: f32[1,64], index: 6, kind: input, shape index: {}]   ;;  %s6826_s7 = inlined_call_operand.hbm [shape: bf16[64,128], index: 7, kind: input, shape index: {}]   ;;  %s6827_s8 = inlined_call_operand.hbm [shape: f32[1,128], index: 8, kind: input, shape index: {}]   ;;  %s6828_s9 = inlined_call_operand.hbm [shape: f32[1024,128], index: 9, kind: output, shape index: {}]  }
   0x1   :  { %6832 = sst [smem:[#allocation23_spill]] %s6821_s2 }
   0x2   :  { %6833 = sst [smem:[#allocation24_spill]] %s6822_s3 }
   0x3   :  { %6834 = sst [smem:[#allocation25_spill]] %s6823_s4 }
   0x4   :  { %14 = vsyncpa [#allocation3], 0 }
   0x5   :  { %16 = vsyncpa [#allocation3 + $0x1], 0 }
   0x6   :  { %17 = vsyncpa [#allocation6], 0 }
   0x7   :  { %18 = vsyncpa [#allocation9], 0 }
   0x8   :  { %19 = vsyncpa [#allocation12], 0 }
   0x9   :  { %20 = vsyncpa [#allocation15], 0 }
   0xa   :  { %21 = vsyncpa [#allocation4], 0 }
   0xb   :  { %23 = vsyncpa [#allocation4 + $0x1], 0  ;;  %s5419_s30 = smov 0   ;;  %s5421_s10 = smov 0  }
   0xc   :  { %s5423_s11 = smov 0   ;;  %s5425_s12 = smov 0  }
   0xd LB: > { %s5354_s13 = smov [#allocation5]   ;;  %s5440_s15 = sadd.s32 4294967295, %s5352_s12   ;;  %s5352_s12 = sphi %s5425_s12, %s6860_s12   ;;  %s5348_s11 = sphi %s5423_s11, %s6859_s11   ;;  %s5344_s10 = sphi %s5421_s10, %s6858_s10   ;;  %s5340_s30 = sphi %s5419_s30, %s6857_s30  }
   0xe   : > { %s270_s14 = sshll.u32 %s5354_s13, 4  ;;  %p3715_p0 = scmp.ge.s32.totalorder %s5352_s12, 1  ;;  %s5445_s14 = int_to_ptr.vmem [resolvable:$true] %s270_s14 }
   0xf   : > { %p6829_p1 = scmp.eq.s32.totalorder %s5440_s15, 0  ;;  %p254_p2 = scmp.lt.s32.totalorder %s5352_s12, 5 }
  0x10   : > { %s5355_s17 = smov [#allocation8]   ;;  %s5356_s19 = smov [#allocation11]  }
  0x11   : > { %p5447_p3 = pnand %p3715_p0, %p254_p2  ;;  %s294_s18 = sshll.u32 %s5355_s17, 4  ;;  %s5453_s18 = int_to_ptr.vmem [resolvable:$true] %s294_s18 }
  0x12   : > { %s318_s20 = sshll.u32 %s5356_s19, 4  ;;  %s5357_s22 = smov [#allocation7]   ;;  %s5461_s20 = int_to_ptr.vmem [resolvable:$true] %s318_s20 }
  0x13   : > { %s6835_s16 = scalar_select %p5447_p3, 1, 0 }
  0x14   : > { %p4597_p4 = pneg %p5447_p3  ;;  %s5463_s23 = sshll.u32 %s5357_s22, 4  ;;  %s281_s23 = int_to_ptr.vmem [resolvable:$true] %s5463_s23 }
  0x15   : > { %s6837_s2 = sld [smem:[#allocation23_spill]] }
  0x16   : > { %p5457_p5 = pnand %p4597_p4, %p6829_p1 }
  0x18   : > { %p5473_p7 = pneg %p5457_p5 }
  0x1b   : > { %s5044_s26 = scalar_lea.hbm %s6837_s2, 16 }
  0x1c   : > { %p5045_p6 = scmp.ne.s32.totalorder %s6837_s2, %s5044_s26  ;;  %p5051_p10 = scmp.lt.u32.totalorder %s5044_s26, %s6837_s2 }
  0x1e   : > { %p5047_p8 = pnand %p5473_p7, %p5045_p6 }
  0x20   : > { %p5048_p9 = pneg %p5047_p8 }
  0x22   : > { %p5053_p11 = pnand %p5051_p10, %p5048_p9 }
  0x24   : > { %5056 = shalt.err (!%p5053_p11)
}
  0x25   : > { %s5057_s19 = scalar_lea.vmem %s5445_s14, 16  ;;  %s5064_s22 = scalar_lea.vmem %s5445_s14, 32 }
  0x26   : > { %p5058_p12 = scmp.ne.s32.totalorder %s5445_s14, %s5057_s19  ;;  %p5065_p2 = scmp.lt.s32.totalorder %s5445_s14, %s5445_s14 }
  0x27   : > { %p5066_p4 = scmp.lt.s32.totalorder %s5064_s22, %s5057_s19 }
  0x28   : > { %p5060_p13 = pnand %p5058_p12, %p5473_p7 }
  0x29   : > { %p5067_p6 = por %p5066_p4, %p5065_p2 }
  0x2a   : > { %p5061_p0 = pneg %p5060_p13 }
  0x2c   : > { %p5068_p8 = pnand %p5067_p6, %p5061_p0 }
  0x2e   : > { %5071 = shalt.err (!%p5068_p8)
}
  0x2f   : > { %4600 = dma.hbm_to_vmem [thread:$0]  (!%p5457_p5), %s6837_s2, 16, %s5445_s14, [#allocation6]  }
  0x30   : > { %s6839_s4 = sld [smem:[#allocation25_spill]] }
  0x36   : > { %s5072_s28 = scalar_lea.hbm %s6839_s4, 16 }
  0x37   : > { %p5073_p9 = scmp.ne.s32.totalorder %s6839_s4, %s5072_s28  ;;  %p5079_p12 = scmp.lt.u32.totalorder %s5072_s28, %s6839_s4 }
  0x39   : > { %p5075_p10 = pnand %p5073_p9, %p5473_p7 }
  0x3b   : > { %p5076_p11 = pneg %p5075_p10 }
  0x3d   : > { %p5081_p13 = pnand %p5079_p12, %p5076_p11 }
  0x3f   : > { %5084 = shalt.err (!%p5081_p13)
}
  0x40   : > { %s5085_s14 = scalar_lea.vmem %s5453_s18, 16  ;;  %s5092_s24 = scalar_lea.vmem %s5453_s18, 32 }
  0x41   : > { %p5086_p0 = scmp.ne.s32.totalorder %s5453_s18, %s5085_s14  ;;  %p5093_p6 = scmp.lt.s32.totalorder %s5453_s18, %s5453_s18 }
  0x42   : > { %p5094_p8 = scmp.lt.s32.totalorder %s5092_s24, %s5085_s14 }
  0x43   : > { %p5088_p2 = pnand %p5086_p0, %p5473_p7 }
  0x44   : > { %p5095_p9 = por %p5094_p8, %p5093_p6 }
  0x45   : > { %p5089_p4 = pneg %p5088_p2 }
  0x47   : > { %p5096_p10 = pnand %p5095_p9, %p5089_p4 }
  0x49   : > { %5099 = shalt.err (!%p5096_p10)
}
  0x4a   : > { %4606 = dma.hbm_to_vmem [thread:$0]  (!%p5457_p5), %s6839_s4, 16, %s5453_s18, [#allocation9]  }
  0x4b   : > { %s5100_s13 = scalar_lea.hbm %s6825_s6, 16 }
  0x4c   : > { %p5101_p11 = scmp.ne.s32.totalorder %s6825_s6, %s5100_s13  ;;  %p5107_p0 = scmp.lt.u32.totalorder %s5100_s13, %s6825_s6 }
  0x4e   : > { %p5103_p12 = pnand %p5101_p11, %p5473_p7 }
  0x50   : > { %p5104_p13 = pneg %p5103_p12 }
  0x52   : > { %p5109_p2 = pnand %p5107_p0, %p5104_p13 }
  0x54   : > { %5112 = shalt.err (!%p5109_p2)
}
  0x55   : > { %s5113_s18 = scalar_lea.vmem %s5461_s20, 16  ;;  %s5120_s24 = scalar_lea.vmem %s5461_s20, 32 }
  0x56   : > { %p5114_p4 = scmp.ne.s32.totalorder %s5461_s20, %s5113_s18  ;;  %p5121_p9 = scmp.lt.s32.totalorder %s5461_s20, %s5461_s20 }
  0x57   : > { %p5122_p10 = scmp.lt.s32.totalorder %s5120_s24, %s5113_s18 }
  0x58   : > { %p5116_p6 = pnand %p5114_p4, %p5473_p7 }
  0x59   : > { %p5123_p11 = por %p5122_p10, %p5121_p9 }
  0x5a   : > { %p5117_p8 = pneg %p5116_p6 }
  0x5c   : > { %p5124_p12 = pnand %p5123_p11, %p5117_p8 }
  0x5e   : > { %5127 = shalt.err (!%p5124_p12)
}
  0x5f   : > { %4612 = dma.hbm_to_vmem [thread:$0]  (!%p5457_p5), %s6825_s6, 16, %s5461_s20, [#allocation12]  }
  0x60   : > { %s6840_s3 = sld [smem:[#allocation24_spill]] }
  0x66   : > { %s5128_s13 = scalar_lea.hbm %s6840_s3, 512 }
  0x67   : > { %p5129_p13 = scmp.ne.s32.totalorder %s6840_s3, %s5128_s13  ;;  %p5135_p4 = scmp.lt.u32.totalorder %s5128_s13, %s6840_s3 }
  0x69   : > { %p5131_p0 = pnand %p5129_p13, %p5473_p7 }
  0x6b   : > { %p5132_p2 = pneg %p5131_p0 }
  0x6d   : > { %p5137_p6 = pnand %p5135_p4, %p5132_p2 }
  0x6f   : > { %5140 = shalt.err (!%p5137_p6)
}
  0x70   : > { %s5141_s18 = scalar_lea.vmem %s281_s23, 512  ;;  %p5149_p11 = scmp.lt.s32.totalorder %s281_s23, %s281_s23 }
  0x71   : > { %p5142_p8 = scmp.ne.s32.totalorder %s281_s23, %s5141_s18  ;;  %p5150_p12 = scmp.lt.s32.totalorder %s5141_s18, %s5141_s18 }
  0x73   : > { %p5144_p9 = pnand %p5142_p8, %p5473_p7  ;;  %p5151_p1 = por %p5150_p12, %p5149_p11 }
  0x75   : > { %p5145_p10 = pneg %p5144_p9 }
  0x77   : > { %p5152_p3 = pnand %p5151_p1, %p5145_p10 }
  0x79   : > { %5155 = shalt.err (!%p5152_p3)
}
  0x7a   : > { %s5358_s20 = smov 64   ;;  %s5359_s24 = smov 4  }
  0x7b   : > { %4603 = dma.hbm_to_vmem [thread:$0]  (!%p5457_p5), %s6840_s3, 512, %s281_s23, [#allocation6], %s5358_s20, %s5358_s20, %s5359_s24  }
  0x7c   : > { %s5360_s27 = smov [#allocation10]   ;;  %s5361_s13 = smov [#allocation13]  }
  0x7d   : > { %s304_s28 = sshll.u32 %s5360_s27, 4  ;;  %s328_s17 = sshll.u32 %s5361_s13, 4  ;;  %s305_s28 = int_to_ptr.vmem [resolvable:$true] %s304_s28  ;;  %s5565_s17 = int_to_ptr.vmem [resolvable:$true] %s328_s17 }
  0x7e   : > { %s5156_s14 = scalar_lea.hbm %s6824_s5, 512 }
  0x7f   : > { %p5157_p1 = scmp.ne.s32.totalorder %s6824_s5, %s5156_s14  ;;  %p5163_p0 = scmp.lt.u32.totalorder %s5156_s14, %s6824_s5 }
  0x81   : > { %p5159_p3 = pnand %p5157_p1, %p5473_p7 }
  0x83   : > { %p5160_p13 = pneg %p5159_p3 }
  0x85   : > { %p5165_p2 = pnand %p5163_p0, %p5160_p13 }
  0x87   : > { %5168 = shalt.err (!%p5165_p2)
}
  0x88   : > { %s5169_s26 = scalar_lea.vmem %s305_s28, 512  ;;  %p5177_p9 = scmp.lt.s32.totalorder %s305_s28, %s305_s28 }
  0x89   : > { %p5170_p4 = scmp.ne.s32.totalorder %s305_s28, %s5169_s26  ;;  %p5178_p10 = scmp.lt.s32.totalorder %s5169_s26, %s5169_s26 }
  0x8b   : > { %p5172_p6 = pnand %p5170_p4, %p5473_p7  ;;  %p5179_p11 = por %p5178_p10, %p5177_p9 }
  0x8d   : > { %p5173_p8 = pneg %p5172_p6 }
  0x8f   : > { %p5180_p12 = pnand %p5179_p11, %p5173_p8 }
  0x91   : > { %5183 = shalt.err (!%p5180_p12)
}
  0x92   : > { %4609 = dma.hbm_to_vmem [thread:$0]  (!%p5457_p5), %s6824_s5, 512, %s305_s28, [#allocation9], %s5358_s20, %s5358_s20, %s5359_s24  }
  0x93   : > { %s5184_s22 = scalar_lea.hbm %s6826_s7, 512 }
  0x94   : > { %p5185_p1 = scmp.ne.s32.totalorder %s6826_s7, %s5184_s22  ;;  %p5191_p0 = scmp.lt.u32.totalorder %s5184_s22, %s6826_s7 }
  0x96   : > { %p5187_p3 = pnand %p5185_p1, %p5473_p7 }
  0x98   : > { %p5188_p13 = pneg %p5187_p3 }
  0x9a   : > { %p5193_p2 = pnand %p5191_p0, %p5188_p13 }
  0x9c   : > { %5196 = shalt.err (!%p5193_p2)
}
  0x9d   : > { %s5197_s28 = scalar_lea.vmem %s5565_s17, 512  ;;  %p5205_p9 = scmp.lt.s32.totalorder %s5565_s17, %s5565_s17 }
  0x9e   : > { %p5198_p4 = scmp.ne.s32.totalorder %s5565_s17, %s5197_s28  ;;  %p5206_p10 = scmp.lt.s32.totalorder %s5197_s28, %s5197_s28 }
  0xa0   : > { %p5200_p6 = pnand %p5198_p4, %p5473_p7  ;;  %p5207_p11 = por %p5206_p10, %p5205_p9 }
  0xa2   : > { %p5201_p8 = pneg %p5200_p6 }
  0xa4   : > { %p5208_p12 = pnand %p5207_p11, %p5201_p8 }
  0xa6   : > { %5211 = shalt.err (!%p5208_p12)
}
  0xa7   : > { %4615 = dma.hbm_to_vmem [thread:$0]  (!%p5457_p5), %s6826_s7, 512, %s5565_s17, [#allocation12], %s5358_s20, %s5358_s20, %s5359_s24  }
  0xa8   : > { %s5362_s27 = smov [#allocation14]   ;;  %s5212_s14 = scalar_lea.hbm %s6827_s8, 16 }
  0xa9   : > { %s342_s13 = sshll.u32 %s5362_s27, 4  ;;  %p5213_p1 = scmp.ne.s32.totalorder %s6827_s8, %s5212_s14  ;;  %s343_s13 = int_to_ptr.vmem [resolvable:$true] %s342_s13 }
  0xaa   : > { %p5219_p0 = scmp.lt.u32.totalorder %s5212_s14, %s6827_s8 }
  0xab   : > { %p5215_p3 = pnand %p5213_p1, %p5473_p7 }
  0xad   : > { %p5216_p13 = pneg %p5215_p3 }
  0xaf   : > { %p5221_p2 = pnand %p5219_p0, %p5216_p13 }
  0xb1   : > { %5224 = shalt.err (!%p5221_p2)
}
  0xb2   : > { %s5225_s20 = scalar_lea.vmem %s343_s13, 16  ;;  %s5232_s24 = scalar_lea.vmem %s343_s13, 32 }
  0xb3   : > { %p5226_p4 = scmp.ne.s32.totalorder %s343_s13, %s5225_s20  ;;  %p5233_p9 = scmp.lt.s32.totalorder %s343_s13, %s343_s13 }
  0xb4   : > { %p5234_p10 = scmp.lt.s32.totalorder %s5232_s24, %s5225_s20 }
  0xb5   : > { %p5228_p6 = pnand %p5226_p4, %p5473_p7 }
  0xb6   : > { %p5235_p11 = por %p5234_p10, %p5233_p9 }
  0xb7   : > { %p5229_p8 = pneg %p5228_p6 }
  0xb9   : > { %p5236_p12 = pnand %p5235_p11, %p5229_p8 }
  0xbb   : > { %5239 = shalt.err (!%p5236_p12)
}
  0xbc   : > { %4618 = dma.hbm_to_vmem [thread:$0]  (!%p5457_p5), %s6827_s8, 16, %s343_s13, [#allocation15]  }
  0xbd   : > { %s3714_s29 = sadd.s32 4294967294, %s5352_s12   ;;  %s5634_s21 = sadd.s32 1, %s5352_s12  }
  0xbe   : > { %s36_s2 = sadd.s32 1, %s5348_s11  ;;  %s33_s27 = ssub.s32 %s5352_s12, %s5634_s21 }
  0xbf   : > { %p43_p7 = scmp.ne.s32.totalorder %s5348_s11, %s5344_s10  ;;  %p34_p1 = scmp.eq.s32.totalorder %s33_s27, 0 }
  0xc0   : > { %p44_p3 = scmp.eq.s32.totalorder %s5352_s12, 0  ;;  %p49_p13 = scmp.ne.s32.totalorder %s5344_s10, %s5340_s30 }
  0xc1   : > { %p241_p0 = scmp.eq.s32.totalorder %s5440_s15, 3  ;;  %p6841_p4 = scmp.eq.s32.totalorder %s5440_s15, 0 }
  0xc2   : > { %s5646_s19 = scalar_select %p34_p1, %s5348_s11, %s36_s2  }
  0xc3   : > { %p45_p2 = por %p44_p3, %p43_p7  ;;  %p5650_p6 = por %p6841_p4, %p49_p13 }
  0xc4   : > { %p5654_p5 = por %p241_p0, %p43_p7  ;;  %p247_p8 = scmp.eq.s32.totalorder %s3714_s29, 3 }
  0xc5   : > { %p4634_p9 = scmp.lt.s32.totalorder %s5352_s12, 4  ;;  %s353_s14 = sand.u32 1, %s5348_s11  }
  0xc6   : > { %s6843_s13 = scalar_select %p5654_p5, 1, 0 }
  0xc7   : > { %p5660_p10 = por %p247_p8, %p49_p13  ;;  %s4562_s25 = smul.u32 896, %s353_s14 }
  0xc8   : > { %p5664_p11 = pnand %p4634_p9, %p45_p2  ;;  %s4563_s28 = smul.u32 14336, %s5352_s12 }
  0xc9   : > { %s6844_s18 = scalar_select %p5660_p10, 1, 0 }
  0xca   : > { %s5672_s17 = scalar_lea.hbm %s6819_s0, %s4563_s28  ;;  %s357_s26 = scalar_lea.vmem [#allocation2], %s4562_s25 }
  0xcb   : > { %s365_s29 = sshll.u32 %s357_s26, 4  ;;  %s5676_s2 = scalar_lea.sflag [#allocation3], %s353_s14  ;;  %s5674_s29 = int_to_ptr.vmem [resolvable:$true] %s365_s29 }
  0xcc   : > { %s5240_s27 = scalar_lea.hbm %s5672_s17, 14336  ;;  %p5242_p7 = pneg %p5664_p11 }
  0xcd   : > { %p5241_p12 = scmp.ne.s32.totalorder %s5672_s17, %s5240_s27  ;;  %s5245_s24 = scalar_lea.hbm %s6819_s0, 57344 }
  0xce   : > { %p5246_p13 = scmp.lt.u32.totalorder %s5672_s17, %s6819_s0  ;;  %p5247_p0 = scmp.lt.u32.totalorder %s5245_s24, %s5240_s27 }
  0xcf   : > { %p5243_p1 = pnand %p5242_p7, %p5241_p12  ;;  %p5249_p4 = scmp.lt.u32.totalorder %s5240_s27, %s5672_s17 }
  0xd0   : > { %p5248_p2 = por %p5247_p0, %p5246_p13 }
  0xd1   : > { %p5244_p3 = pneg %p5243_p1 }
  0xd2   : > { %p5250_p8 = por %p5249_p4, %p5248_p2 }
  0xd4   : > { %p5251_p9 = pnand %p5250_p8, %p5244_p3 }
  0xd6   : > { %5254 = shalt.err (!%p5251_p9)
}
  0xd7   : > { %s5255_s14 = scalar_lea.vmem %s5674_s29, 14336  ;;  %s5363_s25 = smov [#allocation2]  }
  0xd8   : > { %p5256_p12 = scmp.ne.s32.totalorder %s5674_s29, %s5255_s14  ;;  %s5260_s26 = sshll.u32 %s5363_s25, 4  ;;  %s5261_s26 = int_to_ptr.vmem [resolvable:$false] %s5260_s26 }
  0xd9   : > { %s5262_s3 = scalar_lea.vmem %s5261_s26, 28672  ;;  %p5263_p5 = scmp.lt.s32.totalorder %s5674_s29, %s5261_s26 }
  0xda   : > { %p5258_p1 = pnand %p5256_p12, %p5242_p7  ;;  %p5264_p13 = scmp.lt.s32.totalorder %s5262_s3, %s5255_s14 }
  0xdc   : > { %p5259_p10 = pneg %p5258_p1  ;;  %p5265_p0 = por %p5264_p13, %p5263_p5 }
  0xde   : > { %p5266_p2 = pnand %p5265_p0, %p5259_p10 }
  0xe0   : > { %5269 = shalt.err (!%p5266_p2)
}
  0xe1   : > { %s5364_s4 = smov 448   ;;  %s5365_s27 = smov 28  }
  0xe2   : > { %4622 = dma.hbm_to_vmem [thread:$0]  (!%p5664_p11), %s5672_s17, 14336, %s5674_s29, %s5676_s2, %s5364_s4, %s5364_s4, %s5365_s27  }
  0xe3   : > { %p6846_p7 = scmp.ne.s32.totalorder %s6835_s16, 0 }
  0xe4   : > { %s5707_s28 = sand.u32 (!%p6846_p7), 1, %s5344_s10  }
  0xe5   : > { %377 = sbr.rel (%p6846_p7) target bundleno = 1752 (0x6d8), region = 56  ;;  %s380_s24 = scalar_lea.sflag (!%p6846_p7), [#allocation3], %s5707_s28 }
  0xe6   : > { %s4564_s20 = smul.u32 (!%p6846_p7), 896, %s5707_s28 }
  0xe8   : > { %s5711_s14 = scalar_lea.vmem (!%p6846_p7), [#allocation2], %s4564_s20 }
  0xec   : > { %5315 = dma.done.wait (%p5650_p6), %s380_s24, 14336  }
  0xed   : > { %5317 = vsyncadd (%p5650_p6), %s380_s24, 4294952960  ;;  %p6847_p5 = scmp.eq.s32.totalorder %s5440_s15, 0 }
  0xef   : > { %5319 = dma.done.wait (%p6847_p5), [#allocation6], 528   ;;  %p6848_p10 = pmov %p6847_p5 }
  0xf0   : > { %p6849_p11 = pmov %p6847_p5 }
  0xf1   : > { %5321 = vsyncadd (%p6848_p10), [#allocation6], 4294966768 }
  0xf2   : > { %5323 = dma.done.wait (%p6849_p11), [#allocation9], 528   ;;  %p6850_p3 = pmov %p6847_p5 }
  0xf4   : > { %5325 = vsyncadd (%p6850_p3), [#allocation9], 4294966768  ;;  %p6851_p4 = pmov %p6850_p3 }
  0xf5   : > { %p6852_p8 = pmov %p6850_p3 }
  0xf6   : > { %5327 = dma.done.wait (%p6851_p4), [#allocation12], 528  }
  0xf7   : > { %5329 = vsyncadd (%p6852_p8), [#allocation12], 4294966768  ;;  %p6853_p6 = pmov %p6850_p3 }
  0xf8   : > { %p6854_p9 = pmov %p6850_p3 }
  0xf9   : > { %5331 = dma.done.wait (%p6853_p6), [#allocation15], 16  }
  0xfa   : > { %5333 = vsyncadd (%p6854_p9), [#allocation15], 4294967280  ;;  %v4688_v0 = vld [vmem:[%s6820_s1 + $0x40] sm:$0xff]   ;;  %v4692_v4 = vld [vmem:[%s6820_s1 + $0x48] sm:$0xff]   ;;  %vm2339_vm0 = vcmask 523264   ;;  %s3973_s4 = sshll.u32 %s5440_s15, 12 }
  0xfb   : > { %v4689_v1 = vld [vmem:[%s6820_s1] sm:$0xff]   ;;  %3974 = vmatprep.subr.bf16.mxu0 %v4688_v0  ;;  %v4693_v5 = vld [vmem:[%s6820_s1 + $0x8] sm:$0xff]   ;;  %v4696_v8 = vld [vmem:[%s6820_s1 + $0x50] sm:$0xff]   ;;  %s6771_s16 = scalar_lea.hbm %s6828_s9, %s3973_s4  ;;  %s3561_s15 = scalar_lea.sflag [#allocation4], %s5707_s28 }
  0xfc   : > { %v4690_v2 = vld [vmem:[%s6820_s1 + $0xc0] sm:$0xff]   ;;  %3975 = vmatpush3.bf16.msra.mxu0 %v4689_v1  ;;  %v4694_v6 = vld [vmem:[%s6820_s1 + $0xc8] sm:$0xff]   ;;  %v4697_v9 = vld [vmem:[%s6820_s1 + $0x10] sm:$0xff]   ;;  %p6855_p1 = scmp.ne.s32.totalorder %s6843_s13, 0  ;;  %s5366_s23 = smov [#allocation16]  }
  0xfd   : > { %v4691_v3 = vld [vmem:[%s6820_s1 + $0x80] sm:$0xff]   ;;  %4086 = vmatprep.subr.bf16.mxu1 %v4690_v2  ;;  %3976 = vmatprep.subr.bf16.mxu0 %v4692_v4  ;;  %v4695_v7 = vld [vmem:[%s6820_s1 + $0x88] sm:$0xff]   ;;  %v4698_v10 = vld [vmem:[%s6820_s1 + $0xd0] sm:$0xff]   ;;  %s5274_s17 = sshll.u32 %s5366_s23, 4  ;;  %s5275_s17 = int_to_ptr.vmem [resolvable:$false] %s5274_s17 }
  0xfe   : > { %4087 = vmatpush3.bf16.msra.mxu1 %v4691_v3  ;;  %v4699_v11 = vld [vmem:[%s6820_s1 + $0x90] sm:$0xff]   ;;  %v4700_v12 = vld [vmem:[%s6820_s1 + $0x58] sm:$0xff]   ;;  %v4704_v16 = vld [vmem:[%s6820_s1 + $0x60] sm:$0xff]   ;;  %s5276_s29 = scalar_lea.vmem %s5275_s17, 8192 }
  0xff   : > { %4088 = vmatprep.subr.bf16.mxu1 %v4694_v6  ;;  %v4701_v13 = vld [vmem:[%s6820_s1 + $0x18] sm:$0xff]   ;;  %v4705_v17 = vld [vmem:[%s6820_s1 + $0x20] sm:$0xff]   ;;  %v4708_v20 = vld [vmem:[%s6820_s1 + $0x68] sm:$0xff]  }
 0x100   : > { %3977 = vmatpush3.bf16.msra.mxu0 %v4693_v5  ;;  %v4702_v14 = vld [vmem:[%s6820_s1 + $0xd8] sm:$0xff]   ;;  %v4706_v18 = vld [vmem:[%s6820_s1 + $0xe0] sm:$0xff]   ;;  %v4709_v21 = vld [vmem:[%s6820_s1 + $0x28] sm:$0xff]  }
 0x101   : > { %3978 = vmatprep.subr.bf16.mxu0 %v4696_v8  ;;  %v4703_v15 = vld [vmem:[%s6820_s1 + $0x98] sm:$0xff]   ;;  %v4707_v19 = vld [vmem:[%s6820_s1 + $0xa0] sm:$0xff]   ;;  %v4710_v22 = vld [vmem:[%s6820_s1 + $0xe8] sm:$0xff]  }
 0x102   : > { %4089 = vmatpush3.bf16.msra.mxu1 %v4695_v7  ;;  %v4711_v23 = vld [vmem:[%s6820_s1 + $0xa8] sm:$0xff]   ;;  %v4712_v24 = vld [vmem:[%s6820_s1 + $0x70] sm:$0xff]   ;;  %v4716_v28 = vld [vmem:[%s6820_s1 + $0x78] sm:$0xff]  }
 0x103   : > { %4090 = vmatprep.subr.bf16.mxu1 %v4698_v10  ;;  %v4713_v25 = vld [vmem:[%s6820_s1 + $0x30] sm:$0xff]   ;;  %v4717_v29 = vld [vmem:[%s6820_s1 + $0x38] sm:$0xff]   ;;  %v4721_v32 = vld [vmem:[%s5711_s14 + $0x4] ss:$28 sps:$4 sm:$0xff]  }
 0x104   : > { %3979 = vmatpush3.bf16.msra.mxu0 %v4697_v9  ;;  %v4714_v26 = vld [vmem:[%s6820_s1 + $0xf0] sm:$0xff]   ;;  %v4718_v30 = vld [vmem:[%s6820_s1 + $0xf8] sm:$0xff]   ;;  %1640 = vmatprep.mubr.bf16.mxu0 %v4721_v32  ;;  %v4723_v34 = vld [vmem:[%s6820_s1 + $0x140] sm:$0xff]  }
 0x105   : > { %3980 = vmatprep.subr.bf16.mxu0 %v4700_v12  ;;  %v4715_v27 = vld [vmem:[%s6820_s1 + $0xb0] sm:$0xff]   ;;  %v4719_v31 = vld [vmem:[%s5711_s14] ss:$28 sps:$4 sm:$0xff]   ;;  %v4724_v35 = vld [vmem:[%s5711_s14 + $0x8] ss:$28 sps:$4 sm:$0xff]  }
 0x106   : > { %4091 = vmatpush3.bf16.msra.mxu1 %v4699_v11  ;;  %v4722_v33 = vld [vmem:[%s6820_s1 + $0xb8] sm:$0xff]   ;;  %v4726_v36 = vld [vmem:[%s5711_s14 + $0xc] ss:$28 sps:$4 sm:$0xff]   ;;  %v4727_v37 = vld [vmem:[%s6820_s1 + $0x100] sm:$0xff]  }
 0x107   : > { %4092 = vmatprep.subr.bf16.mxu1 %v4702_v14  ;;  %1801 = vmatprep.mubr.bf16.mxu1 %v4726_v36  ;;  %v4728_v38 = vld [vmem:[%s5711_s14 + $0x3c] ss:$28 sps:$4 sm:$0xff]   ;;  %v4731_v39 = vld [vmem:[%s5711_s14 + $0x44] ss:$28 sps:$4 sm:$0xff]   ;;  %v4734_v41 = vld [vmem:[%s5711_s14 + $0x74] ss:$28 sps:$4 sm:$0xff]  }
 0x108   : > { %3981 = vmatpush3.bf16.msra.mxu0 %v4701_v13  ;;  %v4730_v40 = vld [vmem:[%s5711_s14 + $0x38] ss:$28 sps:$4 sm:$0xff]   ;;  %v4737_v42 = vld [vmem:[%s6820_s1 + $0x148] sm:$0xff]   ;;  %v4733_v43 = vld [vmem:[%s5711_s14 + $0x40] ss:$28 sps:$4 sm:$0xff]  }
 0x109   : > { %3982 = vmatprep.subr.bf16.mxu0 %v4704_v16  ;;  %v4738_v44 = vld [vmem:[%s5711_s14 + $0x7c] ss:$28 sps:$4 sm:$0xff]   ;;  %v4740_v45 = vld [vmem:[%s6820_s1 + $0x108] sm:$0xff]   ;;  %v4751_v48 = vld [vmem:[%s6820_s1 + $0x150] sm:$0xff]  }
 0x10a   : > { %4093 = vmatpush3.bf16.msra.mxu1 %v4703_v15  ;;  %v4736_v46 = vld [vmem:[%s5711_s14 + $0x70] ss:$28 sps:$4 sm:$0xff]   ;;  %v4741_v49 = vld [vmem:[%s5711_s14 + $0x78] ss:$28 sps:$4 sm:$0xff]   ;;  %v4744_v52 = vld [vmem:[%s5711_s14 + $0xa8] ss:$28 sps:$4 sm:$0xff]  }
 0x10b   : > { %4094 = vmatprep.subr.bf16.mxu1 %v4706_v18  ;;  %v4742_v47 = vld [vmem:[%s5711_s14 + $0xac] ss:$28 sps:$4 sm:$0xff]   ;;  %v4754_v50 = vld [vmem:[%s6820_s1 + $0x110] sm:$0xff]   ;;  %v4748_v53 = vld [vmem:[%s5711_s14 + $0xe4] ss:$28 sps:$4 sm:$0xff]  }
 0x10c   : > { %3983 = vmatpush3.bf16.msra.mxu0 %v4705_v17  ;;  %v4745_v51 = vld [vmem:[%s5711_s14 + $0xb4] ss:$28 sps:$4 sm:$0xff]   ;;  %v4765_v54 = vld [vmem:[%s6820_s1 + $0x158] sm:$0xff]   ;;  %v4752_v57 = vld [vmem:[%s5711_s14 + $0xec] ss:$28 sps:$4 sm:$0xff]  }
 0x10d   : > { %3984 = vmatprep.subr.bf16.mxu0 %v4708_v20  ;;  %v4747_v55 = vld [vmem:[%s5711_s14 + $0xb0] ss:$28 sps:$4 sm:$0xff]   ;;  %v4768_v56 = vld [vmem:[%s6820_s1 + $0x118] sm:$0xff]   ;;  %v4779_v59 = vld [vmem:[%s6820_s1 + $0x160] sm:$0xff]  }
 0x10e   : > { %4095 = vmatpush3.bf16.msra.mxu1 %v4707_v19  ;;  %v4750_v58 = vld [vmem:[%s5711_s14 + $0xe0] ss:$28 sps:$4 sm:$0xff]   ;;  %v4755_v61 = vld [vmem:[%s5711_s14 + $0xe8] ss:$28 sps:$4 sm:$0xff]   ;;  %v4758_v1 = vld [vmem:[%s5711_s14 + $0x118] ss:$28 sps:$4 sm:$0xff]  }
 0x10f   : > { %4096 = vmatprep.subr.bf16.mxu1 %v4710_v22  ;;  %v4756_v60 = vld [vmem:[%s5711_s14 + $0x11c] ss:$28 sps:$4 sm:$0xff]   ;;  %v4782_v62 = vld [vmem:[%s6820_s1 + $0x120] sm:$0xff]   ;;  %v4794_v2 = vld [vmem:[%s6820_s1 + $0x168] sm:$0xff]  }
 0x110   : > { %3985 = vmatpush3.bf16.msra.mxu0 %v4709_v21  ;;  %v4784_v63 = vld [vmem:[%s6820_s1 + $0x180] sm:$0xff]   ;;  %v4762_v4 = vld [vmem:[%s5711_s14 + $0x154] ss:$28 sps:$4 sm:$0xff]   ;;  %v4797_v5 = vld [vmem:[%s6820_s1 + $0x128] sm:$0xff]  }
 0x111   : > { %3986 = vmatprep.subr.bf16.mxu0 %v4712_v24  ;;  %v4759_v0 = vld [vmem:[%s5711_s14 + $0x124] ss:$28 sps:$4 sm:$0xff]   ;;  %v4766_v6 = vld [vmem:[%s5711_s14 + $0x15c] ss:$28 sps:$4 sm:$0xff]   ;;  %v4799_v7 = vld [vmem:[%s6820_s1 + $0x188] sm:$0xff]  }
 0x112   : > { %4097 = vmatpush3.bf16.msra.mxu1 %v4711_v23  ;;  %v4761_v3 = vld [vmem:[%s5711_s14 + $0x120] ss:$28 sps:$4 sm:$0xff]   ;;  %v4764_v8 = vld [vmem:[%s5711_s14 + $0x150] ss:$28 sps:$4 sm:$0xff]   ;;  %v4769_v11 = vld [vmem:[%s5711_s14 + $0x158] ss:$28 sps:$4 sm:$0xff]  }
 0x113   : > { %4098 = vmatprep.subr.bf16.mxu1 %v4714_v26  ;;  %v4770_v9 = vld [vmem:[%s5711_s14 + $0x18c] ss:$28 sps:$4 sm:$0xff]   ;;  %v4809_v10 = vld [vmem:[%s6820_s1 + $0x170] sm:$0xff]   ;;  %v4776_v16 = vld [vmem:[%s5711_s14 + $0x1c4] ss:$28 sps:$4 sm:$0xff]  }
 0x114   : > { %3987 = vmatpush3.bf16.msra.mxu0 %v4713_v25  ;;  %v4773_v12 = vld [vmem:[%s5711_s14 + $0x194] ss:$28 sps:$4 sm:$0xff]   ;;  %v4772_v15 = vld [vmem:[%s5711_s14 + $0x188] ss:$28 sps:$4 sm:$0xff]   ;;  %v4824_v17 = vld [vmem:[%s6820_s1 + $0x178] sm:$0xff]  }
 0x115   : > { %3988 = vmatprep.subr.bf16.mxu0 %v4716_v28  ;;  %v4812_v13 = vld [vmem:[%s6820_s1 + $0x130] sm:$0xff]   ;;  %v4825_v18 = vld [vmem:[%s6820_s1 + $0x198] sm:$0xff]   ;;  %v4780_v20 = vld [vmem:[%s5711_s14 + $0x1cc] ss:$28 sps:$4 sm:$0xff]  }
 0x116   : > { %4099 = vmatpush3.bf16.msra.mxu1 %v4715_v27  ;;  %v4814_v14 = vld [vmem:[%s6820_s1 + $0x190] sm:$0xff]   ;;  %v4828_v21 = vld [vmem:[%s6820_s1 + $0x138] sm:$0xff]   ;;  %v4830_v22 = vld [vmem:[%s6820_s1 + $0x1a0] sm:$0xff]  }
 0x117   : > { %4100 = vmatprep.subr.bf16.mxu1 %v4718_v30  ;;  %v4775_v19 = vld [vmem:[%s5711_s14 + $0x190] ss:$28 sps:$4 sm:$0xff]   ;;  %v4778_v23 = vld [vmem:[%s5711_s14 + $0x1c0] ss:$28 sps:$4 sm:$0xff]   ;;  %v4783_v27 = vld [vmem:[%s5711_s14 + $0x1c8] ss:$28 sps:$4 sm:$0xff]  }
 0x118   : > { %3989 = vmatpush3.bf16.msra.mxu0 %v4717_v29  ;;  %v4834_v24 = vld [vmem:[%s6820_s1 + $0x1a8] sm:$0xff]   ;;  %v4785_v25 = vld [vmem:[%s5711_s14 + $0x1fc] ss:$28 sps:$4 sm:$0xff]   ;;  %v4838_v26 = vld [vmem:[%s6820_s1 + $0x1b0] sm:$0xff]  }
 0x119   : > { %4198 = vmatprep.subr.bf16.mxu0 %v4723_v34  ;;  %v4788_v28 = vld [vmem:[%s5711_s14 + $0x204] ss:$28 sps:$4 sm:$0xff]   ;;  %v4842_v29 = vld [vmem:[%s6820_s1 + $0x1b8] sm:$0xff]   ;;  %v4793_v34 = vld [vmem:[%s5711_s14 + $0x230] ss:$28 sps:$4 sm:$0xff]  }
 0x11a   : > { %4101 = vmatpush3.bf16.msra.mxu1 %v4722_v33  ;;  %v4787_v30 = vld [vmem:[%s5711_s14 + $0x1f8] ss:$28 sps:$4 sm:$0xff]   ;;  %v4790_v32 = vld [vmem:[%s5711_s14 + $0x200] ss:$28 sps:$4 sm:$0xff]  }
 0x11b   : > { %1641 = vmatmul.mubr.bf16.vlgmr.msra.gmra.mrb[0].mxu0 %v4719_v31  ;;  %4394 = vmatprep.subr.bf16.mxu1 %v4784_v63  ;;  %v4791_v31 = vld [vmem:[%s5711_s14 + $0x234] ss:$28 sps:$4 sm:$0xff]   ;;  %v4795_v33 = vld [vmem:[%s5711_s14 + $0x23c] ss:$28 sps:$4 sm:$0xff]  }
 0x11c   : > { %4199 = vmatpush3.bf16.msra.mxu0 %v4727_v37  ;;  %1648 = vmatprep.mubr.bf16.mxu0 %v4728_v38  ;;  %v4798_v36 = vld [vmem:[%s5711_s14 + $0x238] ss:$28 sps:$4 sm:$0xff]   ;;  %v4802_v38 = vld [vmem:[%s5711_s14 + $0x268] ss:$28 sps:$4 sm:$0xff]  }
 0x11d   : > { %1802 = vmatmul.mubr.bf16.vlgmr.msra.gmra.mrb[0].mxu1 %v4724_v35  ;;  %4200 = vmatprep.subr.bf16.mxu0 %v4737_v42  ;;  %v4800_v35 = vld [vmem:[%s5711_s14 + $0x26c] ss:$28 sps:$4 sm:$0xff]   ;;  %v4803_v37 = vld [vmem:[%s5711_s14 + $0x274] ss:$28 sps:$4 sm:$0xff]   ;;  %v4808_v42 = vld [vmem:[%s5711_s14 + $0x2a0] ss:$28 sps:$4 sm:$0xff]  }
 0x11e   : > { %1809 = vmatprep.mubr.bf16.mxu1 %v4731_v39  ;;  %4395 = vmatpush3.bf16.msra.mxu1 %v4784_v63  ;;  %v4806_v39 = vld [vmem:[%s5711_s14 + $0x2a4] ss:$28 sps:$4 sm:$0xff]  }
 0x11f   : > { %4396 = vmatprep.subr.bf16.mxu1 %v4799_v7  ;;  %v4848_v63 = vld [vmem:[%s5711_s14 + $0x84] ss:$28 sps:$4 sm:$0xff]  }
 0x120   : > { %4201 = vmatpush3.bf16.msra.mxu0 %v4740_v45  ;;  %v4818_v45 = vld [vmem:[%s5711_s14 + $0x2e4] ss:$28 sps:$4 sm:$0xff]  }
 0x121   : > { %4202 = vmatprep.subr.bf16.mxu0 %v4751_v48  ;;  %v4820_v48 = vld [vmem:[%s5711_s14 + $0x2e0] ss:$28 sps:$4 sm:$0xff]  }
 0x122   : > { %4397 = vmatpush3.bf16.msra.mxu1 %v4799_v7  ;;  %v4856_v7 = vld [vmem:[%s5711_s14 + $0xf4] ss:$28 sps:$4 sm:$0xff]  }
 0x123   : > { %1649 = vmatmul.mubr.bf16.gmra.mrb[4].mxu0 %v4730_v40  ;;  %4398 = vmatprep.subr.bf16.mxu1 %v4814_v14  ;;  %v4805_v40 = vld [vmem:[%s5711_s14 + $0x270] ss:$28 sps:$4 sm:$0xff]  }
 0x124   : > { %1656 = vmatprep.mubr.bf16.mxu0 %v4734_v41  ;;  %4203 = vmatpush3.bf16.msra.mxu0 %v4754_v50  ;;  %v4810_v41 = vld [vmem:[%s5711_s14 + $0x2ac] ss:$28 sps:$4 sm:$0xff]  }
 0x125   : > { %1810 = vmatmul.mubr.bf16.gmra.mrb[4].mxu1 %v4733_v43  ;;  %4204 = vmatprep.subr.bf16.mxu0 %v4765_v54  ;;  %v4815_v43 = vld [vmem:[%s5711_s14 + $0x2dc] ss:$28 sps:$4 sm:$0xff]   ;;  %v4823_v50 = vld [vmem:[%s5711_s14 + $0x310] ss:$28 sps:$4 sm:$0xff]   ;;  %v4833_v54 = vld [vmem:[%s5711_s14 + $0x348] ss:$28 sps:$4 sm:$0xff]  }
 0x126   : > { %1817 = vmatprep.mubr.bf16.mxu1 %v4738_v44  ;;  %4399 = vmatpush3.bf16.msra.mxu1 %v4814_v14  ;;  %v4813_v44 = vld [vmem:[%s5711_s14 + $0x2a8] ss:$28 sps:$4 sm:$0xff]  }
 0x127   : > { %4400 = vmatprep.subr.bf16.mxu1 %v4825_v18  ;;  %v4863_v14 = vld [vmem:[%s5711_s14 + $0x128] ss:$28 sps:$4 sm:$0xff]  }
 0x128   : > { %4205 = vmatpush3.bf16.msra.mxu0 %v4768_v56  ;;  %v4837_v56 = vld [vmem:[%s5711_s14 + $0x350] ss:$28 sps:$4 sm:$0xff]  }
 0x129   : > { %4206 = vmatprep.subr.bf16.mxu0 %v4779_v59  ;;  %v4845_v59 = vld [vmem:[%s5711_s14 + $0x4c] ss:$28 sps:$4 sm:$0xff]  }
 0x12a   : > { %4401 = vmatpush3.bf16.msra.mxu1 %v4825_v18  ;;  %v4866_v18 = vld [vmem:[%s5711_s14 + $0x160] ss:$28 sps:$4 sm:$0xff]  }
 0x12b   : > { %1657 = vmatmul.mubr.bf16.gmra.mrb[8].mxu0 %v4736_v46  ;;  %4402 = vmatprep.subr.bf16.mxu1 %v4830_v22  ;;  %v4817_v46 = vld [vmem:[%s5711_s14 + $0x2d8] ss:$28 sps:$4 sm:$0xff]  }
 0x12c   : > { %1664 = vmatprep.mubr.bf16.mxu0 %v4742_v47  ;;  %4207 = vmatpush3.bf16.msra.mxu0 %v4782_v62  ;;  %v4821_v47 = vld [vmem:[%s5711_s14 + $0x314] ss:$28 sps:$4 sm:$0xff]   ;;  %v4847_v62 = vld [vmem:[%s5711_s14 + $0x48] ss:$28 sps:$4 sm:$0xff]  }
 0x12d   : > { %1818 = vmatmul.mubr.bf16.gmra.mrb[8].mxu1 %v4741_v49  ;;  %4208 = vmatprep.subr.bf16.mxu0 %v4794_v2  ;;  %v4826_v49 = vld [vmem:[%s5711_s14 + $0x31c] ss:$28 sps:$4 sm:$0xff]  }
 0x12e   : > { %1825 = vmatprep.mubr.bf16.mxu1 %v4745_v51  ;;  %4403 = vmatpush3.bf16.msra.mxu1 %v4830_v22  ;;  %v4831_v51 = vld [vmem:[%s5711_s14 + $0x34c] ss:$28 sps:$4 sm:$0xff]   ;;  %v4850_v2 = vld [vmem:[%s5711_s14 + $0x80] ss:$28 sps:$4 sm:$0xff]   ;;  %v4871_v22 = vld [vmem:[%s5711_s14 + $0x198] ss:$28 sps:$4 sm:$0xff]  }
 0x12f   : > { %4404 = vmatprep.subr.bf16.mxu1 %v4834_v24 }
 0x130   : > { %4209 = vmatpush3.bf16.msra.mxu0 %v4797_v5  ;;  %v4867_v5 = vld [vmem:[%s5711_s14 + $0x168] ss:$28 sps:$4 sm:$0xff]  }
 0x131   : > { %4210 = vmatprep.subr.bf16.mxu0 %v4809_v10  ;;  %v4858_v10 = vld [vmem:[%s5711_s14 + $0xf0] ss:$28 sps:$4 sm:$0xff]  }
 0x132   : > { %4405 = vmatpush3.bf16.msra.mxu1 %v4834_v24  ;;  %v4900_v24 = vld [vmem:[%s5711_s14 + $0x360] ss:$28 sps:$4 sm:$0xff]  }
 0x133   : > { %1665 = vmatmul.mubr.bf16.gmra.mrb[12].mxu0 %v4744_v52  ;;  %4406 = vmatprep.subr.bf16.mxu1 %v4838_v26  ;;  %v4829_v52 = vld [vmem:[%s5711_s14 + $0x318] ss:$28 sps:$4 sm:$0xff]  }
 0x134   : > { %1672 = vmatprep.mubr.bf16.mxu0 %v4748_v53  ;;  %4211 = vmatpush3.bf16.msra.mxu0 %v4812_v13  ;;  %v4835_v53 = vld [vmem:[%s5711_s14 + $0x354] ss:$28 sps:$4 sm:$0xff]   ;;  %v4883_v13 = vld [vmem:[%s5711_s14 + $0x248] ss:$28 sps:$4 sm:$0xff]  }
 0x135   : > { %1826 = vmatmul.mubr.bf16.gmra.mrb[12].mxu1 %v4747_v55  ;;  %4212 = vmatprep.subr.bf16.mxu0 %v4824_v17  ;;  %v4841_v55 = vld [vmem:[%s5711_s14 + $0x14] ss:$28 sps:$4 sm:$0xff]  }
 0x136   : > { %1833 = vmatprep.mubr.bf16.mxu1 %v4752_v57  ;;  %4407 = vmatpush3.bf16.msra.mxu1 %v4838_v26  ;;  %v4843_v57 = vld [vmem:[%s5711_s14 + $0x18] ss:$28 sps:$4 sm:$0xff]   ;;  %v4877_v26 = vld [vmem:[%s5711_s14 + $0x20c] ss:$28 sps:$4 sm:$0xff]  }
 0x137   : > { %4408 = vmatprep.subr.bf16.mxu1 %v4842_v29  ;;  %v4891_v17 = vld [vmem:[%s5711_s14 + $0x2b8] ss:$28 sps:$4 sm:$0xff]  }
 0x138   : > { %4213 = vmatpush3.bf16.msra.mxu0 %v4828_v21  ;;  %v4899_v21 = vld [vmem:[%s5711_s14 + $0x328] ss:$28 sps:$4 sm:$0xff]  }
 0x13a   : > { %4409 = vmatpush3.bf16.msra.mxu1 %v4842_v29  ;;  %v4882_v29 = vld [vmem:[%s5711_s14 + $0x240] ss:$28 sps:$4 sm:$0xff]  }
 0x13b   : > { %1673 = vmatmul.mubr.bf16.gmra.mrb[16].mxu0 %v4750_v58  ;;  %v4839_v58 = vld [vmem:[%s5711_s14 + $0x10] ss:$28 sps:$4 sm:$0xff]  }
 0x13c   : > { %1680 = vmatprep.mubr.bf16.mxu0 %v4756_v60  ;;  %v4844_v60 = vld [vmem:[%s5711_s14 + $0x50] ss:$28 sps:$4 sm:$0xff]  }
 0x13d   : > { %1834 = vmatmul.mubr.bf16.gmra.mrb[16].mxu1 %v4755_v61  ;;  %v4851_v61 = vld [vmem:[%s5711_s14 + $0x88] ss:$28 sps:$4 sm:$0xff]  }
 0x13e   : > { %1841 = vmatprep.mubr.bf16.mxu1 %v4759_v0  ;;  %v4852_v0 = vld [vmem:[%s5711_s14 + $0xc0] ss:$28 sps:$4 sm:$0xff]  }
 0x143   : > { %1681 = vmatmul.mubr.bf16.gmra.mrb[20].mxu0 %v4758_v1  ;;  %v4859_v1 = vld [vmem:[%s5711_s14 + $0xf8] ss:$28 sps:$4 sm:$0xff]  }
 0x144   : > { %1688 = vmatprep.mubr.bf16.mxu0 %v4762_v4  ;;  %v4860_v4 = vld [vmem:[%s5711_s14 + $0x130] ss:$28 sps:$4 sm:$0xff]  }
 0x145   : > { %1842 = vmatmul.mubr.bf16.gmra.mrb[20].mxu1 %v4761_v3  ;;  %v4853_v3 = vld [vmem:[%s5711_s14 + $0xbc] ss:$28 sps:$4 sm:$0xff]  }
 0x146   : > { %1849 = vmatprep.mubr.bf16.mxu1 %v4766_v6  ;;  %v4855_v6 = vld [vmem:[%s5711_s14 + $0xb8] ss:$28 sps:$4 sm:$0xff]  }
 0x14b   : > { %1689 = vmatmul.mubr.bf16.gmra.mrb[24].mxu0 %v4764_v8  ;;  %v4868_v8 = vld [vmem:[%s5711_s14 + $0x1a0] ss:$28 sps:$4 sm:$0xff]  }
 0x14c   : > { %1696 = vmatprep.mubr.bf16.mxu0 %v4770_v9  ;;  %v4875_v9 = vld [vmem:[%s5711_s14 + $0x1d8] ss:$28 sps:$4 sm:$0xff]  }
 0x14d   : > { %1850 = vmatmul.mubr.bf16.gmra.mrb[24].mxu1 %v4769_v11  ;;  %v4861_v11 = vld [vmem:[%s5711_s14 + $0x12c] ss:$28 sps:$4 sm:$0xff]  }
 0x14e   : > { %1857 = vmatprep.mubr.bf16.mxu1 %v4773_v12  ;;  %v4876_v12 = vld [vmem:[%s5711_s14 + $0x210] ss:$28 sps:$4 sm:$0xff]  }
 0x153   : > { %1697 = vmatmul.mubr.bf16.gmra.mrb[28].mxu0 %v4772_v15  ;;  %v4864_v15 = vld [vmem:[%s5711_s14 + $0x164] ss:$28 sps:$4 sm:$0xff]  }
 0x154   : > { %1704 = vmatprep.mubr.bf16.mxu0 %v4776_v16  ;;  %v4884_v16 = vld [vmem:[%s5711_s14 + $0x280] ss:$28 sps:$4 sm:$0xff]  }
 0x155   : > { %1858 = vmatmul.mubr.bf16.gmra.mrb[28].mxu1 %v4775_v19  ;;  %v4869_v19 = vld [vmem:[%s5711_s14 + $0x19c] ss:$28 sps:$4 sm:$0xff]  }
 0x156   : > { %1865 = vmatprep.mubr.bf16.mxu1 %v4780_v20  ;;  %v4892_v20 = vld [vmem:[%s5711_s14 + $0x2f0] ss:$28 sps:$4 sm:$0xff]  }
 0x15b   : > { %1705 = vmatmul.mubr.bf16.gmra.mrb[32].mxu0 %v4778_v23  ;;  %v4872_v23 = vld [vmem:[%s5711_s14 + $0x1d4] ss:$28 sps:$4 sm:$0xff]  }
 0x15c   : > { %1712 = vmatprep.mubr.bf16.mxu0 %v4785_v25  ;;  %v4874_v25 = vld [vmem:[%s5711_s14 + $0x1d0] ss:$28 sps:$4 sm:$0xff]  }
 0x15d   : > { %1866 = vmatmul.mubr.bf16.gmra.mrb[32].mxu1 %v4783_v27  ;;  %v4879_v27 = vld [vmem:[%s5711_s14 + $0x208] ss:$28 sps:$4 sm:$0xff]  }
 0x15e   : > { %1873 = vmatprep.mubr.bf16.mxu1 %v4788_v28  ;;  %v4880_v28 = vld [vmem:[%s5711_s14 + $0x244] ss:$28 sps:$4 sm:$0xff]  }
 0x163   : > { %1713 = vmatmul.mubr.bf16.gmra.mrb[36].mxu0 %v4787_v30  ;;  %v4885_v30 = vld [vmem:[%s5711_s14 + $0x27c] ss:$28 sps:$4 sm:$0xff]  }
 0x164   : > { %1720 = vmatprep.mubr.bf16.mxu0 %v4791_v31 }
 0x165   : > { %1874 = vmatmul.mubr.bf16.gmra.mrb[36].mxu1 %v4790_v32  ;;  %v6004_v32 = vld [vmem:[#allocation5] ss:$0 sm:$0xff] }
 0x166   : > { %1881 = vmatprep.mubr.bf16.mxu1 %v4795_v33 }
 0x16b   : > { %1721 = vmatmul.mubr.bf16.gmra.mrb[40].mxu0 %v4793_v34  ;;  %v4887_v34 = vld [vmem:[%s5711_s14 + $0x278] ss:$28 sps:$4 sm:$0xff]  }
 0x16c   : > { %1728 = vmatprep.mubr.bf16.mxu0 %v4800_v35 }
 0x16d   : > { %1882 = vmatmul.mubr.bf16.gmra.mrb[40].mxu1 %v4798_v36 }
 0x16e   : > { %1889 = vmatprep.mubr.bf16.mxu1 %v4803_v37  ;;  %v4888_v37 = vld [vmem:[%s5711_s14 + $0x2b4] ss:$28 sps:$4 sm:$0xff]  }
 0x173   : > { %1729 = vmatmul.mubr.bf16.gmra.mrb[44].mxu0 %v4802_v38 }
 0x174   : > { %1736 = vmatprep.mubr.bf16.mxu0 %v4806_v39 }
 0x175   : > { %1890 = vmatmul.mubr.bf16.gmra.mrb[44].mxu1 %v4805_v40 }
 0x176   : > { %1897 = vmatprep.mubr.bf16.mxu1 %v4810_v41 }
 0x17b   : > { %1737 = vmatmul.mubr.bf16.gmra.mrb[48].mxu0 %v4808_v42 }
 0x17c   : > { %1744 = vmatprep.mubr.bf16.mxu0 %v4815_v43 }
 0x17d   : > { %1898 = vmatmul.mubr.bf16.gmra.mrb[48].mxu1 %v4813_v44 }
 0x17e   : > { %1905 = vmatprep.mubr.bf16.mxu1 %v4818_v45  ;;  %v4904_v45 = vld [vmem:[#allocation7] sm:$0xff]  }
 0x17f   : > { %4442 = vmatprep.subr.bf16.mxu1 %v4904_v45 }
 0x183   : > { %1745 = vmatmul.mubr.bf16.gmra.mrb[52].mxu0 %v4817_v46 }
 0x184   : > { %1752 = vmatprep.mubr.bf16.mxu0 %v4821_v47 }
 0x185   : > { %1906 = vmatmul.mubr.bf16.gmra.mrb[52].mxu1 %v4820_v48 }
 0x186   : > { %1913 = vmatprep.mubr.bf16.mxu1 %v4826_v49 }
 0x18b   : > { %1753 = vmatmul.mubr.bf16.gmra.mrb[56].mxu0 %v4823_v50 }
 0x18c   : > { %1760 = vmatprep.mubr.bf16.mxu0 %v4831_v51 }
 0x18d   : > { %1914 = vmatmul.mubr.bf16.gmra.mrb[56].mxu1 %v4829_v52 }
 0x18e   : > { %1921 = vmatprep.mubr.bf16.mxu1 %v4835_v53  ;;  %v4890_v53 = vld [vmem:[%s5711_s14 + $0x2b0] ss:$28 sps:$4 sm:$0xff]  }
 0x193   : > { %1761 = vmatmul.mubr.bf16.gmra.mrb[60].mxu0 %v4833_v54  ;;  %v4905_v54 = vld [vmem:[#allocation7 + $0x8] sm:$0xff]  }
 0x194   : > { %1962 = vmatprep.mubr.bf16.mxu0 %v4841_v55 }
 0x195   : > { %1922 = vmatmul.mubr.bf16.gmra.mrb[60].mxu1 %v4837_v56 }
 0x196   : > { %4410 = vmatprep.mubr.bf16.mxu1 %v4843_v57  ;;  %v4893_v57 = vld [vmem:[%s5711_s14 + $0x2ec] ss:$28 sps:$4 sm:$0xff]  }
 0x19b   : > { %1963 = vmatmul.mubr.bf16.vlgmr.msra.gmra.mrb[64].mxu0 %v4839_v58 }
 0x19c   : > { %1970 = vmatprep.mubr.bf16.mxu0 %v4845_v59 }
 0x19d   : > { %4411 = vmatmul.mubr.bf16.vlgmr.msra.gmra.mrb[64].mxu1 %v4844_v60 }
 0x19e   : > { %4414 = vmatprep.mubr.bf16.mxu1 %v4851_v61  ;;  %4443 = vmatpush3.bf16.msra.mxu1 %v4904_v45 }
 0x19f   : > { %4444 = vmatprep.subr.bf16.mxu1 %v4905_v54 }
 0x1a2   : > { %4445 = vmatpush3.bf16.msra.mxu1 %v4905_v54 }
 0x1a3   : > { %1971 = vmatmul.mubr.bf16.gmra.mrb[68].mxu0 %v4847_v62 }
 0x1a4   : > { %1978 = vmatprep.mubr.bf16.mxu0 %v4848_v63 }
 0x1a5   : > { %4415 = vmatmul.mubr.bf16.gmra.mrb[68].mxu1 %v4852_v0 }
 0x1a6   : > { %4418 = vmatprep.mubr.bf16.mxu1 %v4859_v1  ;;  %v4906_v1 = vld [vmem:[#allocation7 + $0x10] sm:$0xff]  }
 0x1a7   : > { %4446 = vmatprep.subr.bf16.mxu1 %v4906_v1 }
 0x1a8   : > { %4447 = vmatpush3.bf16.msra.mxu1 %v4906_v1 }
 0x1ab   : > { %1979 = vmatmul.mubr.bf16.gmra.mrb[72].mxu0 %v4850_v2 }
 0x1ac   : > { %1986 = vmatprep.mubr.bf16.mxu0 %v4853_v3 }
 0x1ad   : > { %4419 = vmatmul.mubr.bf16.gmra.mrb[72].mxu1 %v4860_v4 }
 0x1ae   : > { %4422 = vmatprep.mubr.bf16.mxu1 %v4867_v5 }
 0x1b3   : > { %1987 = vmatmul.mubr.bf16.gmra.mrb[76].mxu0 %v4855_v6 }
 0x1b4   : > { %1994 = vmatprep.mubr.bf16.mxu0 %v4856_v7 }
 0x1b5   : > { %4423 = vmatmul.mubr.bf16.gmra.mrb[76].mxu1 %v4868_v8 }
 0x1b6   : > { %4426 = vmatprep.mubr.bf16.mxu1 %v4875_v9  ;;  %v4895_v9 = vld [vmem:[%s5711_s14 + $0x2e8] ss:$28 sps:$4 sm:$0xff]  }
 0x1bb   : > { %1995 = vmatmul.mubr.bf16.gmra.mrb[80].mxu0 %v4858_v10  ;;  %v4907_v10 = vld [vmem:[#allocation7 + $0x18] sm:$0xff]  }
 0x1bc   : > { %2002 = vmatprep.mubr.bf16.mxu0 %v4861_v11  ;;  %4448 = vmatprep.subr.bf16.mxu1 %v4907_v10 }
 0x1bd   : > { %4427 = vmatmul.mubr.bf16.gmra.mrb[80].mxu1 %v4876_v12 }
 0x1be   : > { %4430 = vmatprep.mubr.bf16.mxu1 %v4883_v13  ;;  %v4896_v13 = vld [vmem:[%s5711_s14 + $0x324] ss:$28 sps:$4 sm:$0xff]   ;;  %4449 = vmatpush3.bf16.msra.mxu1 %v4907_v10 }
 0x1c3   : > { %2003 = vmatmul.mubr.bf16.gmra.mrb[84].mxu0 %v4863_v14 }
 0x1c4   : > { %2010 = vmatprep.mubr.bf16.mxu0 %v4864_v15 }
 0x1c5   : > { %4431 = vmatmul.mubr.bf16.gmra.mrb[84].mxu1 %v4884_v16 }
 0x1c6   : > { %4434 = vmatprep.mubr.bf16.mxu1 %v4891_v17 }
 0x1cb   : > { %2011 = vmatmul.mubr.bf16.gmra.mrb[88].mxu0 %v4866_v18 }
 0x1cc   : > { %2018 = vmatprep.mubr.bf16.mxu0 %v4869_v19 }
 0x1cd   : > { %4435 = vmatmul.mubr.bf16.gmra.mrb[88].mxu1 %v4892_v20 }
 0x1ce   : > { %4438 = vmatprep.mubr.bf16.mxu1 %v4899_v21 }
 0x1d3   : > { %2019 = vmatmul.mubr.bf16.gmra.mrb[92].mxu0 %v4871_v22 }
 0x1d4   : > { %2026 = vmatprep.mubr.bf16.mxu0 %v4872_v23 }
 0x1d5   : > { %4439 = vmatmul.mubr.bf16.gmra.mrb[92].mxu1 %v4900_v24 }
 0x1db   : > { %2027 = vmatmul.mubr.bf16.gmra.mrb[96].mxu0 %v4874_v25 }
 0x1dc   : > { %2034 = vmatprep.mubr.bf16.mxu0 %v4877_v26 }
 0x1e3   : > { %2035 = vmatmul.mubr.bf16.gmra.mrb[100].mxu0 %v4879_v27 }
 0x1e4   : > { %2042 = vmatprep.mubr.bf16.mxu0 %v4880_v28  ;;  %v4898_v28 = vld [vmem:[%s5711_s14 + $0x320] ss:$28 sps:$4 sm:$0xff]  }
 0x1eb   : > { %2043 = vmatmul.mubr.bf16.gmra.mrb[104].mxu0 %v4882_v29 }
 0x1ec   : > { %2050 = vmatprep.mubr.bf16.mxu0 %v4885_v30 }
 0x1ee   : > { %v3990_v31 = vpop.f32.mrb[0].mxu0 }
 0x1ef   : > { %v3991_v33 = vpop.f32.mrb[1].mxu0 }
 0x1f0   : > { %v3992_v35 = vadd.f32 %v3991_v33, %v3990_v31  ;;  %v3993_v36 = vpop.f32.mrb[2].mxu0  ;;  %v4102_v38 = vpop.f32.mrb[0].mxu1  ;;  %v4901_v31 = vld [vmem:[%s5711_s14 + $0x35c] ss:$28 sps:$4 sm:$0xff]  }
 0x1f1   : > { %v3994_v39 = vpop.f32.mrb[3].mxu0  ;;  %v4103_v42 = vpop.f32.mrb[1].mxu1 }
 0x1f2   : > { %v1643_v40 = vadd.f32 %v3992_v35, %v6004_v32  ;;  %v3995_v41 = vadd.f32 %v3994_v39, %v3993_v36  ;;  %v4104_v43 = vadd.f32 %v4103_v42, %v4102_v38  ;;  %v4105_v44 = vpop.f32.mrb[2].mxu1 }
 0x1f3   : > { %2051 = vmatmul.mubr.bf16.gmra.mrb[108].mxu0 %v4887_v34  ;;  %v4106_v47 = vpop.f32.mrb[3].mxu1 }
 0x1f4   : > { %v1646_v46 = vadd.f32 %v3995_v41, %v6004_v32  ;;  %2058 = vmatprep.mubr.bf16.mxu0 %v4888_v37  ;;  %v6010_v48 = vadd.f32 %v4104_v43, %v1643_v40  ;;  %v4107_v49 = vadd.f32 %v4106_v47, %v4105_v44  ;;  %v4903_v47 = vld [vmem:[%s5711_s14 + $0x358] ss:$28 sps:$4 sm:$0xff]   ;;  %s3735_s14 = sshll.u32 %s5707_s28, 8 }
 0x1f5   : > { %s6704_s3 = scalar_lea.vmem [#allocation16], %s3735_s14 }
 0x1f6   : > { %v3996_v50 = vpop.f32.mrb[4].mxu0  ;;  %v6012_v51 = vadd.f32 %v4107_v49, %v1646_v46  ;;  %s3574_s27 = sshll.u32 %s6704_s3, 4  ;;  %s6773_s27 = int_to_ptr.vmem [resolvable:$true] %s3574_s27 }
 0x1f7   : > { %v3997_v52 = vpop.f32.mrb[5].mxu0  ;;  %s5270_s22 = scalar_lea.vmem %s6773_s27, 4096  ;;  %p5277_p2 = scmp.lt.s32.totalorder %s6773_s27, %s5275_s17 }
 0x1f8   : > { %v3998_v55 = vadd.f32 %v3997_v52, %v3996_v50  ;;  %v3999_v56 = vpop.f32.mrb[6].mxu0  ;;  %v4108_v58 = vpop.f32.mrb[4].mxu1  ;;  %p5271_p12 = scmp.ne.s32.totalorder %s6773_s27, %s5270_s22  ;;  %p5278_p7 = scmp.lt.s32.totalorder %s5276_s29, %s5270_s22 }
 0x1f9   : > { %v4000_v59 = vpop.f32.mrb[7].mxu0  ;;  %v4109_v62 = vpop.f32.mrb[5].mxu1 }
 0x1fa   : > { %v1651_v60 = vadd.f32 %v3998_v55, %v6004_v32  ;;  %v4001_v61 = vadd.f32 %v4000_v59, %v3999_v56  ;;  %v4110_v63 = vadd.f32 %v4109_v62, %v4108_v58  ;;  %v4111_v0 = vpop.f32.mrb[6].mxu1  ;;  %p5272_p13 = pnand %p5271_p12, %p6855_p1  ;;  %p5279_p5 = por %p5278_p7, %p5277_p2 }
 0x1fb   : > { %2059 = vmatmul.mubr.bf16.gmra.mrb[112].mxu0 %v4890_v53  ;;  %v4112_v3 = vpop.f32.mrb[7].mxu1 }
 0x1fc   : > { %v1654_v2 = vadd.f32 %v4001_v61, %v6004_v32  ;;  %2066 = vmatprep.mubr.bf16.mxu0 %v4893_v57  ;;  %v6018_v4 = vadd.f32 %v4110_v63, %v1651_v60  ;;  %v4113_v5 = vadd.f32 %v4112_v3, %v4111_v0  ;;  %p5273_p0 = pneg %p5272_p13 }
 0x1fe   : > { %v4002_v6 = vpop.f32.mrb[8].mxu0  ;;  %v6020_v7 = vadd.f32 %v4113_v5, %v1654_v2  ;;  %p5280_p10 = pnand %p5279_p5, %p5273_p0 }
 0x1ff   : > { %v4003_v8 = vpop.f32.mrb[9].mxu0 }
 0x200   : > { %v4004_v11 = vadd.f32 %v4003_v8, %v4002_v6  ;;  %v4005_v12 = vpop.f32.mrb[10].mxu0  ;;  %v4114_v14 = vpop.f32.mrb[8].mxu1 }
 0x201   : > { %v4006_v15 = vpop.f32.mrb[11].mxu0  ;;  %v4115_v18 = vpop.f32.mrb[9].mxu1 }
 0x202   : > { %v1659_v16 = vadd.f32 %v4004_v11, %v6004_v32  ;;  %v4007_v17 = vadd.f32 %v4006_v15, %v4005_v12  ;;  %v4116_v19 = vadd.f32 %v4115_v18, %v4114_v14  ;;  %v4117_v20 = vpop.f32.mrb[10].mxu1 }
 0x203   : > { %2067 = vmatmul.mubr.bf16.gmra.mrb[116].mxu0 %v4895_v9  ;;  %v4118_v22 = vpop.f32.mrb[11].mxu1 }
 0x204   : > { %v1662_v21 = vadd.f32 %v4007_v17, %v6004_v32  ;;  %2074 = vmatprep.mubr.bf16.mxu0 %v4896_v13  ;;  %v6026_v23 = vadd.f32 %v4116_v19, %v1659_v16  ;;  %v4119_v24 = vadd.f32 %v4118_v22, %v4117_v20 }
 0x206   : > { %v4008_v25 = vpop.f32.mrb[12].mxu0  ;;  %v6028_v26 = vadd.f32 %v4119_v24, %v1662_v21 }
 0x207   : > { %v4009_v27 = vpop.f32.mrb[13].mxu0 }
 0x208   : > { %v4010_v29 = vadd.f32 %v4009_v27, %v4008_v25  ;;  %v4011_v30 = vpop.f32.mrb[14].mxu0  ;;  %v4120_v33 = vpop.f32.mrb[12].mxu1 }
 0x209   : > { %v4012_v34 = vpop.f32.mrb[15].mxu0  ;;  %v4121_v37 = vpop.f32.mrb[13].mxu1 }
 0x20a   : > { %v1667_v35 = vadd.f32 %v4010_v29, %v6004_v32  ;;  %v4013_v36 = vadd.f32 %v4012_v34, %v4011_v30  ;;  %v4122_v38 = vadd.f32 %v4121_v37, %v4120_v33  ;;  %v4123_v39 = vpop.f32.mrb[14].mxu1 }
 0x20b   : > { %2075 = vmatmul.mubr.bf16.gmra.mrb[120].mxu0 %v4898_v28  ;;  %v4124_v41 = vpop.f32.mrb[15].mxu1 }
 0x20c   : > { %v1670_v40 = vadd.f32 %v4013_v36, %v6004_v32  ;;  %2082 = vmatprep.mubr.bf16.mxu0 %v4901_v31  ;;  %v6034_v42 = vadd.f32 %v4122_v38, %v1667_v35  ;;  %v4125_v43 = vadd.f32 %v4124_v41, %v4123_v39 }
 0x20e   : > { %v4014_v44 = vpop.f32.mrb[16].mxu0  ;;  %v6036_v45 = vadd.f32 %v4125_v43, %v1670_v40 }
 0x20f   : > { %v4015_v46 = vpop.f32.mrb[17].mxu0 }
 0x210   : > { %v4016_v49 = vadd.f32 %v4015_v46, %v4014_v44  ;;  %v4017_v50 = vpop.f32.mrb[18].mxu0  ;;  %v4126_v52 = vpop.f32.mrb[16].mxu1 }
 0x211   : > { %v4018_v53 = vpop.f32.mrb[19].mxu0  ;;  %v4127_v56 = vpop.f32.mrb[17].mxu1 }
 0x212   : > { %v1675_v54 = vadd.f32 %v4016_v49, %v6004_v32  ;;  %v4019_v55 = vadd.f32 %v4018_v53, %v4017_v50  ;;  %v4128_v57 = vadd.f32 %v4127_v56, %v4126_v52  ;;  %v4129_v58 = vpop.f32.mrb[18].mxu1 }
 0x213   : > { %2083 = vmatmul.mubr.bf16.gmra.mrb[124].mxu0 %v4903_v47  ;;  %v4130_v60 = vpop.f32.mrb[19].mxu1 }
 0x214   : > { %v1678_v59 = vadd.f32 %v4019_v55, %v6004_v32  ;;  %v6041_v61 = vadd.f32 %v4128_v57, %v1675_v54  ;;  %v4131_v62 = vadd.f32 %v4130_v60, %v4129_v58 }
 0x216   : > { %v4020_v63 = vpop.f32.mrb[20].mxu0  ;;  %v6043_v0 = vadd.f32 %v4131_v62, %v1678_v59 }
 0x217   : > { %v4021_v1 = vpop.f32.mrb[21].mxu0 }
 0x218   : > { %v4022_v2 = vadd.f32 %v4021_v1, %v4020_v63  ;;  %v4023_v3 = vpop.f32.mrb[22].mxu0  ;;  %v4132_v5 = vpop.f32.mrb[20].mxu1 }
 0x219   : > { %v4024_v6 = vpop.f32.mrb[23].mxu0  ;;  %v4133_v10 = vpop.f32.mrb[21].mxu1 }
 0x21a   : > { %v1683_v8 = vadd.f32 %v4022_v2, %v6004_v32  ;;  %v4025_v9 = vadd.f32 %v4024_v6, %v4023_v3  ;;  %v4134_v11 = vadd.f32 %v4133_v10, %v4132_v5  ;;  %v4135_v12 = vpop.f32.mrb[22].mxu1 }
 0x21b   : > { %v4136_v14 = vpop.f32.mrb[23].mxu1 }
 0x21c   : > { %v1686_v13 = vadd.f32 %v4025_v9, %v6004_v32  ;;  %v6047_v15 = vadd.f32 %v4134_v11, %v1683_v8  ;;  %v4137_v16 = vadd.f32 %v4136_v14, %v4135_v12 }
 0x21e   : > { %v4026_v17 = vpop.f32.mrb[24].mxu0  ;;  %v6049_v18 = vadd.f32 %v4137_v16, %v1686_v13 }
 0x21f   : > { %v4027_v19 = vpop.f32.mrb[25].mxu0 }
 0x220   : > { %v4028_v20 = vadd.f32 %v4027_v19, %v4026_v17  ;;  %v4029_v21 = vpop.f32.mrb[26].mxu0  ;;  %v4138_v22 = vpop.f32.mrb[24].mxu1 }
 0x221   : > { %v4030_v24 = vpop.f32.mrb[27].mxu0  ;;  %v4139_v28 = vpop.f32.mrb[25].mxu1 }
 0x222   : > { %v1691_v25 = vadd.f32 %v4028_v20, %v6004_v32  ;;  %v4031_v27 = vadd.f32 %v4030_v24, %v4029_v21  ;;  %v4140_v29 = vadd.f32 %v4139_v28, %v4138_v22  ;;  %v4141_v30 = vpop.f32.mrb[26].mxu1 }
 0x223   : > { %v4142_v33 = vpop.f32.mrb[27].mxu1 }
 0x224   : > { %v1694_v31 = vadd.f32 %v4031_v27, %v6004_v32  ;;  %v6053_v34 = vadd.f32 %v4140_v29, %v1691_v25  ;;  %v4143_v35 = vadd.f32 %v4142_v33, %v4141_v30 }
 0x226   : > { %v4032_v36 = vpop.f32.mrb[28].mxu0  ;;  %v6055_v37 = vadd.f32 %v4143_v35, %v1694_v31 }
 0x227   : > { %v4033_v38 = vpop.f32.mrb[29].mxu0 }
 0x228   : > { %v4034_v39 = vadd.f32 %v4033_v38, %v4032_v36  ;;  %v4035_v40 = vpop.f32.mrb[30].mxu0  ;;  %v4144_v41 = vpop.f32.mrb[28].mxu1 }
 0x229   : > { %v4036_v43 = vpop.f32.mrb[31].mxu0  ;;  %v4145_v47 = vpop.f32.mrb[29].mxu1 }
 0x22a   : > { %v1699_v44 = vadd.f32 %v4034_v39, %v6004_v32  ;;  %v4037_v46 = vadd.f32 %v4036_v43, %v4035_v40  ;;  %v4146_v49 = vadd.f32 %v4145_v47, %v4144_v41  ;;  %v4147_v50 = vpop.f32.mrb[30].mxu1 }
 0x22b   : > { %v4148_v53 = vpop.f32.mrb[31].mxu1 }
 0x22c   : > { %v1702_v52 = vadd.f32 %v4037_v46, %v6004_v32  ;;  %v6059_v54 = vadd.f32 %v4146_v49, %v1699_v44  ;;  %v4149_v55 = vadd.f32 %v4148_v53, %v4147_v50 }
 0x22e   : > { %v4038_v56 = vpop.f32.mrb[32].mxu0  ;;  %v6061_v57 = vadd.f32 %v4149_v55, %v1702_v52 }
 0x22f   : > { %v4039_v58 = vpop.f32.mrb[33].mxu0 }
 0x230   : > { %v4040_v59 = vadd.f32 %v4039_v58, %v4038_v56  ;;  %v4041_v60 = vpop.f32.mrb[34].mxu0  ;;  %v4150_v62 = vpop.f32.mrb[32].mxu1 }
 0x231   : > { %v4042_v63 = vpop.f32.mrb[35].mxu0  ;;  %v4151_v3 = vpop.f32.mrb[33].mxu1 }
 0x232   : > { %v1707_v1 = vadd.f32 %v4040_v59, %v6004_v32  ;;  %v4043_v2 = vadd.f32 %v4042_v63, %v4041_v60  ;;  %v4152_v5 = vadd.f32 %v4151_v3, %v4150_v62  ;;  %v4153_v6 = vpop.f32.mrb[34].mxu1 }
 0x233   : > { %v4154_v9 = vpop.f32.mrb[35].mxu1 }
 0x234   : > { %v1710_v8 = vadd.f32 %v4043_v2, %v6004_v32  ;;  %v6065_v10 = vadd.f32 %v4152_v5, %v1707_v1  ;;  %v4155_v11 = vadd.f32 %v4154_v9, %v4153_v6 }
 0x236   : > { %v4044_v12 = vpop.f32.mrb[36].mxu0  ;;  %v6067_v13 = vadd.f32 %v4155_v11, %v1710_v8 }
 0x237   : > { %v4045_v14 = vpop.f32.mrb[37].mxu0 }
 0x238   : > { %v4046_v16 = vadd.f32 %v4045_v14, %v4044_v12  ;;  %v4047_v17 = vpop.f32.mrb[38].mxu0  ;;  %v4156_v19 = vpop.f32.mrb[36].mxu1 }
 0x239   : > { %v4048_v20 = vpop.f32.mrb[39].mxu0  ;;  %v4157_v24 = vpop.f32.mrb[37].mxu1 }
 0x23a   : > { %v1715_v21 = vadd.f32 %v4046_v16, %v6004_v32  ;;  %v4049_v22 = vadd.f32 %v4048_v20, %v4047_v17  ;;  %v4158_v25 = vadd.f32 %v4157_v24, %v4156_v19  ;;  %v4159_v27 = vpop.f32.mrb[38].mxu1 }
 0x23b   : > { %v4160_v29 = vpop.f32.mrb[39].mxu1 }
 0x23c   : > { %v1718_v28 = vadd.f32 %v4049_v22, %v6004_v32  ;;  %v6071_v30 = vadd.f32 %v4158_v25, %v1715_v21  ;;  %v4161_v31 = vadd.f32 %v4160_v29, %v4159_v27 }
 0x23e   : > { %v4050_v33 = vpop.f32.mrb[40].mxu0  ;;  %v6073_v35 = vadd.f32 %v4161_v31, %v1718_v28 }
 0x23f   : > { %v4051_v36 = vpop.f32.mrb[41].mxu0 }
 0x240   : > { %v4052_v38 = vadd.f32 %v4051_v36, %v4050_v33  ;;  %v4053_v39 = vpop.f32.mrb[42].mxu0  ;;  %v4162_v40 = vpop.f32.mrb[40].mxu1 }
 0x241   : > { %v4054_v41 = vpop.f32.mrb[43].mxu0  ;;  %v4163_v46 = vpop.f32.mrb[41].mxu1 }
 0x242   : > { %v1723_v43 = vadd.f32 %v4052_v38, %v6004_v32  ;;  %v4055_v44 = vadd.f32 %v4054_v41, %v4053_v39  ;;  %v4164_v47 = vadd.f32 %v4163_v46, %v4162_v40  ;;  %v4165_v49 = vpop.f32.mrb[42].mxu1 }
 0x243   : > { %v4166_v52 = vpop.f32.mrb[43].mxu1 }
 0x244   : > { %v1726_v50 = vadd.f32 %v4055_v44, %v6004_v32  ;;  %v6077_v53 = vadd.f32 %v4164_v47, %v1723_v43  ;;  %v4167_v55 = vadd.f32 %v4166_v52, %v4165_v49 }
 0x246   : > { %v4056_v56 = vpop.f32.mrb[44].mxu0  ;;  %v6079_v58 = vadd.f32 %v4167_v55, %v1726_v50 }
 0x247   : > { %v4057_v59 = vpop.f32.mrb[45].mxu0 }
 0x248   : > { %v4058_v60 = vadd.f32 %v4057_v59, %v4056_v56  ;;  %v4059_v62 = vpop.f32.mrb[46].mxu0  ;;  %v4168_v63 = vpop.f32.mrb[44].mxu1 }
 0x249   : > { %v4060_v1 = vpop.f32.mrb[47].mxu0  ;;  %v4169_v5 = vpop.f32.mrb[45].mxu1 }
 0x24a   : > { %v1731_v2 = vadd.f32 %v4058_v60, %v6004_v32  ;;  %v4061_v3 = vadd.f32 %v4060_v1, %v4059_v62  ;;  %v4170_v6 = vadd.f32 %v4169_v5, %v4168_v63  ;;  %v4171_v8 = vpop.f32.mrb[46].mxu1 }
 0x24b   : > { %v4172_v11 = vpop.f32.mrb[47].mxu1 }
 0x24c   : > { %v1734_v9 = vadd.f32 %v4061_v3, %v6004_v32  ;;  %v6083_v12 = vadd.f32 %v4170_v6, %v1731_v2  ;;  %v4173_v14 = vadd.f32 %v4172_v11, %v4171_v8 }
 0x24e   : > { %v4062_v16 = vpop.f32.mrb[48].mxu0  ;;  %v6085_v17 = vadd.f32 %v4173_v14, %v1734_v9 }
 0x24f   : > { %v4063_v19 = vpop.f32.mrb[49].mxu0 }
 0x250   : > { %v4064_v20 = vadd.f32 %v4063_v19, %v4062_v16  ;;  %v4065_v21 = vpop.f32.mrb[50].mxu0  ;;  %v4174_v22 = vpop.f32.mrb[48].mxu1 }
 0x251   : > { %v4066_v24 = vpop.f32.mrb[51].mxu0  ;;  %v4175_v28 = vpop.f32.mrb[49].mxu1 }
 0x252   : > { %v1739_v25 = vadd.f32 %v4064_v20, %v6004_v32  ;;  %v4067_v27 = vadd.f32 %v4066_v24, %v4065_v21  ;;  %v4176_v29 = vadd.f32 %v4175_v28, %v4174_v22  ;;  %v4177_v31 = vpop.f32.mrb[50].mxu1 }
 0x253   : > { %v4178_v36 = vpop.f32.mrb[51].mxu1 }
 0x254   : > { %v1742_v33 = vadd.f32 %v4067_v27, %v6004_v32  ;;  %v6089_v38 = vadd.f32 %v4176_v29, %v1739_v25  ;;  %v4179_v39 = vadd.f32 %v4178_v36, %v4177_v31 }
 0x256   : > { %v4068_v40 = vpop.f32.mrb[52].mxu0  ;;  %v6091_v41 = vadd.f32 %v4179_v39, %v1742_v33 }
 0x257   : > { %v4069_v43 = vpop.f32.mrb[53].mxu0 }
 0x258   : > { %v4070_v44 = vadd.f32 %v4069_v43, %v4068_v40  ;;  %v4071_v46 = vpop.f32.mrb[54].mxu0  ;;  %v4180_v47 = vpop.f32.mrb[52].mxu1 }
 0x259   : > { %v4072_v49 = vpop.f32.mrb[55].mxu0  ;;  %v4181_v55 = vpop.f32.mrb[53].mxu1 }
 0x25a   : > { %v1747_v50 = vadd.f32 %v4070_v44, %v6004_v32  ;;  %v4073_v52 = vadd.f32 %v4072_v49, %v4071_v46  ;;  %v4182_v56 = vadd.f32 %v4181_v55, %v4180_v47  ;;  %v4183_v59 = vpop.f32.mrb[54].mxu1 }
 0x25b   : > { %v4184_v62 = vpop.f32.mrb[55].mxu1 }
 0x25c   : > { %v1750_v60 = vadd.f32 %v4073_v52, %v6004_v32  ;;  %v6095_v63 = vadd.f32 %v4182_v56, %v1747_v50  ;;  %v4185_v1 = vadd.f32 %v4184_v62, %v4183_v59 }
 0x25e   : > { %v4074_v2 = vpop.f32.mrb[56].mxu0  ;;  %v6097_v3 = vadd.f32 %v4185_v1, %v1750_v60 }
 0x25f   : > { %v4075_v5 = vpop.f32.mrb[57].mxu0 }
 0x260   : > { %v4076_v6 = vadd.f32 %v4075_v5, %v4074_v2  ;;  %v4077_v8 = vpop.f32.mrb[58].mxu0  ;;  %v4186_v9 = vpop.f32.mrb[56].mxu1 }
 0x261   : > { %v4078_v11 = vpop.f32.mrb[59].mxu0  ;;  %v4187_v19 = vpop.f32.mrb[57].mxu1 }
 0x262   : > { %v1755_v14 = vadd.f32 %v4076_v6, %v6004_v32  ;;  %v4079_v16 = vadd.f32 %v4078_v11, %v4077_v8  ;;  %v4188_v20 = vadd.f32 %v4187_v19, %v4186_v9  ;;  %v4189_v21 = vpop.f32.mrb[58].mxu1 }
 0x263   : > { %v4190_v24 = vpop.f32.mrb[59].mxu1 }
 0x264   : > { %v1758_v22 = vadd.f32 %v4079_v16, %v6004_v32  ;;  %v6101_v25 = vadd.f32 %v4188_v20, %v1755_v14  ;;  %v4191_v27 = vadd.f32 %v4190_v24, %v4189_v21  ;;  %v4908_v20 = vld [vmem:[#allocation10] sm:$0xff]   ;;  %v4909_v21 = vld [vmem:[#allocation10 + $0x8] sm:$0xff]  }
 0x265   : > { %4482 = vmatprep.subr.bf16.mxu0 %v4908_v20 }
 0x266   : > { %v4080_v28 = vpop.f32.mrb[60].mxu0  ;;  %v6103_v29 = vadd.f32 %v4191_v27, %v1758_v22  ;;  %4483 = vmatpush3.bf16.msra.mxu0 %v4908_v20 }
 0x267   : > { %v4081_v31 = vpop.f32.mrb[61].mxu0  ;;  %4484 = vmatprep.subr.bf16.mxu0 %v4909_v21 }
 0x268   : > { %v4082_v33 = vadd.f32 %v4081_v31, %v4080_v28  ;;  %v4083_v36 = vpop.f32.mrb[62].mxu0  ;;  %v4192_v39 = vpop.f32.mrb[60].mxu1 }
 0x269   : > { %v4084_v40 = vpop.f32.mrb[63].mxu0  ;;  %v4193_v46 = vpop.f32.mrb[61].mxu1 }
 0x26a   : > { %v1763_v43 = vadd.f32 %v4082_v33, %v6004_v32  ;;  %v4085_v44 = vadd.f32 %v4084_v40, %v4083_v36  ;;  %v4194_v47 = vadd.f32 %v4193_v46, %v4192_v39  ;;  %v4195_v49 = vpop.f32.mrb[62].mxu1  ;;  %4485 = vmatpush3.bf16.msra.mxu0 %v4909_v21 }
 0x26b   : > { %v4196_v52 = vpop.f32.mrb[63].mxu1 }
 0x26c   : > { %v1766_v50 = vadd.f32 %v4085_v44, %v6004_v32  ;;  %v6107_v55 = vadd.f32 %v4194_v47, %v1763_v43  ;;  %v4197_v56 = vadd.f32 %v4196_v52, %v4195_v49 }
 0x26e   : > { %v4214_v59 = vpop.f32.mrb[64].mxu0  ;;  %v6109_v60 = vadd.f32 %v4197_v56, %v1766_v50 }
 0x26f   : > { %v4215_v62 = vpop.f32.mrb[65].mxu0 }
 0x270   : > { %v4216_v1 = vadd.f32 %v4215_v62, %v4214_v59  ;;  %v4217_v2 = vpop.f32.mrb[66].mxu0  ;;  %v4412_v6 = vpop.f32.mrb[64].mxu1 }
 0x271   : > { %v4218_v5 = vpop.f32.mrb[67].mxu0  ;;  %v2125_v11 = vpop.f32.mrb[65].mxu1 }
 0x272   : > { %v4219_v8 = vadd.f32 %v4218_v5, %v4217_v2  ;;  %v1965_v9 = vadd.f32 %v4216_v1, %v6010_v48  ;;  %v4413_v14 = vpop.f32.mrb[66].mxu1 }
 0x273   : > { %v2128_v19 = vpop.f32.mrb[67].mxu1 }
 0x274   : > { %v2126_v16 = vadd.f32 %v2125_v11, %v1965_v9  ;;  %v1968_v32 = vadd.f32 %v4219_v8, %v6012_v51 }
 0x276   : > { %v2129_v22 = vadd.f32 %v2128_v19, %v1968_v32  ;;  %v4220_v24 = vpop.f32.mrb[68].mxu0  ;;  %v2252_v28 = vmax.f32 %v2126_v16, 0.0 }
 0x277   : > { %v4221_v27 = vpop.f32.mrb[69].mxu0 }
 0x278   : > { %v2253_v31 = vmax.f32 %v2129_v22, 0.0  ;;  %v4222_v33 = vadd.f32 %v4221_v27, %v4220_v24  ;;  %v4223_v36 = vpop.f32.mrb[70].mxu0  ;;  %v4416_v48 = vpop.f32.mrb[68].mxu1 }
 0x279   : > { %v4224_v39 = vpop.f32.mrb[71].mxu0  ;;  %v2141_v44 = vpop.f32.mrb[69].mxu1 }
 0x27a   : > { %v2284_v40 = vpack.c.bf16 %v2253_v31, %v2252_v28  ;;  %v1973_v43 = vadd.f32 %v4222_v33, %v6018_v4  ;;  %v4225_v51 = vadd.f32 %v4224_v39, %v4223_v36  ;;  %v4417_v46 = vpop.f32.mrb[70].mxu1 }
 0x27b   : > { %v2144_v50 = vpop.f32.mrb[71].mxu1 }
 0x27c   : > { %v2134_v47 = vadd.f32 %v4412_v6, %v1973_v43  ;;  %v1976_v49 = vadd.f32 %v4225_v51, %v6020_v7  ;;  %4450 = vmatprep.mubr.msk.bf16.mxu1 %vm2339_vm0, %v2284_v40 }
 0x27e   : > { %v2137_v52 = vadd.f32 %v4413_v14, %v1976_v49  ;;  %v4226_v56 = vpop.f32.mrb[72].mxu0  ;;  %v2254_v62 = vmax.f32 %v2134_v47, 0.0 }
 0x27f   : > { %v4227_v59 = vpop.f32.mrb[73].mxu0 }
 0x280   : > { %v2255_v1 = vmax.f32 %v2137_v52, 0.0  ;;  %v4228_v2 = vadd.f32 %v4227_v59, %v4226_v56  ;;  %v4229_v5 = vpop.f32.mrb[74].mxu0  ;;  %v4420_v9 = vpop.f32.mrb[72].mxu1 }
 0x281   : > { %v4230_v8 = vpop.f32.mrb[75].mxu0  ;;  %v2157_v32 = vpop.f32.mrb[73].mxu1 }
 0x282   : > { %v2285_v4 = vpack.c.bf16 %v2255_v1, %v2254_v62  ;;  %v4231_v11 = vadd.f32 %v4230_v8, %v4229_v5  ;;  %v1981_v16 = vadd.f32 %v4228_v2, %v6026_v23  ;;  %v4421_v6 = vpop.f32.mrb[74].mxu1 }
 0x283   : > { %v2160_v14 = vpop.f32.mrb[75].mxu1 }
 0x284   : > { %v2142_v19 = vadd.f32 %v2141_v44, %v1981_v16  ;;  %4451 = vmatmul.mubr.msk.bf16.vlgmr.msra.gmra.mrb[96].mxu1 %vm2339_vm0, %v2285_v4  ;;  %v1984_v7 = vadd.f32 %v4231_v11, %v6028_v26 }
 0x286   : > { %v2145_v20 = vadd.f32 %v2144_v50, %v1984_v7  ;;  %v4232_v21 = vpop.f32.mrb[76].mxu0  ;;  %v2256_v24 = vmax.f32 %v2142_v19, 0.0 }
 0x287   : > { %v4233_v22 = vpop.f32.mrb[77].mxu0 }
 0x288   : > { %v2257_v27 = vmax.f32 %v2145_v20, 0.0  ;;  %v4234_v28 = vadd.f32 %v4233_v22, %v4232_v21  ;;  %v4235_v31 = vpop.f32.mrb[78].mxu0  ;;  %v6119_v36 = vpop.f32.mrb[76].mxu1 }
 0x289   : > { %v4236_v33 = vpop.f32.mrb[79].mxu0  ;;  %v2173_v43 = vpop.f32.mrb[77].mxu1 }
 0x28a   : > { %v2286_v39 = vpack.c.bf16 %v2257_v27, %v2256_v24  ;;  %v1989_v23 = vadd.f32 %v4234_v28, %v6034_v42  ;;  %v4237_v40 = vadd.f32 %v4236_v33, %v4235_v31  ;;  %v6122_v51 = vpop.f32.mrb[78].mxu1 }
 0x28b   : > { %v2176_v47 = vpop.f32.mrb[79].mxu1 }
 0x28c   : > { %v2150_v44 = vadd.f32 %v4416_v48, %v1989_v23  ;;  %v1992_v26 = vadd.f32 %v4237_v40, %v6036_v45  ;;  %4454 = vmatprep.mubr.msk.bf16.mxu1 %vm2339_vm0, %v2286_v39 }
 0x28e   : > { %v2153_v49 = vadd.f32 %v4417_v46, %v1992_v26  ;;  %v4238_v50 = vpop.f32.mrb[80].mxu0  ;;  %v2258_v56 = vmax.f32 %v2150_v44, 0.0 }
 0x28f   : > { %v4239_v52 = vpop.f32.mrb[81].mxu0 }
 0x290   : > { %v2259_v59 = vmax.f32 %v2153_v49, 0.0  ;;  %v4240_v62 = vadd.f32 %v4239_v52, %v4238_v50  ;;  %v4241_v1 = vpop.f32.mrb[82].mxu0  ;;  %v6126_v5 = vpop.f32.mrb[80].mxu1 }
 0x291   : > { %v4242_v2 = vpop.f32.mrb[83].mxu0  ;;  %v6129_v48 = vpop.f32.mrb[81].mxu1 }
 0x292   : > { %v2287_v42 = vpack.c.bf16 %v2259_v59, %v2258_v56  ;;  %v4243_v8 = vadd.f32 %v4242_v2, %v4241_v1  ;;  %v1997_v4 = vadd.f32 %v4240_v62, %v6041_v61  ;;  %v6131_v45 = vpop.f32.mrb[82].mxu1 }
 0x293   : > { %v6135_v16 = vpop.f32.mrb[83].mxu1 }
 0x294   : > { %v2158_v11 = vadd.f32 %v2157_v32, %v1997_v4  ;;  %4455 = vmatmul.mubr.msk.bf16.gmra.mrb[100].mxu1 %vm2339_vm0, %v2287_v42  ;;  %v2000_v46 = vadd.f32 %v4243_v8, %v6043_v0 }
 0x296   : > { %v2161_v19 = vadd.f32 %v2160_v14, %v2000_v46  ;;  %v4244_v7 = vpop.f32.mrb[84].mxu0  ;;  %v2260_v21 = vmax.f32 %v2158_v11, 0.0 }
 0x297   : > { %v4245_v20 = vpop.f32.mrb[85].mxu0 }
 0x298   : > { %v2261_v22 = vmax.f32 %v2161_v19, 0.0  ;;  %v4246_v24 = vadd.f32 %v4245_v20, %v4244_v7  ;;  %v4247_v27 = vpop.f32.mrb[86].mxu0  ;;  %v6137_v61 = vpop.f32.mrb[84].mxu1 }
 0x299   : > { %v4248_v28 = vpop.f32.mrb[87].mxu0  ;;  %v6140_v39 = vpop.f32.mrb[85].mxu1 }
 0x29a   : > { %v2288_v31 = vpack.c.bf16 %v2261_v22, %v2260_v21  ;;  %v2005_v33 = vadd.f32 %v4246_v24, %v6047_v15  ;;  %v4249_v32 = vadd.f32 %v4248_v28, %v4247_v27  ;;  %v6142_v23 = vpop.f32.mrb[86].mxu1 }
 0x29b   : > { %v6146_v40 = vpop.f32.mrb[87].mxu1 }
 0x29c   : > { %v2166_v0 = vadd.f32 %v4420_v9, %v2005_v33  ;;  %v2008_v14 = vadd.f32 %v4249_v32, %v6049_v18  ;;  %4458 = vmatprep.mubr.msk.bf16.mxu1 %vm2339_vm0, %v2288_v31 }
 0x29e   : > { %v2169_v44 = vadd.f32 %v4421_v6, %v2008_v14  ;;  %v4250_v26 = vpop.f32.mrb[88].mxu0  ;;  %v2262_v50 = vmax.f32 %v2166_v0, 0.0 }
 0x29f   : > { %v4251_v49 = vpop.f32.mrb[89].mxu0 }
 0x2a0   : > { %v2263_v52 = vmax.f32 %v2169_v44, 0.0  ;;  %v4252_v56 = vadd.f32 %v4251_v49, %v4250_v26  ;;  %v4253_v59 = vpop.f32.mrb[90].mxu0  ;;  %v6148_v62 = vpop.f32.mrb[88].mxu1 }
 0x2a1   : > { %v4254_v15 = vpop.f32.mrb[91].mxu0  ;;  %v6151_v42 = vpop.f32.mrb[89].mxu1 }
 0x2a2   : > { %v2289_v1 = vpack.c.bf16 %v2263_v52, %v2262_v50  ;;  %v4255_v2 = vadd.f32 %v4254_v15, %v4253_v59  ;;  %v2013_v9 = vadd.f32 %v4252_v56, %v6053_v34  ;;  %v6153_v18 = vpop.f32.mrb[90].mxu1 }
 0x2a3   : > { %v6157_v4 = vpop.f32.mrb[91].mxu1 }
 0x2a4   : > { %v2174_v8 = vadd.f32 %v2173_v43, %v2013_v9  ;;  %4459 = vmatmul.mubr.msk.bf16.gmra.mrb[104].mxu1 %vm2339_vm0, %v2289_v1  ;;  %v2016_v6 = vadd.f32 %v4255_v2, %v6055_v37 }
 0x2a6   : > { %v2177_v11 = vadd.f32 %v2176_v47, %v2016_v6  ;;  %v4256_v46 = vpop.f32.mrb[92].mxu0  ;;  %v2264_v7 = vmax.f32 %v2174_v8, 0.0 }
 0x2a7   : > { %v4257_v19 = vpop.f32.mrb[93].mxu0 }
 0x2a8   : > { %v2265_v20 = vmax.f32 %v2177_v11, 0.0  ;;  %v4258_v21 = vadd.f32 %v4257_v19, %v4256_v46  ;;  %v4259_v22 = vpop.f32.mrb[94].mxu0  ;;  %v6159_v34 = vpop.f32.mrb[92].mxu1 }
 0x2a9   : > { %v4260_v24 = vpop.f32.mrb[95].mxu0  ;;  %v6162_v31 = vpop.f32.mrb[93].mxu1 }
 0x2aa   : > { %v2290_v27 = vpack.c.bf16 %v2265_v20, %v2264_v7  ;;  %v2021_v28 = vadd.f32 %v4258_v21, %v6059_v54  ;;  %v4261_v43 = vadd.f32 %v4260_v24, %v4259_v22  ;;  %v6164_v33 = vpop.f32.mrb[94].mxu1 }
 0x2ab   : > { %v6169_v32 = vpop.f32.mrb[95].mxu1 }
 0x2ac   : > { %v2182_v37 = vadd.f32 %v6119_v36, %v2021_v28  ;;  %v2024_v47 = vadd.f32 %v4261_v43, %v6061_v57  ;;  %4462 = vmatprep.mubr.msk.bf16.mxu1 %vm2339_vm0, %v2290_v27 }
 0x2ae   : > { %v2185_v0 = vadd.f32 %v6122_v51, %v2024_v47  ;;  %v4262_v14 = vpop.f32.mrb[96].mxu0  ;;  %v2266_v26 = vmax.f32 %v2182_v37, 0.0 }
 0x2af   : > { %v4263_v44 = vpop.f32.mrb[97].mxu0 }
 0x2b0   : > { %v2267_v49 = vmax.f32 %v2185_v0, 0.0  ;;  %v4264_v54 = vadd.f32 %v4263_v44, %v4262_v14  ;;  %v4265_v50 = vpop.f32.mrb[98].mxu0 }
 0x2b1   : > { %v4266_v52 = vpop.f32.mrb[99].mxu0 }
 0x2b2   : > { %v2291_v56 = vpack.c.bf16 %v2267_v49, %v2266_v26  ;;  %v4267_v59 = vadd.f32 %v4266_v52, %v4265_v50  ;;  %v2029_v15 = vadd.f32 %v4264_v54, %v6065_v10 }
 0x2b4   : > { %v2190_v36 = vadd.f32 %v6129_v48, %v2029_v15  ;;  %4463 = vmatmul.mubr.msk.bf16.gmra.mrb[108].mxu1 %vm2339_vm0, %v2291_v56  ;;  %v2032_v57 = vadd.f32 %v4267_v59, %v6067_v13 }
 0x2b6   : > { %v2193_v1 = vadd.f32 %v6135_v16, %v2032_v57  ;;  %v4268_v51 = vpop.f32.mrb[100].mxu0  ;;  %v2268_v9 = vmax.f32 %v2190_v36, 0.0 }
 0x2b7   : > { %v4269_v2 = vpop.f32.mrb[101].mxu0 }
 0x2b8   : > { %v2269_v8 = vmax.f32 %v2193_v1, 0.0  ;;  %v4270_v6 = vadd.f32 %v4269_v2, %v4268_v51  ;;  %v4271_v11 = vpop.f32.mrb[102].mxu0 }
 0x2b9   : > { %v4272_v46 = vpop.f32.mrb[103].mxu0 }
 0x2ba   : > { %v2292_v19 = vpack.c.bf16 %v2269_v8, %v2268_v9  ;;  %v2037_v7 = vadd.f32 %v4270_v6, %v6071_v30  ;;  %v4273_v20 = vadd.f32 %v4272_v46, %v4271_v11 }
 0x2bc   : > { %v2198_v10 = vadd.f32 %v6126_v5, %v2037_v7  ;;  %v2040_v48 = vadd.f32 %v4273_v20, %v6073_v35  ;;  %4466 = vmatprep.mubr.msk.bf16.mxu1 %vm2339_vm0, %v2292_v19 }
 0x2be   : > { %v2201_v13 = vadd.f32 %v6131_v45, %v2040_v48  ;;  %v4274_v16 = vpop.f32.mrb[104].mxu0  ;;  %v2270_v22 = vmax.f32 %v2198_v10, 0.0  ;;  %v4910_v48 = vld [vmem:[#allocation10 + $0x10] sm:$0xff]  }
 0x2bf   : > { %v4275_v21 = vpop.f32.mrb[105].mxu0  ;;  %4486 = vmatprep.subr.bf16.mxu0 %v4910_v48 }
 0x2c0   : > { %v2271_v24 = vmax.f32 %v2201_v13, 0.0  ;;  %v4276_v27 = vadd.f32 %v4275_v21, %v4274_v16  ;;  %v4277_v28 = vpop.f32.mrb[106].mxu0  ;;  %4487 = vmatpush3.bf16.msra.mxu0 %v4910_v48 }
 0x2c1   : > { %v4278_v43 = vpop.f32.mrb[107].mxu0 }
 0x2c2   : > { %v2293_v37 = vpack.c.bf16 %v2271_v24, %v2270_v22  ;;  %v4279_v47 = vadd.f32 %v4278_v43, %v4277_v28  ;;  %v2045_v30 = vadd.f32 %v4276_v27, %v6077_v53 }
 0x2c4   : > { %v2206_v0 = vadd.f32 %v6140_v39, %v2045_v30  ;;  %4467 = vmatmul.mubr.msk.bf16.gmra.mrb[112].mxu1 %vm2339_vm0, %v2293_v37  ;;  %v2048_v35 = vadd.f32 %v4279_v47, %v6079_v58 }
 0x2c6   : > { %v2209_v5 = vadd.f32 %v6146_v40, %v2048_v35  ;;  %v4280_v45 = vpop.f32.mrb[108].mxu0  ;;  %v2272_v44 = vmax.f32 %v2206_v0, 0.0 }
 0x2c7   : > { %v4281_v14 = vpop.f32.mrb[109].mxu0 }
 0x2c8   : > { %v2273_v26 = vmax.f32 %v2209_v5, 0.0  ;;  %v4282_v49 = vadd.f32 %v4281_v14, %v4280_v45  ;;  %v4283_v54 = vpop.f32.mrb[110].mxu0 }
 0x2c9   : > { %v4284_v50 = vpop.f32.mrb[111].mxu0 }
 0x2ca   : > { %v2294_v52 = vpack.c.bf16 %v2273_v26, %v2272_v44  ;;  %v2053_v56 = vadd.f32 %v4282_v49, %v6083_v12  ;;  %v4285_v59 = vadd.f32 %v4284_v50, %v4283_v54 }
 0x2cc   : > { %v2214_v53 = vadd.f32 %v6137_v61, %v2053_v56  ;;  %v2056_v39 = vadd.f32 %v4285_v59, %v6085_v17  ;;  %4470 = vmatprep.mubr.msk.bf16.mxu1 %vm2339_vm0, %v2294_v52 }
 0x2ce   : > { %v2217_v58 = vadd.f32 %v6142_v23, %v2056_v39  ;;  %v4286_v40 = vpop.f32.mrb[112].mxu0  ;;  %v2274_v36 = vmax.f32 %v2214_v53, 0.0  ;;  %v4912_v53 = vld [vmem:[#allocation13] sm:$0xff]   ;;  %v4913_v39 = vld [vmem:[#allocation13 + $0x8] sm:$0xff]  }
 0x2cf   : > { %v4287_v15 = vpop.f32.mrb[113].mxu0  ;;  %4522 = vmatprep.subr.bf16.mxu1 %v4912_v53 }
 0x2d0   : > { %v2275_v57 = vmax.f32 %v2217_v58, 0.0  ;;  %v4288_v1 = vadd.f32 %v4287_v15, %v4286_v40  ;;  %v4289_v51 = vpop.f32.mrb[114].mxu0  ;;  %v6213_v58 = vld [vmem:[#allocation8] ss:$0 sm:$0xff]  ;;  %4523 = vmatpush3.bf16.msra.mxu1 %v4912_v53 }
 0x2d1   : > { %v4290_v2 = vpop.f32.mrb[115].mxu0  ;;  %4524 = vmatprep.subr.bf16.mxu1 %v4913_v39 }
 0x2d2   : > { %v2295_v9 = vpack.c.bf16 %v2275_v57, %v2274_v36  ;;  %v4291_v8 = vadd.f32 %v4290_v2, %v4289_v51  ;;  %v2061_v12 = vadd.f32 %v4288_v1, %v6089_v38 }
 0x2d4   : > { %v2222_v6 = vadd.f32 %v6151_v42, %v2061_v12  ;;  %4471 = vmatmul.mubr.msk.bf16.gmra.mrb[116].mxu1 %vm2339_vm0, %v2295_v9  ;;  %v2064_v17 = vadd.f32 %v4291_v8, %v6091_v41  ;;  %v4911_v41 = vld [vmem:[#allocation10 + $0x18] sm:$0xff]  }
 0x2d5   : > { %4488 = vmatprep.subr.bf16.mxu0 %v4911_v41  ;;  %4525 = vmatpush3.bf16.msra.mxu1 %v4913_v39 }
 0x2d6   : > { %v2225_v61 = vadd.f32 %v6157_v4, %v2064_v17  ;;  %v4292_v23 = vpop.f32.mrb[116].mxu0  ;;  %v2276_v46 = vmax.f32 %v2222_v6, 0.0  ;;  %4489 = vmatpush3.bf16.msra.mxu0 %v4911_v41 }
 0x2d7   : > { %v4293_v11 = vpop.f32.mrb[117].mxu0 }
 0x2d8   : > { %v2277_v19 = vmax.f32 %v2225_v61, 0.0  ;;  %v4294_v7 = vadd.f32 %v4293_v11, %v4292_v23  ;;  %v4295_v20 = vpop.f32.mrb[118].mxu0 }
 0x2d9   : > { %v4296_v10 = vpop.f32.mrb[119].mxu0 }
 0x2da   : > { %v2296_v13 = vpack.c.bf16 %v2277_v19, %v2276_v46  ;;  %v2069_v16 = vadd.f32 %v4294_v7, %v6095_v63  ;;  %v4297_v38 = vadd.f32 %v4296_v10, %v4295_v20 }
 0x2dc   : > { %v2230_v42 = vadd.f32 %v6148_v62, %v2069_v16  ;;  %v2072_v21 = vadd.f32 %v4297_v38, %v6097_v3  ;;  %4474 = vmatprep.mubr.msk.bf16.mxu1 %vm2339_vm0, %v2296_v13 }
 0x2de   : > { %v2233_v4 = vadd.f32 %v6153_v18, %v2072_v21  ;;  %v4298_v22 = vpop.f32.mrb[120].mxu0  ;;  %v2278_v27 = vmax.f32 %v2230_v42, 0.0 }
 0x2df   : > { %v4299_v24 = vpop.f32.mrb[121].mxu0 }
 0x2e0   : > { %v2279_v28 = vmax.f32 %v2233_v4, 0.0  ;;  %v4300_v43 = vadd.f32 %v4299_v24, %v4298_v22  ;;  %v4301_v37 = vpop.f32.mrb[122].mxu0 }
 0x2e1   : > { %v4302_v63 = vpop.f32.mrb[123].mxu0 }
 0x2e2   : > { %v2297_v47 = vpack.c.bf16 %v2279_v28, %v2278_v27  ;;  %v4303_v30 = vadd.f32 %v4302_v63, %v4301_v37  ;;  %v2077_v62 = vadd.f32 %v4300_v43, %v6101_v25 }
 0x2e4   : > { %v2238_v3 = vadd.f32 %v6162_v31, %v2077_v62  ;;  %4475 = vmatmul.mubr.msk.bf16.gmra.mrb[120].mxu1 %vm2339_vm0, %v2297_v47  ;;  %v2080_v0 = vadd.f32 %v4303_v30, %v6103_v29 }
 0x2e6   : > { %v2241_v18 = vadd.f32 %v6169_v32, %v2080_v0  ;;  %v4304_v35 = vpop.f32.mrb[124].mxu0  ;;  %v2280_v45 = vmax.f32 %v2238_v3, 0.0 }
 0x2e7   : > { %v4305_v5 = vpop.f32.mrb[125].mxu0 }
 0x2e8   : > { %v2281_v14 = vmax.f32 %v2241_v18, 0.0  ;;  %v4306_v44 = vadd.f32 %v4305_v5, %v4304_v35  ;;  %v4307_v26 = vpop.f32.mrb[126].mxu0 }
 0x2e9   : > { %v4308_v49 = vpop.f32.mrb[127].mxu0 }
 0x2ea   : > { %v2298_v54 = vpack.c.bf16 %v2281_v14, %v2280_v45  ;;  %v2085_v50 = vadd.f32 %v4306_v44, %v6107_v55  ;;  %v4309_v52 = vadd.f32 %v4308_v49, %v4307_v26 }
 0x2ec   : > { %v2246_v25 = vadd.f32 %v6159_v34, %v2085_v50  ;;  %v2088_v31 = vadd.f32 %v4309_v52, %v6109_v60  ;;  %4478 = vmatprep.mubr.msk.bf16.mxu1 %vm2339_vm0, %v2298_v54 }
 0x2ee   : > { %v2249_v29 = vadd.f32 %v6164_v33, %v2088_v31  ;;  %v2282_v32 = vmax.f32 %v2246_v25, 0.0 }
 0x2f0   : > { %v2283_v56 = vmax.f32 %v2249_v29, 0.0 }
 0x2f2   : > { %v2299_v59 = vpack.c.bf16 %v2283_v56, %v2282_v32 }
 0x2f4   : > { %4479 = vmatmul.mubr.msk.bf16.gmra.mrb[124].mxu1 %vm2339_vm0, %v2299_v59 }
 0x357   : > { %v4452_v55 = vpop.f32.mrb[96].mxu1 }
 0x358   : > { %v2431_v34 = vadd.f32 %v4452_v55, %v6213_v58  ;;  %v2422_v60 = vpop.f32.mrb[97].mxu1 }
 0x359   : > { %v2423_v40 = vadd.f32 %v6213_v58, %v2422_v60  ;;  %v4453_v15 = vpop.f32.mrb[98].mxu1 }
 0x35a   : > { %v2434_v33 = vadd.f32 %v4453_v15, %v6213_v58  ;;  %v2425_v36 = vpop.f32.mrb[99].mxu1  ;;  %v2551_v1 = vmax.f32 %v2431_v34, 0.0 }
 0x35b   : > { %v2426_v57 = vadd.f32 %v6213_v58, %v2425_v36  ;;  %v2549_v2 = vmax.f32 %v2423_v40, 0.0 }
 0x35c   : > { %v2552_v51 = vmax.f32 %v2434_v33, 0.0 }
 0x35d   : > { %v2550_v9 = vmax.f32 %v2426_v57, 0.0 }
 0x35e   : > { %v2582_v8 = vpack.c.bf16 %v2552_v51, %v2551_v1 }
 0x35f   : > { %v2581_v12 = vpack.c.bf16 %v2550_v9, %v2549_v2 }
 0x361   : > { %4490 = vmatprep.mubr.msk.bf16.mxu0 %vm2339_vm0, %v2581_v12 }
 0x362   : > { %4491 = vmatmul.mubr.msk.bf16.vlgmr.msra.gmra.mrb[128].mxu0 %vm2339_vm0, %v2582_v8 }
 0x367   : > { %v4456_v6 = vpop.f32.mrb[100].mxu1 }
 0x368   : > { %v2447_v17 = vadd.f32 %v4456_v6, %v6213_v58  ;;  %v2438_v61 = vpop.f32.mrb[101].mxu1 }
 0x369   : > { %v2439_v23 = vadd.f32 %v6213_v58, %v2438_v61  ;;  %v4457_v11 = vpop.f32.mrb[102].mxu1 }
 0x36a   : > { %v2450_v46 = vadd.f32 %v4457_v11, %v6213_v58  ;;  %v2441_v19 = vpop.f32.mrb[103].mxu1  ;;  %v2555_v20 = vmax.f32 %v2447_v17, 0.0 }
 0x36b   : > { %v2442_v7 = vadd.f32 %v6213_v58, %v2441_v19  ;;  %v2553_v48 = vmax.f32 %v2439_v23, 0.0 }
 0x36c   : > { %v2556_v10 = vmax.f32 %v2450_v46, 0.0 }
 0x36d   : > { %v2554_v13 = vmax.f32 %v2442_v7, 0.0 }
 0x36e   : > { %v2584_v16 = vpack.c.bf16 %v2556_v10, %v2555_v20  ;;  %v4914_v20 = vld [vmem:[#allocation13 + $0x10] sm:$0xff]  }
 0x36f   : > { %v2583_v38 = vpack.c.bf16 %v2554_v13, %v2553_v48  ;;  %4526 = vmatprep.subr.bf16.mxu1 %v4914_v20 }
 0x370   : > { %4527 = vmatpush3.bf16.msra.mxu1 %v4914_v20 }
 0x371   : > { %4494 = vmatprep.mubr.msk.bf16.mxu0 %vm2339_vm0, %v2583_v38 }
 0x372   : > { %4495 = vmatmul.mubr.msk.bf16.gmra.mrb[132].mxu0 %vm2339_vm0, %v2584_v16 }
 0x377   : > { %v4460_v42 = vpop.f32.mrb[104].mxu1 }
 0x378   : > { %v2463_v21 = vadd.f32 %v4460_v42, %v6213_v58  ;;  %v2454_v41 = vpop.f32.mrb[105].mxu1 }
 0x379   : > { %v2455_v4 = vadd.f32 %v6213_v58, %v2454_v41  ;;  %v4461_v22 = vpop.f32.mrb[106].mxu1  ;;  %v4915_v41 = vld [vmem:[#allocation13 + $0x18] sm:$0xff]  }
 0x37a   : > { %v2466_v24 = vadd.f32 %v4461_v22, %v6213_v58  ;;  %v2457_v27 = vpop.f32.mrb[107].mxu1  ;;  %v2559_v43 = vmax.f32 %v2463_v21, 0.0  ;;  %4528 = vmatprep.subr.bf16.mxu1 %v4915_v41 }
 0x37b   : > { %v2458_v28 = vadd.f32 %v6213_v58, %v2457_v27  ;;  %v2557_v63 = vmax.f32 %v2455_v4, 0.0  ;;  %4529 = vmatpush3.bf16.msra.mxu1 %v4915_v41 }
 0x37c   : > { %v2560_v37 = vmax.f32 %v2466_v24, 0.0 }
 0x37d   : > { %v2558_v47 = vmax.f32 %v2458_v28, 0.0 }
 0x37e   : > { %v2586_v30 = vpack.c.bf16 %v2560_v37, %v2559_v43 }
 0x37f   : > { %v2585_v62 = vpack.c.bf16 %v2558_v47, %v2557_v63 }
 0x381   : > { %4498 = vmatprep.mubr.msk.bf16.mxu0 %vm2339_vm0, %v2585_v62 }
 0x382   : > { %4499 = vmatmul.mubr.msk.bf16.gmra.mrb[136].mxu0 %vm2339_vm0, %v2586_v30 }
 0x387   : > { %v4464_v3 = vpop.f32.mrb[108].mxu1 }
 0x388   : > { %v2479_v0 = vadd.f32 %v4464_v3, %v6213_v58  ;;  %v2470_v18 = vpop.f32.mrb[109].mxu1 }
 0x389   : > { %v2471_v35 = vadd.f32 %v6213_v58, %v2470_v18  ;;  %v4465_v5 = vpop.f32.mrb[110].mxu1 }
 0x38a   : > { %v2482_v45 = vadd.f32 %v4465_v5, %v6213_v58  ;;  %v2473_v14 = vpop.f32.mrb[111].mxu1  ;;  %v2563_v26 = vmax.f32 %v2479_v0, 0.0 }
 0x38b   : > { %v2474_v44 = vadd.f32 %v6213_v58, %v2473_v14  ;;  %v2561_v54 = vmax.f32 %v2471_v35, 0.0 }
 0x38c   : > { %v2564_v49 = vmax.f32 %v2482_v45, 0.0 }
 0x38d   : > { %v2562_v50 = vmax.f32 %v2474_v44, 0.0 }
 0x38e   : > { %v2588_v52 = vpack.c.bf16 %v2564_v49, %v2563_v26  ;;  %v6263_v49 = vld [vmem:[#allocation11] ss:$0 sm:$0xff] }
 0x38f   : > { %v2587_v25 = vpack.c.bf16 %v2562_v50, %v2561_v54 }
 0x391   : > { %4502 = vmatprep.mubr.msk.bf16.mxu0 %vm2339_vm0, %v2587_v25 }
 0x392   : > { %4503 = vmatmul.mubr.msk.bf16.gmra.mrb[140].mxu0 %vm2339_vm0, %v2588_v52 }
 0x397   : > { %v4468_v31 = vpop.f32.mrb[112].mxu1 }
 0x398   : > { %v2495_v29 = vadd.f32 %v4468_v31, %v6213_v58  ;;  %v2486_v32 = vpop.f32.mrb[113].mxu1 }
 0x399   : > { %v2487_v56 = vadd.f32 %v6213_v58, %v2486_v32  ;;  %v4469_v59 = vpop.f32.mrb[114].mxu1 }
 0x39a   : > { %v2498_v53 = vadd.f32 %v4469_v59, %v6213_v58  ;;  %v2489_v39 = vpop.f32.mrb[115].mxu1  ;;  %v2567_v34 = vmax.f32 %v2495_v29, 0.0 }
 0x39b   : > { %v2490_v55 = vadd.f32 %v6213_v58, %v2489_v39  ;;  %v2565_v40 = vmax.f32 %v2487_v56, 0.0 }
 0x39c   : > { %v2568_v60 = vmax.f32 %v2498_v53, 0.0 }
 0x39d   : > { %v2566_v15 = vmax.f32 %v2490_v55, 0.0 }
 0x39e   : > { %v2590_v33 = vpack.c.bf16 %v2568_v60, %v2567_v34 }
 0x39f   : > { %v2589_v36 = vpack.c.bf16 %v2566_v15, %v2565_v40 }
 0x3a1   : > { %4506 = vmatprep.mubr.msk.bf16.mxu0 %vm2339_vm0, %v2589_v36 }
 0x3a2   : > { %4507 = vmatmul.mubr.msk.bf16.gmra.mrb[144].mxu0 %vm2339_vm0, %v2590_v33 }
 0x3a7   : > { %v4472_v57 = vpop.f32.mrb[116].mxu1 }
 0x3a8   : > { %v2511_v1 = vadd.f32 %v4472_v57, %v6213_v58  ;;  %v2502_v51 = vpop.f32.mrb[117].mxu1 }
 0x3a9   : > { %v2503_v2 = vadd.f32 %v6213_v58, %v2502_v51  ;;  %v4473_v9 = vpop.f32.mrb[118].mxu1 }
 0x3aa   : > { %v2514_v8 = vadd.f32 %v4473_v9, %v6213_v58  ;;  %v2505_v12 = vpop.f32.mrb[119].mxu1  ;;  %v2571_v17 = vmax.f32 %v2511_v1, 0.0 }
 0x3ab   : > { %v2506_v6 = vadd.f32 %v6213_v58, %v2505_v12  ;;  %v2569_v23 = vmax.f32 %v2503_v2, 0.0 }
 0x3ac   : > { %v2572_v61 = vmax.f32 %v2514_v8, 0.0 }
 0x3ad   : > { %v2570_v11 = vmax.f32 %v2506_v6, 0.0 }
 0x3ae   : > { %v2592_v46 = vpack.c.bf16 %v2572_v61, %v2571_v17 }
 0x3af   : > { %v2591_v19 = vpack.c.bf16 %v2570_v11, %v2569_v23 }
 0x3b1   : > { %4510 = vmatprep.mubr.msk.bf16.mxu0 %vm2339_vm0, %v2591_v19 }
 0x3b2   : > { %4511 = vmatmul.mubr.msk.bf16.gmra.mrb[148].mxu0 %vm2339_vm0, %v2592_v46 }
 0x3b7   : > { %v4476_v7 = vpop.f32.mrb[120].mxu1 }
 0x3b8   : > { %v2527_v10 = vadd.f32 %v4476_v7, %v6213_v58  ;;  %v2518_v48 = vpop.f32.mrb[121].mxu1 }
 0x3b9   : > { %v2519_v13 = vadd.f32 %v6213_v58, %v2518_v48  ;;  %v4477_v16 = vpop.f32.mrb[122].mxu1 }
 0x3ba   : > { %v2530_v38 = vadd.f32 %v4477_v16, %v6213_v58  ;;  %v2521_v42 = vpop.f32.mrb[123].mxu1  ;;  %v2575_v4 = vmax.f32 %v2527_v10, 0.0 }
 0x3bb   : > { %v2522_v21 = vadd.f32 %v6213_v58, %v2521_v42  ;;  %v2573_v24 = vmax.f32 %v2519_v13, 0.0 }
 0x3bc   : > { %v2576_v22 = vmax.f32 %v2530_v38, 0.0 }
 0x3bd   : > { %v2574_v27 = vmax.f32 %v2522_v21, 0.0 }
 0x3be   : > { %v2594_v28 = vpack.c.bf16 %v2576_v22, %v2575_v4 }
 0x3bf   : > { %v2593_v43 = vpack.c.bf16 %v2574_v27, %v2573_v24 }
 0x3c1   : > { %4514 = vmatprep.mubr.msk.bf16.mxu0 %vm2339_vm0, %v2593_v43 }
 0x3c2   : > { %4515 = vmatmul.mubr.msk.bf16.gmra.mrb[152].mxu0 %vm2339_vm0, %v2594_v28 }
 0x3c7   : > { %v4480_v37 = vpop.f32.mrb[124].mxu1 }
 0x3c8   : > { %v2543_v63 = vadd.f32 %v4480_v37, %v6213_v58  ;;  %v2534_v47 = vpop.f32.mrb[125].mxu1 }
 0x3c9   : > { %v2535_v30 = vadd.f32 %v6213_v58, %v2534_v47  ;;  %v4481_v62 = vpop.f32.mrb[126].mxu1 }
 0x3ca   : > { %v2546_v3 = vadd.f32 %v4481_v62, %v6213_v58  ;;  %v2537_v0 = vpop.f32.mrb[127].mxu1  ;;  %v2579_v35 = vmax.f32 %v2543_v63, 0.0 }
 0x3cb   : > { %v2538_v18 = vadd.f32 %v6213_v58, %v2537_v0  ;;  %v2577_v45 = vmax.f32 %v2535_v30, 0.0 }
 0x3cc   : > { %v2580_v5 = vmax.f32 %v2546_v3, 0.0 }
 0x3cd   : > { %v2578_v14 = vmax.f32 %v2538_v18, 0.0 }
 0x3ce   : > { %v2596_v44 = vpack.c.bf16 %v2580_v5, %v2579_v35 }
 0x3cf   : > { %v2595_v26 = vpack.c.bf16 %v2578_v14, %v2577_v45 }
 0x3d1   : > { %4518 = vmatprep.mubr.msk.bf16.mxu0 %vm2339_vm0, %v2595_v26 }
 0x3d2   : > { %4519 = vmatmul.mubr.msk.bf16.gmra.mrb[156].mxu0 %vm2339_vm0, %v2596_v44 }
 0x435   : > { %v4492_v54 = vpop.f32.mrb[128].mxu0 }
 0x436   : > { %v2727_v50 = vadd.f32 %v4492_v54, %v6263_v49  ;;  %v2718_v52 = vpop.f32.mrb[129].mxu0 }
 0x437   : > { %v2719_v25 = vadd.f32 %v6263_v49, %v2718_v52  ;;  %v4493_v31 = vpop.f32.mrb[130].mxu0 }
 0x438   : > { %v2730_v58 = vadd.f32 %v4493_v31, %v6263_v49  ;;  %v2721_v29 = vpop.f32.mrb[131].mxu0  ;;  %v2847_v56 = vmax.f32 %v2727_v50, 0.0 }
 0x439   : > { %v2722_v32 = vadd.f32 %v6263_v49, %v2721_v29  ;;  %v2845_v53 = vmax.f32 %v2719_v25, 0.0 }
 0x43a   : > { %v2848_v59 = vmax.f32 %v2730_v58, 0.0 }
 0x43b   : > { %v2846_v39 = vmax.f32 %v2722_v32, 0.0 }
 0x43c   : > { %v2878_v55 = vpack.c.bf16 %v2848_v59, %v2847_v56 }
 0x43d   : > { %v2877_v34 = vpack.c.bf16 %v2846_v39, %v2845_v53 }
 0x43f   : > { %4530 = vmatprep.mubr.msk.bf16.mxu1 %vm2339_vm0, %v2877_v34 }
 0x440   : > { %4531 = vmatmul.mubr.msk.bf16.vlgmr.msra.gmra.mrb[128].mxu1 %vm2339_vm0, %v2878_v55 }
 0x445   : > { %v4496_v60 = vpop.f32.mrb[132].mxu0 }
 0x446   : > { %v2743_v40 = vadd.f32 %v4496_v60, %v6263_v49  ;;  %v2734_v15 = vpop.f32.mrb[133].mxu0 }
 0x447   : > { %v2735_v33 = vadd.f32 %v6263_v49, %v2734_v15  ;;  %v4497_v36 = vpop.f32.mrb[134].mxu0 }
 0x448   : > { %v2746_v57 = vadd.f32 %v4497_v36, %v6263_v49  ;;  %v2737_v1 = vpop.f32.mrb[135].mxu0  ;;  %v2851_v2 = vmax.f32 %v2743_v40, 0.0 }
 0x449   : > { %v2738_v51 = vadd.f32 %v6263_v49, %v2737_v1  ;;  %v2849_v8 = vmax.f32 %v2735_v33, 0.0 }
 0x44a   : > { %v2852_v9 = vmax.f32 %v2746_v57, 0.0 }
 0x44b   : > { %v2850_v12 = vmax.f32 %v2738_v51, 0.0 }
 0x44c   : > { %v2880_v6 = vpack.c.bf16 %v2852_v9, %v2851_v2 }
 0x44d   : > { %v2879_v17 = vpack.c.bf16 %v2850_v12, %v2849_v8 }
 0x44f   : > { %4534 = vmatprep.mubr.msk.bf16.mxu1 %vm2339_vm0, %v2879_v17 }
 0x450   : > { %4535 = vmatmul.mubr.msk.bf16.gmra.mrb[132].mxu1 %vm2339_vm0, %v2880_v6 }
 0x455   : > { %v4500_v61 = vpop.f32.mrb[136].mxu0 }
 0x456   : > { %v2759_v23 = vadd.f32 %v4500_v61, %v6263_v49  ;;  %v2750_v11 = vpop.f32.mrb[137].mxu0 }
 0x457   : > { %v2751_v46 = vadd.f32 %v6263_v49, %v2750_v11  ;;  %v4501_v19 = vpop.f32.mrb[138].mxu0 }
 0x458   : > { %v2762_v7 = vadd.f32 %v4501_v19, %v6263_v49  ;;  %v2753_v20 = vpop.f32.mrb[139].mxu0  ;;  %v2855_v48 = vmax.f32 %v2759_v23, 0.0 }
 0x459   : > { %v2754_v10 = vadd.f32 %v6263_v49, %v2753_v20  ;;  %v2853_v16 = vmax.f32 %v2751_v46, 0.0 }
 0x45a   : > { %v2856_v13 = vmax.f32 %v2762_v7, 0.0 }
 0x45b   : > { %v2854_v38 = vmax.f32 %v2754_v10, 0.0 }
 0x45c   : > { %v2882_v42 = vpack.c.bf16 %v2856_v13, %v2855_v48 }
 0x45d   : > { %v2881_v21 = vpack.c.bf16 %v2854_v38, %v2853_v16 }
 0x45f   : > { %4538 = vmatprep.mubr.msk.bf16.mxu1 %vm2339_vm0, %v2881_v21 }
 0x460   : > { %4539 = vmatmul.mubr.msk.bf16.gmra.mrb[136].mxu1 %vm2339_vm0, %v2882_v42 }
 0x465   : > { %v4504_v41 = vpop.f32.mrb[140].mxu0 }
 0x466   : > { %v2775_v4 = vadd.f32 %v4504_v41, %v6263_v49  ;;  %v2766_v22 = vpop.f32.mrb[141].mxu0 }
 0x467   : > { %v2767_v24 = vadd.f32 %v6263_v49, %v2766_v22  ;;  %v4505_v27 = vpop.f32.mrb[142].mxu0 }
 0x468   : > { %v2778_v28 = vadd.f32 %v4505_v27, %v6263_v49  ;;  %v2769_v43 = vpop.f32.mrb[143].mxu0  ;;  %v2859_v63 = vmax.f32 %v2775_v4, 0.0 }
 0x469   : > { %v2770_v37 = vadd.f32 %v6263_v49, %v2769_v43  ;;  %v2857_v30 = vmax.f32 %v2767_v24, 0.0 }
 0x46a   : > { %v2860_v47 = vmax.f32 %v2778_v28, 0.0 }
 0x46b   : > { %v2858_v62 = vmax.f32 %v2770_v37, 0.0  ;;  %v3141_v37 = vlaneseq }
 0x46c   : > { %v2884_v3 = vpack.c.bf16 %v2860_v47, %v2859_v63  ;;  %v6315_v47 = vld [vmem:[#allocation14] ss:$0 sm:$0xff] }
 0x46d   : > { %v2883_v0 = vpack.c.bf16 %v2858_v62, %v2857_v30  ;;  %v6313_v63 = vand.u32 127, %v3141_v37 }
 0x46f   : > { %4542 = vmatprep.mubr.msk.bf16.mxu1 %vm2339_vm0, %v2883_v0  ;;  %vm3143_vm1 = vcmp.lt.s32.totalorder %v6313_v63, 10 }
 0x470   : > { %4543 = vmatmul.mubr.msk.bf16.gmra.mrb[140].mxu1 %vm2339_vm0, %v2884_v3 }
 0x475   : > { %v4508_v18 = vpop.f32.mrb[144].mxu0 }
 0x476   : > { %v2791_v35 = vadd.f32 %v4508_v18, %v6263_v49  ;;  %v2782_v5 = vpop.f32.mrb[145].mxu0 }
 0x477   : > { %v2783_v45 = vadd.f32 %v6263_v49, %v2782_v5  ;;  %v4509_v14 = vpop.f32.mrb[146].mxu0 }
 0x478   : > { %v2794_v44 = vadd.f32 %v4509_v14, %v6263_v49  ;;  %v2785_v26 = vpop.f32.mrb[147].mxu0  ;;  %v2863_v50 = vmax.f32 %v2791_v35, 0.0 }
 0x479   : > { %v2786_v54 = vadd.f32 %v6263_v49, %v2785_v26  ;;  %v2861_v25 = vmax.f32 %v2783_v45, 0.0 }
 0x47a   : > { %v2864_v52 = vmax.f32 %v2794_v44, 0.0 }
 0x47b   : > { %v2862_v31 = vmax.f32 %v2786_v54, 0.0 }
 0x47c   : > { %v2886_v58 = vpack.c.bf16 %v2864_v52, %v2863_v50 }
 0x47d   : > { %v2885_v29 = vpack.c.bf16 %v2862_v31, %v2861_v25 }
 0x47f   : > { %4546 = vmatprep.mubr.msk.bf16.mxu1 %vm2339_vm0, %v2885_v29 }
 0x480   : > { %4547 = vmatmul.mubr.msk.bf16.gmra.mrb[144].mxu1 %vm2339_vm0, %v2886_v58 }
 0x485   : > { %v4512_v32 = vpop.f32.mrb[148].mxu0 }
 0x486   : > { %v2807_v56 = vadd.f32 %v4512_v32, %v6263_v49  ;;  %v2798_v59 = vpop.f32.mrb[149].mxu0 }
 0x487   : > { %v2799_v53 = vadd.f32 %v6263_v49, %v2798_v59  ;;  %v4513_v39 = vpop.f32.mrb[150].mxu0 }
 0x488   : > { %v2810_v55 = vadd.f32 %v4513_v39, %v6263_v49  ;;  %v2801_v34 = vpop.f32.mrb[151].mxu0  ;;  %v2867_v40 = vmax.f32 %v2807_v56, 0.0 }
 0x489   : > { %v2802_v60 = vadd.f32 %v6263_v49, %v2801_v34  ;;  %v2865_v33 = vmax.f32 %v2799_v53, 0.0 }
 0x48a   : > { %v2868_v15 = vmax.f32 %v2810_v55, 0.0 }
 0x48b   : > { %v2866_v36 = vmax.f32 %v2802_v60, 0.0 }
 0x48c   : > { %v2888_v57 = vpack.c.bf16 %v2868_v15, %v2867_v40 }
 0x48d   : > { %v2887_v1 = vpack.c.bf16 %v2866_v36, %v2865_v33 }
 0x48f   : > { %4550 = vmatprep.mubr.msk.bf16.mxu1 %vm2339_vm0, %v2887_v1 }
 0x490   : > { %4551 = vmatmul.mubr.msk.bf16.gmra.mrb[148].mxu1 %vm2339_vm0, %v2888_v57 }
 0x495   : > { %v4516_v51 = vpop.f32.mrb[152].mxu0 }
 0x496   : > { %v2823_v2 = vadd.f32 %v4516_v51, %v6263_v49  ;;  %v2814_v9 = vpop.f32.mrb[153].mxu0 }
 0x497   : > { %v2815_v8 = vadd.f32 %v6263_v49, %v2814_v9  ;;  %v4517_v12 = vpop.f32.mrb[154].mxu0 }
 0x498   : > { %v2826_v6 = vadd.f32 %v4517_v12, %v6263_v49  ;;  %v2817_v17 = vpop.f32.mrb[155].mxu0  ;;  %v2871_v23 = vmax.f32 %v2823_v2, 0.0 }
 0x499   : > { %v2818_v61 = vadd.f32 %v6263_v49, %v2817_v17  ;;  %v2869_v46 = vmax.f32 %v2815_v8, 0.0 }
 0x49a   : > { %v2872_v11 = vmax.f32 %v2826_v6, 0.0 }
 0x49b   : > { %v2870_v19 = vmax.f32 %v2818_v61, 0.0 }
 0x49c   : > { %v2890_v7 = vpack.c.bf16 %v2872_v11, %v2871_v23 }
 0x49d   : > { %v2889_v20 = vpack.c.bf16 %v2870_v19, %v2869_v46 }
 0x49f   : > { %4554 = vmatprep.mubr.msk.bf16.mxu1 %vm2339_vm0, %v2889_v20 }
 0x4a0   : > { %4555 = vmatmul.mubr.msk.bf16.gmra.mrb[152].mxu1 %vm2339_vm0, %v2890_v7 }
 0x4a5   : > { %v4520_v10 = vpop.f32.mrb[156].mxu0 }
 0x4a6   : > { %v2839_v48 = vadd.f32 %v4520_v10, %v6263_v49  ;;  %v2830_v13 = vpop.f32.mrb[157].mxu0 }
 0x4a7   : > { %v2831_v16 = vadd.f32 %v6263_v49, %v2830_v13  ;;  %v4521_v38 = vpop.f32.mrb[158].mxu0 }
 0x4a8   : > { %v2842_v42 = vadd.f32 %v4521_v38, %v6263_v49  ;;  %v2833_v21 = vpop.f32.mrb[159].mxu0  ;;  %v2875_v4 = vmax.f32 %v2839_v48, 0.0 }
 0x4a9   : > { %v2834_v41 = vadd.f32 %v6263_v49, %v2833_v21  ;;  %v2873_v24 = vmax.f32 %v2831_v16, 0.0 }
 0x4aa   : > { %v2876_v22 = vmax.f32 %v2842_v42, 0.0 }
 0x4ab   : > { %v2874_v27 = vmax.f32 %v2834_v41, 0.0 }
 0x4ac   : > { %v2892_v28 = vpack.c.bf16 %v2876_v22, %v2875_v4 }
 0x4ad   : > { %v2891_v43 = vpack.c.bf16 %v2874_v27, %v2873_v24 }
 0x4af   : > { %4558 = vmatprep.mubr.msk.bf16.mxu1 %vm2339_vm0, %v2891_v43 }
 0x4b0   : > { %4559 = vmatmul.mubr.msk.bf16.gmra.mrb[156].mxu1 %vm2339_vm0, %v2892_v28 }
 0x513   : > { %v4532_v30 = vpop.f32.mrb[128].mxu1 }
 0x514   : > { %v6319_v49 = vadd.f32 %v4532_v30, %v6315_v47  ;;  %v3014_v62 = vpop.f32.mrb[129].mxu1 }
 0x515   : > { %v6322_v3 = vadd.f32 %v6315_v47, %v3014_v62  ;;  %v4533_v0 = vpop.f32.mrb[130].mxu1 }
 0x516   : > { %v6325_v18 = vadd.f32 %v4533_v0, %v6315_v47  ;;  %v3017_v35 = vpop.f32.mrb[131].mxu1  ;;  %v3146_v5 = vsel %vm3143_vm1, %v6319_v49, -1e+30 }
 0x517   : > { %v6331_v45 = vadd.f32 %v6315_v47, %v3017_v35  ;;  %3180 = vmax.xlane.f32.xlu1 %v3146_v5  ;;  %v3144_v14 = vsel %vm3143_vm1, %v6322_v3, -1e+30 }
 0x518   : > { %3176 = vmax.xlane.f32.xlu0 %v3144_v14  ;;  %v3147_v44 = vsel %vm3143_vm1, %v6325_v18, -1e+30 }
 0x519   : > { %v3145_v26 = vsel %vm3143_vm1, %v6331_v45, -1e+30 }
 0x51b   : > { %3182 = vmax.xlane.f32.xlu1 %v3147_v44 }
 0x51c   : > { %3178 = vmax.xlane.f32.xlu0 %v3145_v26 }
 0x523   : > { %v4536_v54 = vpop.f32.mrb[132].mxu1 }
 0x524   : > { %v6343_v50 = vadd.f32 %v4536_v54, %v6315_v47  ;;  %v3030_v52 = vpop.f32.mrb[133].mxu1 }
 0x525   : > { %v4537_v25 = vpop.f32.mrb[134].mxu1  ;;  %v6346_v31 = vadd.f32 %v6315_v47, %v3030_v52 }
 0x526   : > { %v6349_v58 = vadd.f32 %v4537_v25, %v6315_v47  ;;  %v3033_v29 = vpop.f32.mrb[135].mxu1  ;;  %v3150_v32 = vsel %vm3143_vm1, %v6343_v50, -1e+30 }
 0x527   : > { %3188 = vmax.xlane.f32.xlu0 %v3150_v32  ;;  %v6355_v56 = vadd.f32 %v6315_v47, %v3033_v29  ;;  %v3148_v53 = vsel %vm3143_vm1, %v6346_v31, -1e+30 }
 0x528   : > { %v3151_v59 = vsel %vm3143_vm1, %v6349_v58, -1e+30 }
 0x529   : > { %3190 = vmax.xlane.f32.xlu1 %v3151_v59  ;;  %v3149_v39 = vsel %vm3143_vm1, %v6355_v56, -1e+30 }
 0x52b   : > { %3184 = vmax.xlane.f32.xlu0 %v3148_v53 }
 0x52d   : > { %3186 = vmax.xlane.f32.xlu1 %v3149_v39 }
 0x533   : > { %v4540_v55 = vpop.f32.mrb[136].mxu1 }
 0x534   : > { %v6367_v34 = vadd.f32 %v4540_v55, %v6315_v47  ;;  %v3046_v60 = vpop.f32.mrb[137].mxu1 }
 0x535   : > { %v4541_v40 = vpop.f32.mrb[138].mxu1  ;;  %v6370_v15 = vadd.f32 %v6315_v47, %v3046_v60 }
 0x536   : > { %v6373_v33 = vadd.f32 %v4541_v40, %v6315_v47  ;;  %v3049_v36 = vpop.f32.mrb[139].mxu1  ;;  %v3154_v57 = vsel %vm3143_vm1, %v6367_v34, -1e+30 }
 0x537   : > { %3196 = vmax.xlane.f32.xlu0 %v3154_v57  ;;  %v6379_v1 = vadd.f32 %v6315_v47, %v3049_v36  ;;  %v3152_v2 = vsel %vm3143_vm1, %v6370_v15, -1e+30 }
 0x538   : > { %v3155_v51 = vsel %vm3143_vm1, %v6373_v33, -1e+30 }
 0x539   : > { %3198 = vmax.xlane.f32.xlu1 %v3155_v51  ;;  %v3153_v9 = vsel %vm3143_vm1, %v6379_v1, -1e+30 }
 0x53b   : > { %3192 = vmax.xlane.f32.xlu0 %v3152_v2 }
 0x53d   : > { %3194 = vmax.xlane.f32.xlu1 %v3153_v9 }
 0x543   : > { %v4544_v8 = vpop.f32.mrb[140].mxu1 }
 0x544   : > { %v6391_v12 = vadd.f32 %v4544_v8, %v6315_v47  ;;  %v3062_v6 = vpop.f32.mrb[141].mxu1 }
 0x545   : > { %v4545_v17 = vpop.f32.mrb[142].mxu1  ;;  %v6394_v61 = vadd.f32 %v6315_v47, %v3062_v6 }
 0x546   : > { %v6397_v23 = vadd.f32 %v4545_v17, %v6315_v47  ;;  %v3065_v11 = vpop.f32.mrb[143].mxu1  ;;  %v3158_v46 = vsel %vm3143_vm1, %v6391_v12, -1e+30 }
 0x547   : > { %3204 = vmax.xlane.f32.xlu0 %v3158_v46  ;;  %v6403_v19 = vadd.f32 %v6315_v47, %v3065_v11  ;;  %v3156_v20 = vsel %vm3143_vm1, %v6394_v61, -1e+30 }
 0x548   : > { %v3159_v7 = vsel %vm3143_vm1, %v6397_v23, -1e+30 }
 0x549   : > { %3206 = vmax.xlane.f32.xlu1 %v3159_v7  ;;  %v3157_v10 = vsel %vm3143_vm1, %v6403_v19, -1e+30 }
 0x54b   : > { %3200 = vmax.xlane.f32.xlu0 %v3156_v20 }
 0x54d   : > { %3202 = vmax.xlane.f32.xlu1 %v3157_v10 }
 0x553   : > { %v4548_v48 = vpop.f32.mrb[144].mxu1 }
 0x554   : > { %v6415_v13 = vadd.f32 %v4548_v48, %v6315_v47  ;;  %v3078_v16 = vpop.f32.mrb[145].mxu1 }
 0x555   : > { %v4549_v38 = vpop.f32.mrb[146].mxu1  ;;  %v6418_v42 = vadd.f32 %v6315_v47, %v3078_v16 }
 0x556   : > { %v6421_v21 = vadd.f32 %v4549_v38, %v6315_v47  ;;  %v3081_v41 = vpop.f32.mrb[147].mxu1  ;;  %v3162_v4 = vsel %vm3143_vm1, %v6415_v13, -1e+30 }
 0x557   : > { %3212 = vmax.xlane.f32.xlu0 %v3162_v4  ;;  %v6427_v22 = vadd.f32 %v6315_v47, %v3081_v41  ;;  %v3160_v27 = vsel %vm3143_vm1, %v6418_v42, -1e+30 }
 0x558   : > { %v3163_v24 = vsel %vm3143_vm1, %v6421_v21, -1e+30 }
 0x559   : > { %3214 = vmax.xlane.f32.xlu1 %v3163_v24  ;;  %v3161_v28 = vsel %vm3143_vm1, %v6427_v22, -1e+30 }
 0x55b   : > { %3208 = vmax.xlane.f32.xlu0 %v3160_v27 }
 0x55d   : > { %3210 = vmax.xlane.f32.xlu1 %v3161_v28 }
 0x563   : > { %v4552_v43 = vpop.f32.mrb[148].mxu1 }
 0x564   : > { %v6439_v37 = vadd.f32 %v4552_v43, %v6315_v47  ;;  %v3094_v30 = vpop.f32.mrb[149].mxu1 }
 0x565   : > { %v4553_v62 = vpop.f32.mrb[150].mxu1  ;;  %v6442_v0 = vadd.f32 %v6315_v47, %v3094_v30 }
 0x566   : > { %v6445_v35 = vadd.f32 %v4553_v62, %v6315_v47  ;;  %v3097_v5 = vpop.f32.mrb[151].mxu1  ;;  %v3166_v14 = vsel %vm3143_vm1, %v6439_v37, -1e+30 }
 0x567   : > { %3220 = vmax.xlane.f32.xlu0 %v3166_v14  ;;  %v6451_v44 = vadd.f32 %v6315_v47, %v3097_v5  ;;  %v3164_v54 = vsel %vm3143_vm1, %v6442_v0, -1e+30 }
 0x568   : > { %v3167_v26 = vsel %vm3143_vm1, %v6445_v35, -1e+30 }
 0x569   : > { %3222 = vmax.xlane.f32.xlu1 %v3167_v26  ;;  %v3165_v52 = vsel %vm3143_vm1, %v6451_v44, -1e+30 }
 0x56b   : > { %3216 = vmax.xlane.f32.xlu0 %v3164_v54 }
 0x56d   : > { %3218 = vmax.xlane.f32.xlu1 %v3165_v52 }
 0x573   : > { %v4556_v25 = vpop.f32.mrb[152].mxu1 }
 0x574   : > { %v6463_v29 = vadd.f32 %v4556_v25, %v6315_v47  ;;  %v3110_v32 = vpop.f32.mrb[153].mxu1 }
 0x575   : > { %v4557_v59 = vpop.f32.mrb[154].mxu1  ;;  %v6466_v53 = vadd.f32 %v6315_v47, %v3110_v32 }
 0x576   : > { %v6469_v39 = vadd.f32 %v4557_v59, %v6315_v47  ;;  %v3113_v55 = vpop.f32.mrb[155].mxu1  ;;  %v3170_v60 = vsel %vm3143_vm1, %v6463_v29, -1e+30 }
 0x577   : > { %3228 = vmax.xlane.f32.xlu0 %v3170_v60  ;;  %v6475_v40 = vadd.f32 %v6315_v47, %v3113_v55  ;;  %v3168_v57 = vsel %vm3143_vm1, %v6466_v53, -1e+30 }
 0x578   : > { %v3171_v36 = vsel %vm3143_vm1, %v6469_v39, -1e+30 }
 0x579   : > { %3230 = vmax.xlane.f32.xlu1 %v3171_v36  ;;  %v3169_v51 = vsel %vm3143_vm1, %v6475_v40, -1e+30 }
 0x57b   : > { %3224 = vmax.xlane.f32.xlu0 %v3168_v57 }
 0x57d   : > { %3226 = vmax.xlane.f32.xlu1 %v3169_v51 }
 0x583   : > { %v4560_v2 = vpop.f32.mrb[156].mxu1 }
 0x584   : > { %v3126_v9 = vpop.f32.mrb[157].mxu1  ;;  %v6490_v11 = vadd.f32 %v4560_v2, %v6315_v47 }
 0x585   : > { %v6487_v8 = vadd.f32 %v6315_v47, %v3126_v9  ;;  %v4561_v6 = vpop.f32.mrb[158].mxu1 }
 0x586   : > { %v3129_v17 = vpop.f32.mrb[159].mxu1  ;;  %v6499_v20 = vadd.f32 %v4561_v6, %v6315_v47  ;;  %v3174_v48 = vsel %vm3143_vm1, %v6490_v11, -1e+30 }
 0x587   : > { %v6493_v46 = vadd.f32 %v6315_v47, %v3129_v17  ;;  %v3172_v7 = vsel %vm3143_vm1, %v6487_v8, -1e+30 }
 0x588   : > { %3232 = vmax.xlane.f32.xlu0 %v3172_v7  ;;  %v3175_v16 = vsel %vm3143_vm1, %v6499_v20, -1e+30 }
 0x589   : > { %v3173_v10 = vsel %vm3143_vm1, %v6493_v46, -1e+30 }
 0x58a   : > { %3234 = vmax.xlane.f32.xlu1 %v3173_v10 }
 0x58c   : > { %3236 = vmax.xlane.f32.xlu0 %v3174_v48 }
 0x58e   : > { %3238 = vmax.xlane.f32.xlu1 %v3175_v16 }
 0x5a4   : > { %v3181_v38 = vpop.xlane.xlu1 %3180 }
 0x5a5   : > { %v6511_v41 = vsub.f32 %v6319_v49, %v3181_v38  ;;  %v3177_v47 = vpop.xlane.xlu0 %3176 }
 0x5a6   : > { %v6514_v4 = vsub.f32 %v6322_v3, %v3177_v47 }
 0x5a7   : > { %v3276_v24 = vmul.f32 1.442695, %v6511_v41 }
 0x5a8   : > { %v3272_v27 = vmul.f32 1.442695, %v6514_v4  ;;  %v3183_v28 = vpop.xlane.xlu1 %3182 }
 0x5a9   : > { %4916 = vpow2.f32 %v3276_v24  ;;  %v6519_v43 = vsub.f32 %v6325_v18, %v3183_v28  ;;  %v3179_v30 = vpop.xlane.xlu0 %3178 }
 0x5aa   : > { %v6522_v62 = vsub.f32 %v6331_v45, %v3179_v30  ;;  %4918 = vpow2.f32 %v3272_v27 }
 0x5ab   : > { %v3278_v49 = vmul.f32 1.442695, %v6519_v43 }
 0x5ac   : > { %v3274_v5 = vmul.f32 1.442695, %v6522_v62 }
 0x5ad   : > { %4920 = vpow2.f32 %v3278_v49 }
 0x5ae   : > { %4922 = vpow2.f32 %v3274_v5 }
 0x5b3   : > { %v4917_v3 = vpop.eup %4916 }
 0x5b4   : > { %v3189_v14 = vpop.xlane.xlu0 %3188  ;;  %v3338_v26 = vsel %vm3143_vm1, %v4917_v3, 0.0  ;;  %v4919_v54 = vpop.eup %4918 }
 0x5b5   : > { %v6529_v18 = vsub.f32 %v6343_v50, %v3189_v14  ;;  %3372 = vadd.xlane.f32.xlu0 %v3338_v26  ;;  %v3336_v60 = vsel %vm3143_vm1, %v4919_v54, 0.0 }
 0x5b6   : > { %v3191_v52 = vpop.xlane.xlu1 %3190 }
 0x5b7   : > { %v4921_v45 = vpop.eup %4920  ;;  %v3284_v25 = vmul.f32 1.442695, %v6529_v18  ;;  %v6533_v32 = vsub.f32 %v6349_v58, %v3191_v52 }
 0x5b8   : > { %v3185_v59 = vpop.xlane.xlu0 %3184  ;;  %v3339_v55 = vsel %vm3143_vm1, %v4921_v45, 0.0  ;;  %v4923_v36 = vpop.eup %4922 }
 0x5b9   : > { %4924 = vpow2.f32 %v3284_v25  ;;  %v3286_v50 = vmul.f32 1.442695, %v6533_v32  ;;  %v6541_v57 = vsub.f32 %v6346_v31, %v3185_v59  ;;  %3374 = vadd.xlane.f32.xlu1 %v3339_v55  ;;  %3368 = vadd.xlane.f32.xlu0 %v3336_v60  ;;  %v3337_v9 = vsel %vm3143_vm1, %v4923_v36, 0.0 }
 0x5ba   : > { %v3187_v51 = vpop.xlane.xlu1 %3186 }
 0x5bb   : > { %4926 = vpow2.f32 %v3286_v50  ;;  %v3280_v58 = vmul.f32 1.442695, %v6541_v57  ;;  %v6545_v2 = vsub.f32 %v6355_v56, %v3187_v51 }
 0x5bd   : > { %4928 = vpow2.f32 %v3280_v58  ;;  %v3282_v6 = vmul.f32 1.442695, %v6545_v2  ;;  %3370 = vadd.xlane.f32.xlu1 %v3337_v9 }
 0x5bf   : > { %4930 = vpow2.f32 %v3282_v6 }
 0x5c3   : > { %v4925_v17 = vpop.eup %4924 }
 0x5c4   : > { %v3197_v31 = vpop.xlane.xlu0 %3196  ;;  %v3342_v7 = vsel %vm3143_vm1, %v4925_v17, 0.0 }
 0x5c5   : > { %v4927_v10 = vpop.eup %4926  ;;  %v6553_v48 = vsub.f32 %v6367_v34, %v3197_v31  ;;  %3380 = vadd.xlane.f32.xlu0 %v3342_v7 }
 0x5c6   : > { %v3199_v56 = vpop.xlane.xlu1 %3198  ;;  %v3343_v16 = vsel %vm3143_vm1, %v4927_v10, 0.0 }
 0x5c7   : > { %v4929_v38 = vpop.eup %4928  ;;  %v3292_v47 = vmul.f32 1.442695, %v6553_v48  ;;  %v6559_v24 = vsub.f32 %v6373_v33, %v3199_v56  ;;  %3382 = vadd.xlane.f32.xlu1 %v3343_v16 }
 0x5c8   : > { %v3193_v27 = vpop.xlane.xlu0 %3192  ;;  %v3340_v28 = vsel %vm3143_vm1, %v4929_v38, 0.0 }
 0x5c9   : > { %v4931_v30 = vpop.eup %4930  ;;  %4932 = vpow2.f32 %v3292_v47  ;;  %v3294_v34 = vmul.f32 1.442695, %v6559_v24  ;;  %v6565_v49 = vsub.f32 %v6370_v15, %v3193_v27  ;;  %3376 = vadd.xlane.f32.xlu0 %v3340_v28 }
 0x5ca   : > { %v3195_v5 = vpop.xlane.xlu1 %3194  ;;  %v3341_v3 = vsel %vm3143_vm1, %v4931_v30, 0.0 }
 0x5cb   : > { %4934 = vpow2.f32 %v3294_v34  ;;  %v3288_v33 = vmul.f32 1.442695, %v6565_v49  ;;  %v6571_v14 = vsub.f32 %v6379_v1, %v3195_v5  ;;  %3378 = vadd.xlane.f32.xlu1 %v3341_v3 }
 0x5cd   : > { %4936 = vpow2.f32 %v3288_v33  ;;  %v3290_v26 = vmul.f32 1.442695, %v6571_v14 }
 0x5cf   : > { %4938 = vpow2.f32 %v3290_v26 }
 0x5d3   : > { %v4933_v54 = vpop.eup %4932 }
 0x5d4   : > { %v3205_v52 = vpop.xlane.xlu0 %3204  ;;  %v3346_v15 = vsel %vm3143_vm1, %v4933_v54, 0.0 }
 0x5d5   : > { %v4935_v45 = vpop.eup %4934  ;;  %v6577_v25 = vsub.f32 %v6391_v12, %v3205_v52  ;;  %3388 = vadd.xlane.f32.xlu0 %v3346_v15 }
 0x5d6   : > { %v3207_v59 = vpop.xlane.xlu1 %3206  ;;  %v3347_v1 = vsel %vm3143_vm1, %v4935_v45, 0.0 }
 0x5d7   : > { %v4937_v55 = vpop.eup %4936  ;;  %v3300_v60 = vmul.f32 1.442695, %v6577_v25  ;;  %v6583_v36 = vsub.f32 %v6397_v23, %v3207_v59  ;;  %3390 = vadd.xlane.f32.xlu1 %v3347_v1 }
 0x5d8   : > { %v3201_v50 = vpop.xlane.xlu0 %3200  ;;  %v3344_v51 = vsel %vm3143_vm1, %v4937_v55, 0.0 }
 0x5d9   : > { %v4939_v58 = vpop.eup %4938  ;;  %4940 = vpow2.f32 %v3300_v60  ;;  %v3302_v12 = vmul.f32 1.442695, %v6583_v36  ;;  %v6589_v9 = vsub.f32 %v6394_v61, %v3201_v50  ;;  %3384 = vadd.xlane.f32.xlu0 %v3344_v51 }
 0x5da   : > { %v3203_v6 = vpop.xlane.xlu1 %3202  ;;  %v3345_v17 = vsel %vm3143_vm1, %v4939_v58, 0.0 }
 0x5db   : > { %4942 = vpow2.f32 %v3302_v12  ;;  %v3296_v23 = vmul.f32 1.442695, %v6589_v9  ;;  %v6595_v31 = vsub.f32 %v6403_v19, %v3203_v6  ;;  %3386 = vadd.xlane.f32.xlu1 %v3345_v17 }
 0x5dd   : > { %4944 = vpow2.f32 %v3296_v23  ;;  %v3298_v7 = vmul.f32 1.442695, %v6595_v31 }
 0x5df   : > { %4946 = vpow2.f32 %v3298_v7 }
 0x5e3   : > { %v4941_v10 = vpop.eup %4940 }
 0x5e4   : > { %v3213_v56 = vpop.xlane.xlu0 %3212  ;;  %v3350_v61 = vsel %vm3143_vm1, %v4941_v10, 0.0 }
 0x5e5   : > { %v4943_v16 = vpop.eup %4942  ;;  %v6601_v38 = vsub.f32 %v6415_v13, %v3213_v56  ;;  %3396 = vadd.xlane.f32.xlu0 %v3350_v61 }
 0x5e6   : > { %v3215_v47 = vpop.xlane.xlu1 %3214  ;;  %v3351_v19 = vsel %vm3143_vm1, %v4943_v16, 0.0 }
 0x5e7   : > { %v4945_v27 = vpop.eup %4944  ;;  %v3308_v28 = vmul.f32 1.442695, %v6601_v38  ;;  %v6607_v30 = vsub.f32 %v6421_v21, %v3215_v47  ;;  %3398 = vadd.xlane.f32.xlu1 %v3351_v19 }
 0x5e8   : > { %v3209_v34 = vpop.xlane.xlu0 %3208  ;;  %v3348_v5 = vsel %vm3143_vm1, %v4945_v27, 0.0 }
 0x5e9   : > { %v4947_v3 = vpop.eup %4946  ;;  %4948 = vpow2.f32 %v3308_v28  ;;  %v3310_v13 = vmul.f32 1.442695, %v6607_v30  ;;  %v6613_v33 = vsub.f32 %v6418_v42, %v3209_v34  ;;  %3392 = vadd.xlane.f32.xlu0 %v3348_v5 }
 0x5ea   : > { %v3211_v26 = vpop.xlane.xlu1 %3210  ;;  %v3349_v54 = vsel %vm3143_vm1, %v4947_v3, 0.0 }
 0x5eb   : > { %4950 = vpow2.f32 %v3310_v13  ;;  %v3304_v21 = vmul.f32 1.442695, %v6613_v33  ;;  %v6619_v52 = vsub.f32 %v6427_v22, %v3211_v26  ;;  %3394 = vadd.xlane.f32.xlu1 %v3349_v54 }
 0x5ed   : > { %4952 = vpow2.f32 %v3304_v21  ;;  %v3306_v15 = vmul.f32 1.442695, %v6619_v52 }
 0x5ef   : > { %4954 = vpow2.f32 %v3306_v15 }
 0x5f3   : > { %v4949_v45 = vpop.eup %4948 }
 0x5f4   : > { %v3221_v59 = vpop.xlane.xlu0 %3220  ;;  %v3354_v42 = vsel %vm3143_vm1, %v4949_v45, 0.0 }
 0x5f5   : > { %v4951_v1 = vpop.eup %4950  ;;  %v6625_v55 = vsub.f32 %v6439_v37, %v3221_v59  ;;  %3404 = vadd.xlane.f32.xlu0 %v3354_v42 }
 0x5f6   : > { %v3223_v60 = vpop.xlane.xlu1 %3222  ;;  %v3355_v22 = vsel %vm3143_vm1, %v4951_v1, 0.0 }
 0x5f7   : > { %v4953_v50 = vpop.eup %4952  ;;  %v3316_v51 = vmul.f32 1.442695, %v6625_v55  ;;  %v6631_v58 = vsub.f32 %v6445_v35, %v3223_v60  ;;  %3406 = vadd.xlane.f32.xlu1 %v3355_v22 }
 0x5f8   : > { %v3217_v12 = vpop.xlane.xlu0 %3216  ;;  %v3352_v6 = vsel %vm3143_vm1, %v4953_v50, 0.0 }
 0x5f9   : > { %v4955_v17 = vpop.eup %4954  ;;  %4956 = vpow2.f32 %v3316_v51  ;;  %v3318_v37 = vmul.f32 1.442695, %v6631_v58  ;;  %v6637_v23 = vsub.f32 %v6442_v0, %v3217_v12  ;;  %3400 = vadd.xlane.f32.xlu0 %v3352_v6 }
 0x5fa   : > { %v3219_v7 = vpop.xlane.xlu1 %3218  ;;  %v3353_v10 = vsel %vm3143_vm1, %v4955_v17, 0.0 }
 0x5fb   : > { %4958 = vpow2.f32 %v3318_v37  ;;  %v3312_v35 = vmul.f32 1.442695, %v6637_v23  ;;  %v6643_v56 = vsub.f32 %v6451_v44, %v3219_v7  ;;  %3402 = vadd.xlane.f32.xlu1 %v3353_v10 }
 0x5fd   : > { %4960 = vpow2.f32 %v3312_v35  ;;  %v3314_v61 = vmul.f32 1.442695, %v6643_v56 }
 0x5ff   : > { %4962 = vpow2.f32 %v3314_v61 }
 0x603   : > { %v4957_v16 = vpop.eup %4956 }
 0x604   : > { %v3229_v47 = vpop.xlane.xlu0 %3228  ;;  %v3358_v0 = vsel %vm3143_vm1, %v4957_v16, 0.0 }
 0x605   : > { %v4959_v19 = vpop.eup %4958  ;;  %v6649_v27 = vsub.f32 %v6463_v29, %v3229_v47  ;;  %3412 = vadd.xlane.f32.xlu0 %v3358_v0 }
 0x606   : > { %v3231_v28 = vpop.xlane.xlu1 %3230  ;;  %v3359_v44 = vsel %vm3143_vm1, %v4959_v19, 0.0 }
 0x607   : > { %v4961_v34 = vpop.eup %4960  ;;  %v3324_v5 = vmul.f32 1.442695, %v6649_v27  ;;  %v6655_v3 = vsub.f32 %v6469_v39, %v3231_v28  ;;  %3414 = vadd.xlane.f32.xlu1 %v3359_v44 }
 0x608   : > { %v3225_v13 = vpop.xlane.xlu0 %3224  ;;  %v3356_v26 = vsel %vm3143_vm1, %v4961_v34, 0.0 }
 0x609   : > { %v4963_v54 = vpop.eup %4962  ;;  %4964 = vpow2.f32 %v3324_v5  ;;  %v3326_v29 = vmul.f32 1.442695, %v6655_v3  ;;  %v6661_v21 = vsub.f32 %v6466_v53, %v3225_v13  ;;  %3408 = vadd.xlane.f32.xlu0 %v3356_v26 }
 0x60a   : > { %v3227_v15 = vpop.xlane.xlu1 %3226  ;;  %v3357_v45 = vsel %vm3143_vm1, %v4963_v54, 0.0 }
 0x60b   : > { %4966 = vpow2.f32 %v3326_v29  ;;  %v3320_v39 = vmul.f32 1.442695, %v6661_v21  ;;  %v6667_v59 = vsub.f32 %v6475_v40, %v3227_v15  ;;  %3410 = vadd.xlane.f32.xlu1 %v3357_v45 }
 0x60d   : > { %4968 = vpow2.f32 %v3320_v39  ;;  %v3322_v42 = vmul.f32 1.442695, %v6667_v59 }
 0x60f   : > { %4970 = vpow2.f32 %v3322_v42 }
 0x613   : > { %v4965_v1 = vpop.eup %4964 }
 0x614   : > { %v3362_v53 = vsel %vm3143_vm1, %v4965_v1, 0.0 }
 0x615   : > { %v4967_v60 = vpop.eup %4966  ;;  %3420 = vadd.xlane.f32.xlu0 %v3362_v53  ;;  %v3233_v22 = vpop.xlane.xlu0 %3232 }
 0x616   : > { %v6673_v50 = vsub.f32 %v6487_v8, %v3233_v22  ;;  %v3363_v51 = vsel %vm3143_vm1, %v4967_v60, 0.0 }
 0x617   : > { %v4969_v40 = vpop.eup %4968  ;;  %v3235_v12 = vpop.xlane.xlu1 %3234  ;;  %3422 = vadd.xlane.f32.xlu1 %v3363_v51 }
 0x618   : > { %v3328_v6 = vmul.f32 1.442695, %v6673_v50  ;;  %v6679_v17 = vsub.f32 %v6493_v46, %v3235_v12  ;;  %v3360_v37 = vsel %vm3143_vm1, %v4969_v40, 0.0 }
 0x619   : > { %v4971_v7 = vpop.eup %4970  ;;  %3416 = vadd.xlane.f32.xlu0 %v3360_v37  ;;  %v3237_v10 = vpop.xlane.xlu0 %3236 }
 0x61a   : > { %4972 = vpow2.f32 %v3328_v6  ;;  %v3330_v8 = vmul.f32 1.442695, %v6679_v17  ;;  %v6685_v35 = vsub.f32 %v6490_v11, %v3237_v10  ;;  %v3361_v61 = vsel %vm3143_vm1, %v4971_v7, 0.0 }
 0x61b   : > { %v3239_v16 = vpop.xlane.xlu1 %3238  ;;  %3418 = vadd.xlane.f32.xlu1 %v3361_v61 }
 0x61c   : > { %4974 = vpow2.f32 %v3330_v8  ;;  %v3332_v46 = vmul.f32 1.442695, %v6685_v35  ;;  %v6691_v47 = vsub.f32 %v6499_v20, %v3239_v16 }
 0x61e   : > { %4976 = vpow2.f32 %v3332_v46  ;;  %v3334_v0 = vmul.f32 1.442695, %v6691_v47 }
 0x620   : > { %4978 = vpow2.f32 %v3334_v0 }
 0x624   : > { %v4973_v19 = vpop.eup %4972 }
 0x625   : > { %v3364_v11 = vsel %vm3143_vm1, %v4973_v19, 0.0 }
 0x626   : > { %v4975_v28 = vpop.eup %4974  ;;  %3424 = vadd.xlane.f32.xlu0 %v3364_v11 }
 0x627   : > { %v3365_v44 = vsel %vm3143_vm1, %v4975_v28, 0.0 }
 0x628   : > { %v4977_v34 = vpop.eup %4976  ;;  %3426 = vadd.xlane.f32.xlu1 %v3365_v44 }
 0x629   : > { %v3366_v20 = vsel %vm3143_vm1, %v4977_v34, 0.0 }
 0x62a   : > { %v4979_v5 = vpop.eup %4978  ;;  %3428 = vadd.xlane.f32.xlu0 %v3366_v20 }
 0x62b   : > { %v3367_v13 = vsel %vm3143_vm1, %v4979_v5, 0.0 }
 0x62c   : > { %3430 = vadd.xlane.f32.xlu1 %v3367_v13 }
 0x642   : > { %v3373_v26 = vpop.xlane.xlu0 %3372 }
 0x643   : > { %4980 = vlog2.f32 %v3373_v26 }
 0x646   : > { %v3375_v54 = vpop.xlane.xlu1 %3374  ;;  %v3369_v29 = vpop.xlane.xlu0 %3368 }
 0x647   : > { %4982 = vlog2.f32 %v3375_v54 }
 0x648   : > { %4984 = vlog2.f32 %v3369_v29 }
 0x64a   : > { %v3371_v15 = vpop.xlane.xlu1 %3370 }
 0x64b   : > { %4986 = vlog2.f32 %v3371_v15 }
 0x64d   : > { %v4981_v45 = vpop.eup %4980 }
 0x64e   : > { %v3437_v39 = vmul.f32 0.6931472, %v4981_v45 }
 0x650   : > { %v3498_v42 = vsub.f32 %v6511_v41, %v3437_v39 }
 0x651   : > { %v4983_v1 = vpop.eup %4982 }
 0x652   : > { %v4985_v53 = vpop.eup %4984  ;;  %3530 = vst [vmem:[%s6704_s3 + $0x10] sm:$0xff] %v3498_v42  ;;  %v3439_v63 = vmul.f32 0.6931472, %v4983_v1  ;;  %v3381_v60 = vpop.xlane.xlu0 %3380 }
 0x653   : > { %v3433_v22 = vmul.f32 0.6931472, %v4985_v53  ;;  %4988 = vlog2.f32 %v3381_v60 }
 0x654   : > { %v3499_v51 = vsub.f32 %v6519_v43, %v3439_v63  ;;  %v3383_v40 = vpop.xlane.xlu1 %3382 }
 0x655   : > { %v4987_v12 = vpop.eup %4986  ;;  %v3496_v6 = vsub.f32 %v6514_v4, %v3433_v22  ;;  %4990 = vlog2.f32 %v3383_v40 }
 0x656   : > { %3531 = vst [vmem:[%s6704_s3 + $0x18] sm:$0xff] %v3499_v51  ;;  %v3435_v41 = vmul.f32 0.6931472, %v4987_v12  ;;  %v3377_v37 = vpop.xlane.xlu0 %3376 }
 0x657   : > { %3528 = vst [vmem:[%s6704_s3] sm:$0xff] %v3496_v6  ;;  %4992 = vlog2.f32 %v3377_v37 }
 0x658   : > { %v3497_v7 = vsub.f32 %v6522_v62, %v3435_v41  ;;  %v3379_v10 = vpop.xlane.xlu1 %3378 }
 0x659   : > { %4994 = vlog2.f32 %v3379_v10 }
 0x65a   : > { %3529 = vst [vmem:[%s6704_s3 + $0x8] sm:$0xff] %v3497_v7 }
 0x65d   : > { %v4989_v8 = vpop.eup %4988 }
 0x65e   : > { %v3445_v61 = vmul.f32 0.6931472, %v4989_v8 }
 0x65f   : > { %v4991_v43 = vpop.eup %4990 }
 0x660   : > { %v3502_v16 = vsub.f32 %v6529_v18, %v3445_v61  ;;  %v3447_v4 = vmul.f32 0.6931472, %v4991_v43 }
 0x661   : > { %v4993_v46 = vpop.eup %4992 }
 0x662   : > { %3534 = vst [vmem:[%s6704_s3 + $0x30] sm:$0xff] %v3502_v16  ;;  %v3503_v0 = vsub.f32 %v6533_v32, %v3447_v4  ;;  %v3441_v19 = vmul.f32 0.6931472, %v4993_v46  ;;  %v3389_v11 = vpop.xlane.xlu0 %3388 }
 0x663   : > { %v4995_v28 = vpop.eup %4994  ;;  %4996 = vlog2.f32 %v3389_v11 }
 0x664   : > { %3535 = vst [vmem:[%s6704_s3 + $0x38] sm:$0xff] %v3503_v0  ;;  %v3500_v62 = vsub.f32 %v6541_v57, %v3441_v19  ;;  %v3443_v44 = vmul.f32 0.6931472, %v4995_v28  ;;  %v3391_v34 = vpop.xlane.xlu1 %3390 }
 0x665   : > { %4998 = vlog2.f32 %v3391_v34 }
 0x666   : > { %3532 = vst [vmem:[%s6704_s3 + $0x20] sm:$0xff] %v3500_v62  ;;  %v3501_v18 = vsub.f32 %v6545_v2, %v3443_v44  ;;  %v3385_v20 = vpop.xlane.xlu0 %3384 }
 0x667   : > { %5000 = vlog2.f32 %v3385_v20 }
 0x668   : > { %3533 = vst [vmem:[%s6704_s3 + $0x28] sm:$0xff] %v3501_v18  ;;  %v3387_v5 = vpop.xlane.xlu1 %3386 }
 0x669   : > { %5002 = vlog2.f32 %v3387_v5 }
 0x66d   : > { %v4997_v32 = vpop.eup %4996 }
 0x66e   : > { %v3453_v13 = vmul.f32 0.6931472, %v4997_v32 }
 0x66f   : > { %v4999_v26 = vpop.eup %4998 }
 0x670   : > { %v3506_v54 = vsub.f32 %v6553_v48, %v3453_v13  ;;  %v3455_v57 = vmul.f32 0.6931472, %v4999_v26 }
 0x671   : > { %v5001_v29 = vpop.eup %5000 }
 0x672   : > { %3538 = vst [vmem:[%s6704_s3 + $0x50] sm:$0xff] %v3506_v54  ;;  %v3507_v15 = vsub.f32 %v6559_v24, %v3455_v57  ;;  %v3449_v45 = vmul.f32 0.6931472, %v5001_v29  ;;  %v3397_v2 = vpop.xlane.xlu0 %3396 }
 0x673   : > { %v5003_v39 = vpop.eup %5002  ;;  %5004 = vlog2.f32 %v3397_v2 }
 0x674   : > { %3539 = vst [vmem:[%s6704_s3 + $0x58] sm:$0xff] %v3507_v15  ;;  %v3504_v42 = vsub.f32 %v6565_v49, %v3449_v45  ;;  %v3451_v1 = vmul.f32 0.6931472, %v5003_v39  ;;  %v3399_v53 = vpop.xlane.xlu1 %3398 }
 0x675   : > { %5006 = vlog2.f32 %v3399_v53 }
 0x676   : > { %3536 = vst [vmem:[%s6704_s3 + $0x40] sm:$0xff] %v3504_v42  ;;  %v3505_v48 = vsub.f32 %v6571_v14, %v3451_v1  ;;  %v3393_v63 = vpop.xlane.xlu0 %3392 }
 0x677   : > { %5008 = vlog2.f32 %v3393_v63 }
 0x678   : > { %3537 = vst [vmem:[%s6704_s3 + $0x48] sm:$0xff] %v3505_v48  ;;  %v3395_v60 = vpop.xlane.xlu1 %3394 }
 0x679   : > { %5010 = vlog2.f32 %v3395_v60 }
 0x67d   : > { %v5005_v24 = vpop.eup %5004 }
 0x67e   : > { %v3461_v22 = vmul.f32 0.6931472, %v5005_v24 }
 0x67f   : > { %v5007_v51 = vpop.eup %5006 }
 0x680   : > { %v3510_v40 = vsub.f32 %v6577_v25, %v3461_v22  ;;  %v3463_v49 = vmul.f32 0.6931472, %v5007_v51 }
 0x681   : > { %v5009_v12 = vpop.eup %5008 }
 0x682   : > { %3542 = vst [vmem:[%s6704_s3 + $0x70] sm:$0xff] %v3510_v40  ;;  %v3511_v6 = vsub.f32 %v6583_v36, %v3463_v49  ;;  %v3457_v41 = vmul.f32 0.6931472, %v5009_v12  ;;  %v3405_v14 = vpop.xlane.xlu0 %3404 }
 0x683   : > { %v5011_v37 = vpop.eup %5010  ;;  %5012 = vlog2.f32 %v3405_v14 }
 0x684   : > { %3543 = vst [vmem:[%s6704_s3 + $0x78] sm:$0xff] %v3511_v6  ;;  %v3508_v7 = vsub.f32 %v6589_v9, %v3457_v41  ;;  %v3459_v10 = vmul.f32 0.6931472, %v5011_v37  ;;  %v3407_v8 = vpop.xlane.xlu1 %3406 }
 0x685   : > { %5014 = vlog2.f32 %v3407_v8 }
 0x686   : > { %3540 = vst [vmem:[%s6704_s3 + $0x60] sm:$0xff] %v3508_v7  ;;  %v3509_v25 = vsub.f32 %v6595_v31, %v3459_v10  ;;  %v3401_v61 = vpop.xlane.xlu0 %3400 }
 0x687   : > { %5016 = vlog2.f32 %v3401_v61 }
 0x688   : > { %3541 = vst [vmem:[%s6704_s3 + $0x68] sm:$0xff] %v3509_v25  ;;  %v3403_v43 = vpop.xlane.xlu1 %3402 }
 0x689   : > { %5018 = vlog2.f32 %v3403_v43 }
 0x68d   : > { %v5013_v36 = vpop.eup %5012 }
 0x68e   : > { %v3469_v16 = vmul.f32 0.6931472, %v5013_v36 }
 0x68f   : > { %v5015_v4 = vpop.eup %5014 }
 0x690   : > { %v3514_v46 = vsub.f32 %v6601_v38, %v3469_v16  ;;  %v3471_v9 = vmul.f32 0.6931472, %v5015_v4 }
 0x691   : > { %v5017_v0 = vpop.eup %5016 }
 0x692   : > { %3546 = vst [vmem:[%s6704_s3 + $0x90] sm:$0xff] %v3514_v46  ;;  %v3515_v19 = vsub.f32 %v6607_v30, %v3471_v9  ;;  %v3465_v11 = vmul.f32 0.6931472, %v5017_v0  ;;  %v3413_v31 = vpop.xlane.xlu0 %3412 }
 0x693   : > { %v5019_v28 = vpop.eup %5018  ;;  %5020 = vlog2.f32 %v3413_v31 }
 0x694   : > { %3547 = vst [vmem:[%s6704_s3 + $0x98] sm:$0xff] %v3515_v19  ;;  %v3512_v62 = vsub.f32 %v6613_v33, %v3465_v11  ;;  %v3467_v44 = vmul.f32 0.6931472, %v5019_v28  ;;  %v3415_v34 = vpop.xlane.xlu1 %3414 }
 0x695   : > { %5022 = vlog2.f32 %v3415_v34 }
 0x696   : > { %3544 = vst [vmem:[%s6704_s3 + $0x80] sm:$0xff] %v3512_v62  ;;  %v3513_v38 = vsub.f32 %v6619_v52, %v3467_v44  ;;  %v3409_v18 = vpop.xlane.xlu0 %3408 }
 0x697   : > { %5024 = vlog2.f32 %v3409_v18 }
 0x698   : > { %3545 = vst [vmem:[%s6704_s3 + $0x88] sm:$0xff] %v3513_v38  ;;  %v3411_v20 = vpop.xlane.xlu1 %3410 }
 0x699   : > { %5026 = vlog2.f32 %v3411_v20 }
 0x69d   : > { %v5021_v30 = vpop.eup %5020 }
 0x69e   : > { %v3477_v5 = vmul.f32 0.6931472, %v5021_v30 }
 0x69f   : > { %v5023_v32 = vpop.eup %5022 }
 0x6a0   : > { %v3518_v13 = vsub.f32 %v6625_v55, %v3477_v5  ;;  %v3479_v33 = vmul.f32 0.6931472, %v5023_v32 }
 0x6a1   : > { %v5025_v26 = vpop.eup %5024 }
 0x6a2   : > { %3550 = vst [vmem:[%s6704_s3 + $0xb0] sm:$0xff] %v3518_v13  ;;  %v3519_v54 = vsub.f32 %v6631_v58, %v3479_v33  ;;  %v3473_v57 = vmul.f32 0.6931472, %v5025_v26  ;;  %v3421_v52 = vpop.xlane.xlu0 %3420 }
 0x6a3   : > { %v5027_v29 = vpop.eup %5026  ;;  %5028 = vlog2.f32 %v3421_v52 }
 0x6a4   : > { %3551 = vst [vmem:[%s6704_s3 + $0xb8] sm:$0xff] %v3519_v54  ;;  %v3516_v15 = vsub.f32 %v6637_v23, %v3473_v57  ;;  %v3475_v45 = vmul.f32 0.6931472, %v5027_v29  ;;  %v3423_v2 = vpop.xlane.xlu1 %3422 }
 0x6a5   : > { %5030 = vlog2.f32 %v3423_v2 }
 0x6a6   : > { %3548 = vst [vmem:[%s6704_s3 + $0xa0] sm:$0xff] %v3516_v15  ;;  %v3517_v55 = vsub.f32 %v6643_v56, %v3475_v45  ;;  %v3417_v39 = vpop.xlane.xlu0 %3416 }
 0x6a7   : > { %5032 = vlog2.f32 %v3417_v39 }
 0x6a8   : > { %3549 = vst [vmem:[%s6704_s3 + $0xa8] sm:$0xff] %v3517_v55  ;;  %v3419_v42 = vpop.xlane.xlu1 %3418 }
 0x6a9   : > { %5034 = vlog2.f32 %v3419_v42 }
 0x6ad   : > { %v5029_v58 = vpop.eup %5028 }
 0x6ae   : > { %v3485_v1 = vmul.f32 0.6931472, %v5029_v58 }
 0x6af   : > { %v5031_v53 = vpop.eup %5030 }
 0x6b0   : > { %v3522_v48 = vsub.f32 %v6649_v27, %v3485_v1  ;;  %v3487_v23 = vmul.f32 0.6931472, %v5031_v53 }
 0x6b1   : > { %v5033_v63 = vpop.eup %5032 }
 0x6b2   : > { %3554 = vst [vmem:[%s6704_s3 + $0xd0] sm:$0xff] %v3522_v48  ;;  %v3523_v60 = vsub.f32 %v6655_v3, %v3487_v23  ;;  %v3481_v24 = vmul.f32 0.6931472, %v5033_v63 }
 0x6b3   : > { %v5035_v56 = vpop.eup %5034  ;;  %v3425_v22 = vpop.xlane.xlu0 %3424 }
 0x6b4   : > { %3555 = vst [vmem:[%s6704_s3 + $0xd8] sm:$0xff] %v3523_v60  ;;  %v3520_v51 = vsub.f32 %v6661_v21, %v3481_v24  ;;  %v3483_v40 = vmul.f32 0.6931472, %v5035_v56  ;;  %5036 = vlog2.f32 %v3425_v22 }
 0x6b5   : > { %v3427_v49 = vpop.xlane.xlu1 %3426 }
 0x6b6   : > { %3552 = vst [vmem:[%s6704_s3 + $0xc0] sm:$0xff] %v3520_v51  ;;  %v3521_v12 = vsub.f32 %v6667_v59, %v3483_v40  ;;  %5038 = vlog2.f32 %v3427_v49 }
 0x6b7   : > { %v3429_v27 = vpop.xlane.xlu0 %3428 }
 0x6b8   : > { %3553 = vst [vmem:[%s6704_s3 + $0xc8] sm:$0xff] %v3521_v12  ;;  %5040 = vlog2.f32 %v3429_v27 }
 0x6b9   : > { %v3431_v3 = vpop.xlane.xlu1 %3430 }
 0x6ba   : > { %5042 = vlog2.f32 %v3431_v3 }
 0x6be   : > { %v5037_v6 = vpop.eup %5036 }
 0x6bf   : > { %v3489_v41 = vmul.f32 0.6931472, %v5037_v6 }
 0x6c0   : > { %v5039_v21 = vpop.eup %5038 }
 0x6c1   : > { %v3524_v14 = vsub.f32 %v6673_v50, %v3489_v41  ;;  %v3491_v37 = vmul.f32 0.6931472, %v5039_v21 }
 0x6c2   : > { %v5041_v7 = vpop.eup %5040 }
 0x6c3   : > { %3556 = vst [vmem:[%s6704_s3 + $0xe0] sm:$0xff] %v3524_v14  ;;  %v3525_v59 = vsub.f32 %v6679_v17, %v3491_v37  ;;  %v3493_v10 = vmul.f32 0.6931472, %v5041_v7 }
 0x6c4   : > { %v5043_v8 = vpop.eup %5042 }
 0x6c5   : > { %3557 = vst [vmem:[%s6704_s3 + $0xe8] sm:$0xff] %v3525_v59  ;;  %v3526_v25 = vsub.f32 %v6685_v35, %v3493_v10  ;;  %v3495_v61 = vmul.f32 0.6931472, %v5043_v8 }
 0x6c7   : > { %3558 = vst [vmem:[%s6704_s3 + $0xf0] sm:$0xff] %v3526_v25  ;;  %v3527_v50 = vsub.f32 %v6691_v47, %v3495_v61 }
 0x6c9   : > { %3559 = vst [vmem:[%s6704_s3 + $0xf8] sm:$0xff] %v3527_v50 }
 0x6ca   : > { %5283 = shalt.err (!%p5280_p10)
}
 0x6cb   : > { %s5284_s2 = scalar_lea.hbm %s6771_s16, 4096  ;;  %s5288_s14 = scalar_lea.hbm %s6828_s9, 16384 }
 0x6cc   : > { %p5285_p11 = scmp.ne.s32.totalorder %s6771_s16, %s5284_s2  ;;  %p5289_p8 = scmp.lt.u32.totalorder %s6771_s16, %s6828_s9 }
 0x6cd   : > { %p5290_p6 = scmp.lt.u32.totalorder %s5288_s14, %s5284_s2  ;;  %p5292_p12 = scmp.lt.u32.totalorder %s5284_s2, %s6771_s16 }
 0x6ce   : > { %p5286_p3 = pnand %p5285_p11, %p6855_p1 }
 0x6cf   : > { %p5291_p9 = por %p5290_p6, %p5289_p8 }
 0x6d0   : > { %p5287_p4 = pneg %p5286_p3 }
 0x6d1   : > { %p5293_p13 = por %p5292_p12, %p5291_p9 }
 0x6d3   : > { %p5294_p0 = pnand %p5293_p13, %p5287_p4 }
 0x6d5   : > { %5297 = shalt.err (!%p5294_p0)
}
 0x6d6   : > { %s5367_s20 = smov 128   ;;  %s5368_s24 = smov 8  }
 0x6d7   : > { %4595 = dma.vmem_to_hbm [thread:$0]  (%p6855_p1), %s6773_s27, 4096, %s6771_s16, %s3561_s15, %s5367_s20, %s5367_s20, %s5368_s24  }
 0x6d8 PF: > { %p4642_p2 = scmp.ge.s32.totalorder %s5352_s12, 2  ;;  %s3589_s22 = sand.u32 1, %s5340_s30  }
 0x6d9   : > { %p6856_p7 = scmp.ne.s32.totalorder %s6844_s18, 0  ;;  %s3590_s23 = scalar_lea.sflag [#allocation4], %s3589_s22 }
 0x6db   : > { %p4624_p5 = pnand %p4642_p2, %p6856_p7 }
 0x6dd   : > { %5335 = dma.done.wait (!%p4624_p5), %s3590_s23, 4096  }
 0x6de   : > { %5337 = vsyncadd (!%p4624_p5), %s3590_s23, 4294963200  ;;  %p26_p10 = scmp.ge.s32.totalorder %s5634_s21, 6   ;;  %s6857_s30 = smov %s5344_s10 }
 0x6df   : > { %s6858_s10 = smov %s5348_s11  ;;  %s6859_s11 = smov %s5646_s19 }
 0x6e0   : > { %s6860_s12 = smov %s5634_s21  ;;  %28 = sbr.rel (!%p26_p10) target bundleno = 13 (0xd), region = 129 }
 0x6e7   :  { %3595 = vsyncpa [#allocation3], 1 }
 0x6e8   :  { %3597 = vsyncpa [#allocation3 + $0x1], 1 }
 0x6e9   :  { %3598 = vsyncpa [#allocation6], 1 }
 0x6ea   :  { %3599 = vsyncpa [#allocation9], 1 }
 0x6eb   :  { %3600 = vsyncpa [#allocation12], 1 }
 0x6ec   :  { %3601 = vsyncpa [#allocation15], 1 }
 0x6ed   :  { %3602 = vsyncpa [#allocation4], 1 }
 0x6ee   :  { %3604 = vsyncpa [#allocation4 + $0x1], 1 }

</bundles_post_ra>
